<compile_context>
chip_gen: v7x
topology: tpu7x:2x2x1
jax: 0.10.0
libtpu: 0.0.40
codegen_flags: <defaults>
</compile_context>

<pallas_src>
import math
import functools

import jax
import jax.numpy as jnp
from jax import lax
from jax.experimental import pallas as pl
from jax.experimental.pallas import tpu as pltpu


# --------------------------- in-kernel building blocks ----------------------

def _dot(a, b):
    return jnp.dot(a, b, preferred_element_type=jnp.float32)


def _layernorm(x, g, b):
    mu = jnp.mean(x, axis=-1, keepdims=True)
    var = jnp.mean(jnp.square(x - mu), axis=-1, keepdims=True)
    return (x - mu) * lax.rsqrt(var + 1e-5) * g + b


def _softmax(s):
    s = s - jnp.max(s, axis=-1, keepdims=True)
    p = jnp.exp(s)
    return p / jnp.sum(p, axis=-1, keepdims=True)   # exact divide (torch parity)


def _ffn(x, w1, b1, w2, b2):
    h = jnp.maximum(_dot(x, w1) + b1, 0.0)          # ReLUDropout(eval) == relu
    return _dot(h, w2) + b2


def _param(slab_ref, spec):
    r0, r, c = spec                                  # static row offset / extent
    return slab_ref[r0:r0 + r, :c]


# ------------------------------ fused kernel --------------------------------

def _perceiver_kernel(x_ref, slab_ref, o_ref, *, off, cfg):
    P = lambda name: _param(slab_ref, off[name])

    S = cfg['seq']
    dm = cfg['d_model']
    lq = cfg['out_len']
    H = cfg['enc_nhead']
    hd = dm // H

    # ---- Fourier positional encoding + input LayerNorm (fused in-kernel) ----
    x_d = lax.broadcasted_iota(jnp.int32, (S, 1), 0).astype(jnp.float32)
    x_d = x_d * (2.0 / (S - 1)) - 1.0                       # linspace(-1, 1, S)
    ang = x_d * P('freqs')                                  # (S, num_bands)
    mem = jnp.concatenate(
        [x_ref[...].astype(jnp.float32), jnp.sin(ang), jnp.cos(ang), x_d],
        axis=-1)                                            # (S, d_kv)
    mem = _layernorm(mem, P('norm_g'), P('norm_b'))

    # ---- decoder K / V depend only on `mem`: hoist out of the cross-attn loop
    k = _dot(mem, P('d_wk')) + P('d_bk')                    # (S, dm)
    v = _dot(mem, P('d_wv')) + P('d_bv')                    # (S, dm)
    kT = k.T                                                # single transpose, reused

    q = P('query')                                          # (lq, dm), per-batch copy

    for _ in range(cfg['num_cross_attn']):
        # ---------- cross-attention decoder layer (nhead = 1) ----------
        x1 = _layernorm(q, P('d_n1g'), P('d_n1b'))
        qp = _dot(x1, P('d_wq')) + P('d_bq')                # 1/sqrt(hd) pre-folded
        pm = _softmax(_dot(qp, kT))                         # (lq, S)
        ctx = _dot(pm, v)
        q = q + _dot(ctx, P('d_wo')) + P('d_bo')
        x2 = _layernorm(q, P('d_n2g'), P('d_n2b'))
        q = q + _ffn(x2, P('d_w1'), P('d_b1'), P('d_w2'), P('d_b2'))

        # ---------- self-attention encoder layers ----------
        for e in range(cfg['n_enc']):
            pre = f'e{e}_'
            x1 = _layernorm(q, P(pre + 'n1g'), P(pre + 'n1b'))
            qkv = _dot(x1, P(pre + 'wqkv')) + P(pre + 'bqkv')   # fused QKV, Q pre-scaled
            kT_l = qkv[:, dm:2 * dm].T                          # one transpose / layer
            # per-head scores stacked along sublanes -> one batched softmax pass
            s = jnp.concatenate(
                [_dot(qkv[:, h * hd:(h + 1) * hd], kT_l[h * hd:(h + 1) * hd, :])
                 for h in range(H)], axis=0)                    # (H*lq, lq)
            pm = _softmax(s)
            # head concat folded into the output projection (no lane concat)
            wo = P(pre + 'wo')
            attn = P(pre + 'bo')
            for h in range(H):
                head = _dot(pm[h * lq:(h + 1) * lq, :],
                            qkv[:, 2 * dm + h * hd:2 * dm + (h + 1) * hd])
                attn = attn + _dot(head, wo[h * hd:(h + 1) * hd, :])
            q = q + attn
            x2 = _layernorm(q, P(pre + 'n2g'), P(pre + 'n2b'))
            q = q + _ffn(x2, P(pre + 'w1'), P(pre + 'b1'), P(pre + 'w2'), P(pre + 'b2'))

    o_ref[...] = q.astype(o_ref.dtype)


# ------------------------------- model glue ---------------------------------

def _cost_estimate(cfg, *, x_bytes, slab_bytes, out_bytes):
    lq, S, dm = cfg['out_len'], cfg['seq'], cfg['d_model']
    dkv, H = cfg['d_kv'], cfg['enc_nhead']
    hd = dm // H
    nenc, nc = cfg['n_enc'], cfg['num_cross_attn']
    nb, B = cfg['num_bands'], cfg['batch']
    mm = lambda m, k, n: 2 * m * k * n
    dec = (2 * mm(lq, dm, dm) + mm(lq, dm, S) + mm(lq, S, dm) + 2 * mm(lq, dm, dm))
    enc = (mm(lq, dm, 3 * dm)
           + H * (mm(lq, hd, lq) + mm(lq, lq, hd) + mm(lq, hd, dm))
           + 2 * mm(lq, dm, dm))
    flops = B * (2 * mm(S, dkv, dm) + nc * (dec + nenc * enc))
    trans = B * (2 * S * nb + nc * (lq * S + nenc * H * lq * lq))
    return pl.CostEstimate(flops=flops, transcendentals=trans,
                           bytes_accessed=x_bytes + slab_bytes + out_bytes)


def perceiver_forward(x, slab, *, offsets, meta, num_cross_attn):
    s, b, d_in = x.shape
    lq, dm = meta['out_len'], meta['d_model']

    cfg = dict(seq=s, batch=b, d_model=dm, d_kv=meta['d_kv'],
               out_len=lq, enc_nhead=meta['enc_nhead'], n_enc=meta['n_enc'],
               num_bands=meta['num_bands'], num_cross_attn=num_cross_attn)

    x_bm = jnp.transpose(x, (1, 0, 2))              # (B, S, d_input)

    cost = _cost_estimate(cfg, x_bytes=4 * x.size, slab_bytes=4 * slab.size,
                          out_bytes=4 * b * lq * dm)

    out = pl.pallas_call(
        functools.partial(_perceiver_kernel, off=offsets, cfg=cfg),
        grid=(b,),
        out_shape=jax.ShapeDtypeStruct((b, lq, dm), jnp.float32),
        in_specs=[
            pl.BlockSpec((None, s, d_in), lambda i: (i, 0, 0)),   # one batch / step
            pl.BlockSpec(slab.shape, lambda i: (0, 0)),           # param slab, resident
        ],
        out_specs=pl.BlockSpec((None, lq, dm), lambda i: (i, 0, 0)),
        compiler_params=pltpu.CompilerParams(dimension_semantics=("parallel",)),
        cost_estimate=cost,
    )(x_bm, slab)

    return jnp.transpose(out, (1, 0, 2))            # PyTorch seq-first (out_len, B, dm)


# ---------------------------- parameter handling ----------------------------

def init_params(key, *, out_len, d_model, d_input, band_size, enc_dec_ratio, max_freq):
    """Parameters in torch convention (Linear weights stored as (D_out, D_in))."""
    num_bands = band_size // 2
    d_kv = d_input + band_size
    keys = iter(jax.random.split(key, 64))

    def nrm(shape, s=0.05):
        return s * jax.random.normal(next(keys), shape, jnp.float32)

    def attn_layer(dm, dkv_, nhead, dim_ff):
        return dict(
            nhead=nhead,
            wq=nrm((dm, dm)), bq=jnp.zeros((dm,), jnp.float32),
            wk=nrm((dm, dkv_)), bk=jnp.zeros((dm,), jnp.float32),
            wv=nrm((dm, dkv_)), bv=jnp.zeros((dm,), jnp.float32),
            wo=nrm((dm, dm)), bo=jnp.zeros((dm,), jnp.float32),
            w1=nrm((dim_ff, dm)), b1=jnp.zeros((dim_ff,), jnp.float32),
            w2=nrm((dm, dim_ff)), b2=jnp.zeros((dm,), jnp.float32),
            norm1_g=jnp.ones((dm,), jnp.float32), norm1_b=jnp.zeros((dm,), jnp.float32),
            norm2_g=jnp.ones((dm,), jnp.float32), norm2_b=jnp.zeros((dm,), jnp.float32),
        )

    return dict(
        # FourierEncoding buffer: exp(linspace(0, log(max_freq/2), num_bands)) * pi
        freqs=(jnp.exp(jnp.linspace(0.0, math.log(max_freq / 2.0), num_bands))
               * math.pi).astype(jnp.float32),
        norm_g=jnp.ones((d_kv,), jnp.float32),
        norm_b=jnp.zeros((d_kv,), jnp.float32),
        query=jax.random.normal(next(keys), (out_len, d_model), jnp.float32),
        dec=attn_layer(d_model, d_kv, 1, d_model),          # nhead=1, kdim=vdim=d_kv
        encs=[attn_layer(d_model, d_model, d_model // band_size, d_model)
              for _ in range(enc_dec_ratio)],
    )


def prepare_params(params):
    """Pack every tensor into one lane-dense (R, 128) f32 slab.

    Weights are pre-transposed to (D_in, D_out), the QKV projection of the
    encoder layers is fused, the 1/sqrt(head_dim) attention scale is folded
    into the Q projection, and each tensor is row-padded to a multiple of 8 so
    every static slice in the kernel starts on an (8,128) tile boundary."""
    dm = params['dec']['wq'].shape[0]
    entries = []

    def add(name, a):
        a = jnp.asarray(a, jnp.float32)
        if a.ndim == 1:
            a = a.reshape(1, -1)
        entries.append((name, a))

    add('freqs', params['freqs'])
    add('norm_g', params['norm_g']); add('norm_b', params['norm_b'])
    add('query', params['query'])

    d = params['dec']
    dsc = 1.0 / math.sqrt(dm // d['nhead'])
    add('d_wq', d['wq'].T * dsc); add('d_bq', d['bq'] * dsc)
    add('d_wk', d['wk'].T); add('d_bk', d['bk'])
    add('d_wv', d['wv'].T); add('d_bv', d['bv'])
    add('d_wo', d['wo'].T); add('d_bo', d['bo'])
    add('d_w1', d['w1'].T); add('d_b1', d['b1'])
    add('d_w2', d['w2'].T); add('d_b2', d['b2'])
    add('d_n1g', d['norm1_g']); add('d_n1b', d['norm1_b'])
    add('d_n2g', d['norm2_g']); add('d_n2b', d['norm2_b'])

    for i, e in enumerate(params['encs']):
        pre = f'e{i}_'
        esc = 1.0 / math.sqrt(dm // e['nhead'])
        add(pre + 'wqkv', jnp.concatenate([e['wq'].T * esc, e['wk'].T, e['wv'].T], axis=1))
        add(pre + 'bqkv', jnp.concatenate([e['bq'] * esc, e['bk'], e['bv']]))
        add(pre + 'wo', e['wo'].T); add(pre + 'bo', e['bo'])
        add(pre + 'w1', e['w1'].T); add(pre + 'b1', e['b1'])
        add(pre + 'w2', e['w2'].T); add(pre + 'b2', e['b2'])
        add(pre + 'n1g', e['norm1_g']); add(pre + 'n1b', e['norm1_b'])
        add(pre + 'n2g', e['norm2_g']); add(pre + 'n2b', e['norm2_b'])

    offsets, blocks, row = {}, [], 0
    for name, a in entries:
        r, c = a.shape
        assert c <= 128, (name, a.shape)
        rp = -(-r // 8) * 8
        blocks.append(jnp.zeros((rp, 128), jnp.float32).at[:r, :c].set(a))
        offsets[name] = (row, r, c)
        row += rp
    slab = jnp.concatenate(blocks, axis=0)

    meta = dict(out_len=params['query'].shape[0], d_model=dm,
                d_kv=params['norm_g'].shape[0],
                num_bands=params['freqs'].shape[0],
                enc_nhead=params['encs'][0]['nhead'],
                n_enc=len(params['encs']))
    return slab, offsets, meta


# --------------------------------- main --------------------------------------

if __name__ == "__main__":
    OUT_LEN = 8
    D_MODEL = 32
    D_INPUT = 17
    BAND_SIZE = 15            # odd: 2*(band_size//2)+1 == band_size
    ENC_DEC_RATIO = 2
    NUM_CROSS_ATTN = 2
    MAX_FREQ = 1.0
    S, B = 16, 2              # input is (seq, batch, d_input), PyTorch seq-first

    key = jax.random.PRNGKey(0)
    pkey, xkey = jax.random.split(key)
    params = init_params(pkey, out_len=OUT_LEN, d_model=D_MODEL, d_input=D_INPUT,
                         band_size=BAND_SIZE, enc_dec_ratio=ENC_DEC_RATIO,
                         max_freq=MAX_FREQ)
    assert D_MODEL % (D_MODEL // BAND_SIZE) == 0
    slab, offsets, meta = prepare_params(params)
    x = jax.random.normal(xkey, (S, B, D_INPUT), jnp.float32)

    fwd = jax.jit(functools.partial(perceiver_forward, offsets=offsets, meta=meta,
                                    num_cross_attn=NUM_CROSS_ATTN))
    out = fwd(x, slab)
    jax.block_until_ready(out)

    assert out.shape == (OUT_LEN, B, D_MODEL), out.shape
    assert bool(jnp.all(jnp.isfinite(out)))
    print("KERNEL_OK")
</pallas_src>

<mosaic_0001>
module attributes {stable_mosaic.version = 11 : i64} {
  func.func @_perceiver_kernel(%arg0: i32, %arg1: memref<1x16x17xf32, #tpu.memory_space<vmem>>, %arg2: memref<688x128xf32, #tpu.memory_space<vmem>>, %arg3: memref<1x8x32xf32, #tpu.memory_space<vmem>>) attributes {dimension_semantics = [#tpu.dimension_semantics<parallel>], iteration_bounds = array<i64: 2>, scalar_prefetch = 0 : i64, scratch_operands = 0 : i64, tpu.core_type = #tpu.core_type<tc>, window_params = [{transform_indices = @transform_0, window_bounds = array<i64: 1, 16, 17>}, {pipeline_mode = #tpu.pipeline_mode<synchronous>, transform_indices = @transform_1, window_bounds = array<i64: 688, 128>}, {transform_indices = @transform_2, window_bounds = array<i64: 1, 8, 32>}]} {
    %0 = tpu.iota {dimensions = array<i32: 0>} : vector<16x1xi32>
    %1 = arith.sitofp %0 : vector<16x1xi32> to vector<16x1xf32>
    %cst = arith.constant 0.13333334 : f32
    %2 = vector.broadcast %cst : f32 to vector<16x1xf32>
    %3 = arith.mulf %1, %2 : vector<16x1xf32>
    %cst_0 = arith.constant 1.000000e+00 : f32
    %4 = vector.broadcast %cst_0 : f32 to vector<16x1xf32>
    %5 = arith.subf %3, %4 : vector<16x1xf32>
    %c0 = arith.constant 0 : index
    %c0_1 = arith.constant 0 : index
    %6 = vector.load %arg2[%c0, %c0_1] : memref<688x128xf32, #tpu.memory_space<vmem>>, vector<1x7xf32>
    %7 = vector.broadcast %5 : vector<16x1xf32> to vector<16x7xf32>
    %8 = vector.broadcast %6 : vector<1x7xf32> to vector<16x7xf32>
    %9 = arith.mulf %7, %8 : vector<16x7xf32>
    %c0_2 = arith.constant 0 : index
    %c0_3 = arith.constant 0 : index
    %c0_4 = arith.constant 0 : index
    %10 = vector.load %arg1[%c0_2, %c0_3, %c0_4] : memref<1x16x17xf32, #tpu.memory_space<vmem>>, vector<1x16x17xf32>
    %11 = vector.shape_cast %10 : vector<1x16x17xf32> to vector<16x17xf32>
    %12 = math.sin %9 : vector<16x7xf32>
    %13 = math.cos %9 : vector<16x7xf32>
    %14 = tpu.concatenate %11, %12, %13, %5 in 1 : vector<16x17xf32>, vector<16x7xf32>, vector<16x7xf32>, vector<16x1xf32> -> vector<16x32xf32>
    %c8 = arith.constant 8 : index
    %c0_5 = arith.constant 0 : index
    %15 = vector.load %arg2[%c8, %c0_5] : memref<688x128xf32, #tpu.memory_space<vmem>>, vector<1x32xf32>
    %c16 = arith.constant 16 : index
    %c0_6 = arith.constant 0 : index
    %16 = vector.load %arg2[%c16, %c0_6] : memref<688x128xf32, #tpu.memory_space<vmem>>, vector<1x32xf32>
    %cst_7 = arith.constant dense<0.000000e+00> : vector<16xf32>
    %17 = vector.multi_reduction <add>, %14, %cst_7 [1] : vector<16x32xf32> to vector<16xf32>
    %18 = vector.shape_cast %17 : vector<16xf32> to vector<16x1xf32>
    %cst_8 = arith.constant 3.200000e+01 : f32
    %19 = vector.broadcast %cst_8 : f32 to vector<16x1xf32>
    %20 = arith.divf %18, %19 : vector<16x1xf32>
    %21 = vector.broadcast %20 : vector<16x1xf32> to vector<16x32xf32>
    %22 = arith.subf %14, %21 : vector<16x32xf32>
    %23 = arith.mulf %22, %22 : vector<16x32xf32>
    %cst_9 = arith.constant dense<0.000000e+00> : vector<16xf32>
    %24 = vector.multi_reduction <add>, %23, %cst_9 [1] : vector<16x32xf32> to vector<16xf32>
    %25 = vector.shape_cast %24 : vector<16xf32> to vector<16x1xf32>
    %cst_10 = arith.constant 3.200000e+01 : f32
    %26 = vector.broadcast %cst_10 : f32 to vector<16x1xf32>
    %27 = arith.divf %25, %26 : vector<16x1xf32>
    %28 = vector.broadcast %20 : vector<16x1xf32> to vector<16x32xf32>
    %29 = arith.subf %14, %28 : vector<16x32xf32>
    %cst_11 = arith.constant 9.99999974E-6 : f32
    %30 = vector.broadcast %cst_11 : f32 to vector<16x1xf32>
    %31 = arith.addf %27, %30 : vector<16x1xf32>
    %32 = math.rsqrt %31 : vector<16x1xf32>
    %33 = vector.broadcast %32 : vector<16x1xf32> to vector<16x32xf32>
    %34 = arith.mulf %29, %33 : vector<16x32xf32>
    %35 = vector.broadcast %15 : vector<1x32xf32> to vector<16x32xf32>
    %36 = arith.mulf %34, %35 : vector<16x32xf32>
    %37 = vector.broadcast %16 : vector<1x32xf32> to vector<16x32xf32>
    %38 = arith.addf %36, %37 : vector<16x32xf32>
    %c72 = arith.constant 72 : index
    %c0_12 = arith.constant 0 : index
    %39 = vector.load %arg2[%c72, %c0_12] : memref<688x128xf32, #tpu.memory_space<vmem>>, vector<32x32xf32>
    %cst_13 = arith.constant dense<0.000000e+00> : vector<16x32xf32>
    %40 = tpu.matmul %38, %39, %cst_13 {dimension_numbers = #tpu.dot_dimension_numbers<[1], [0], [0], [1], [0, 0, 1, 1], [], []>} : vector<16x32xf32>, vector<32x32xf32>, vector<16x32xf32> -> vector<16x32xf32>
    %c104 = arith.constant 104 : index
    %c0_14 = arith.constant 0 : index
    %41 = vector.load %arg2[%c104, %c0_14] : memref<688x128xf32, #tpu.memory_space<vmem>>, vector<1x32xf32>
    %42 = vector.broadcast %41 : vector<1x32xf32> to vector<16x32xf32>
    %43 = arith.addf %40, %42 : vector<16x32xf32>
    %c112 = arith.constant 112 : index
    %c0_15 = arith.constant 0 : index
    %44 = vector.load %arg2[%c112, %c0_15] : memref<688x128xf32, #tpu.memory_space<vmem>>, vector<32x32xf32>
    %cst_16 = arith.constant dense<0.000000e+00> : vector<16x32xf32>
    %45 = tpu.matmul %38, %44, %cst_16 {dimension_numbers = #tpu.dot_dimension_numbers<[1], [0], [0], [1], [0, 0, 1, 1], [], []>} : vector<16x32xf32>, vector<32x32xf32>, vector<16x32xf32> -> vector<16x32xf32>
    %c144 = arith.constant 144 : index
    %c0_17 = arith.constant 0 : index
    %46 = vector.load %arg2[%c144, %c0_17] : memref<688x128xf32, #tpu.memory_space<vmem>>, vector<1x32xf32>
    %47 = vector.broadcast %46 : vector<1x32xf32> to vector<16x32xf32>
    %48 = arith.addf %45, %47 : vector<16x32xf32>
    %49 = tpu.transpose %43, [1, 0] : vector<16x32xf32> -> vector<32x16xf32>
    %c24 = arith.constant 24 : index
    %c0_18 = arith.constant 0 : index
    %50 = vector.load %arg2[%c24, %c0_18] : memref<688x128xf32, #tpu.memory_space<vmem>>, vector<8x32xf32>
    %c272 = arith.constant 272 : index
    %c0_19 = arith.constant 0 : index
    %51 = vector.load %arg2[%c272, %c0_19] : memref<688x128xf32, #tpu.memory_space<vmem>>, vector<1x32xf32>
    %c280 = arith.constant 280 : index
    %c0_20 = arith.constant 0 : index
    %52 = vector.load %arg2[%c280, %c0_20] : memref<688x128xf32, #tpu.memory_space<vmem>>, vector<1x32xf32>
    %cst_21 = arith.constant dense<0.000000e+00> : vector<8xf32>
    %53 = vector.multi_reduction <add>, %50, %cst_21 [1] : vector<8x32xf32> to vector<8xf32>
    %54 = vector.shape_cast %53 : vector<8xf32> to vector<8x1xf32>
    %cst_22 = arith.constant 3.200000e+01 : f32
    %55 = vector.broadcast %cst_22 : f32 to vector<8x1xf32>
    %56 = arith.divf %54, %55 : vector<8x1xf32>
    %57 = vector.broadcast %56 : vector<8x1xf32> to vector<8x32xf32>
    %58 = arith.subf %50, %57 : vector<8x32xf32>
    %59 = arith.mulf %58, %58 : vector<8x32xf32>
    %cst_23 = arith.constant dense<0.000000e+00> : vector<8xf32>
    %60 = vector.multi_reduction <add>, %59, %cst_23 [1] : vector<8x32xf32> to vector<8xf32>
    %61 = vector.shape_cast %60 : vector<8xf32> to vector<8x1xf32>
    %cst_24 = arith.constant 3.200000e+01 : f32
    %62 = vector.broadcast %cst_24 : f32 to vector<8x1xf32>
    %63 = arith.divf %61, %62 : vector<8x1xf32>
    %64 = vector.broadcast %56 : vector<8x1xf32> to vector<8x32xf32>
    %65 = arith.subf %50, %64 : vector<8x32xf32>
    %cst_25 = arith.constant 9.99999974E-6 : f32
    %66 = vector.broadcast %cst_25 : f32 to vector<8x1xf32>
    %67 = arith.addf %63, %66 : vector<8x1xf32>
    %68 = math.rsqrt %67 : vector<8x1xf32>
    %69 = vector.broadcast %68 : vector<8x1xf32> to vector<8x32xf32>
    %70 = arith.mulf %65, %69 : vector<8x32xf32>
    %71 = vector.broadcast %51 : vector<1x32xf32> to vector<8x32xf32>
    %72 = arith.mulf %70, %71 : vector<8x32xf32>
    %73 = vector.broadcast %52 : vector<1x32xf32> to vector<8x32xf32>
    %74 = arith.addf %72, %73 : vector<8x32xf32>
    %c32 = arith.constant 32 : index
    %c0_26 = arith.constant 0 : index
    %75 = vector.load %arg2[%c32, %c0_26] : memref<688x128xf32, #tpu.memory_space<vmem>>, vector<32x32xf32>
    %cst_27 = arith.constant dense<0.000000e+00> : vector<8x32xf32>
    %76 = tpu.matmul %74, %75, %cst_27 {dimension_numbers = #tpu.dot_dimension_numbers<[1], [0], [0], [1], [0, 0, 1, 1], [], []>} : vector<8x32xf32>, vector<32x32xf32>, vector<8x32xf32> -> vector<8x32xf32>
    %c64 = arith.constant 64 : index
    %c0_28 = arith.constant 0 : index
    %77 = vector.load %arg2[%c64, %c0_28] : memref<688x128xf32, #tpu.memory_space<vmem>>, vector<1x32xf32>
    %78 = vector.broadcast %77 : vector<1x32xf32> to vector<8x32xf32>
    %79 = arith.addf %76, %78 : vector<8x32xf32>
    %cst_29 = arith.constant dense<0.000000e+00> : vector<8x16xf32>
    %80 = tpu.matmul %79, %49, %cst_29 {dimension_numbers = #tpu.dot_dimension_numbers<[1], [0], [0], [1], [0, 0, 1, 1], [], []>} : vector<8x32xf32>, vector<32x16xf32>, vector<8x16xf32> -> vector<8x16xf32>
    %cst_30 = arith.constant dense<0xFF800000> : vector<8xf32>
    %81 = vector.multi_reduction <maximumf>, %80, %cst_30 [1] : vector<8x16xf32> to vector<8xf32>
    %82 = vector.shape_cast %81 : vector<8xf32> to vector<8x1xf32>
    %83 = vector.broadcast %82 : vector<8x1xf32> to vector<8x16xf32>
    %84 = arith.subf %80, %83 : vector<8x16xf32>
    %85 = math.exp %84 : vector<8x16xf32>
    %cst_31 = arith.constant dense<0.000000e+00> : vector<8xf32>
    %86 = vector.multi_reduction <add>, %85, %cst_31 [1] : vector<8x16xf32> to vector<8xf32>
    %87 = vector.shape_cast %86 : vector<8xf32> to vector<8x1xf32>
    %88 = vector.broadcast %87 : vector<8x1xf32> to vector<8x16xf32>
    %89 = arith.divf %85, %88 : vector<8x16xf32>
    %cst_32 = arith.constant dense<0.000000e+00> : vector<8x32xf32>
    %90 = tpu.matmul %89, %48, %cst_32 {dimension_numbers = #tpu.dot_dimension_numbers<[1], [0], [0], [1], [0, 0, 1, 1], [], []>} : vector<8x16xf32>, vector<16x32xf32>, vector<8x32xf32> -> vector<8x32xf32>
    %c152 = arith.constant 152 : index
    %c0_33 = arith.constant 0 : index
    %91 = vector.load %arg2[%c152, %c0_33] : memref<688x128xf32, #tpu.memory_space<vmem>>, vector<32x32xf32>
    %cst_34 = arith.constant dense<0.000000e+00> : vector<8x32xf32>
    %92 = tpu.matmul %90, %91, %cst_34 {dimension_numbers = #tpu.dot_dimension_numbers<[1], [0], [0], [1], [0, 0, 1, 1], [], []>} : vector<8x32xf32>, vector<32x32xf32>, vector<8x32xf32> -> vector<8x32xf32>
    %93 = arith.addf %50, %92 : vector<8x32xf32>
    %c184 = arith.constant 184 : index
    %c0_35 = arith.constant 0 : index
    %94 = vector.load %arg2[%c184, %c0_35] : memref<688x128xf32, #tpu.memory_space<vmem>>, vector<1x32xf32>
    %95 = vector.broadcast %94 : vector<1x32xf32> to vector<8x32xf32>
    %96 = arith.addf %93, %95 : vector<8x32xf32>
    %c288 = arith.constant 288 : index
    %c0_36 = arith.constant 0 : index
    %97 = vector.load %arg2[%c288, %c0_36] : memref<688x128xf32, #tpu.memory_space<vmem>>, vector<1x32xf32>
    %c296 = arith.constant 296 : index
    %c0_37 = arith.constant 0 : index
    %98 = vector.load %arg2[%c296, %c0_37] : memref<688x128xf32, #tpu.memory_space<vmem>>, vector<1x32xf32>
    %cst_38 = arith.constant dense<0.000000e+00> : vector<8xf32>
    %99 = vector.multi_reduction <add>, %96, %cst_38 [1] : vector<8x32xf32> to vector<8xf32>
    %100 = vector.shape_cast %99 : vector<8xf32> to vector<8x1xf32>
    %cst_39 = arith.constant 3.200000e+01 : f32
    %101 = vector.broadcast %cst_39 : f32 to vector<8x1xf32>
    %102 = arith.divf %100, %101 : vector<8x1xf32>
    %103 = vector.broadcast %102 : vector<8x1xf32> to vector<8x32xf32>
    %104 = arith.subf %96, %103 : vector<8x32xf32>
    %105 = arith.mulf %104, %104 : vector<8x32xf32>
    %cst_40 = arith.constant dense<0.000000e+00> : vector<8xf32>
    %106 = vector.multi_reduction <add>, %105, %cst_40 [1] : vector<8x32xf32> to vector<8xf32>
    %107 = vector.shape_cast %106 : vector<8xf32> to vector<8x1xf32>
    %cst_41 = arith.constant 3.200000e+01 : f32
    %108 = vector.broadcast %cst_41 : f32 to vector<8x1xf32>
    %109 = arith.divf %107, %108 : vector<8x1xf32>
    %110 = vector.broadcast %102 : vector<8x1xf32> to vector<8x32xf32>
    %111 = arith.subf %96, %110 : vector<8x32xf32>
    %cst_42 = arith.constant 9.99999974E-6 : f32
    %112 = vector.broadcast %cst_42 : f32 to vector<8x1xf32>
    %113 = arith.addf %109, %112 : vector<8x1xf32>
    %114 = math.rsqrt %113 : vector<8x1xf32>
    %115 = vector.broadcast %114 : vector<8x1xf32> to vector<8x32xf32>
    %116 = arith.mulf %111, %115 : vector<8x32xf32>
    %117 = vector.broadcast %97 : vector<1x32xf32> to vector<8x32xf32>
    %118 = arith.mulf %116, %117 : vector<8x32xf32>
    %119 = vector.broadcast %98 : vector<1x32xf32> to vector<8x32xf32>
    %120 = arith.addf %118, %119 : vector<8x32xf32>
    %c192 = arith.constant 192 : index
    %c0_43 = arith.constant 0 : index
    %121 = vector.load %arg2[%c192, %c0_43] : memref<688x128xf32, #tpu.memory_space<vmem>>, vector<32x32xf32>
    %c224 = arith.constant 224 : index
    %c0_44 = arith.constant 0 : index
    %122 = vector.load %arg2[%c224, %c0_44] : memref<688x128xf32, #tpu.memory_space<vmem>>, vector<1x32xf32>
    %c232 = arith.constant 232 : index
    %c0_45 = arith.constant 0 : index
    %123 = vector.load %arg2[%c232, %c0_45] : memref<688x128xf32, #tpu.memory_space<vmem>>, vector<32x32xf32>
    %c264 = arith.constant 264 : index
    %c0_46 = arith.constant 0 : index
    %124 = vector.load %arg2[%c264, %c0_46] : memref<688x128xf32, #tpu.memory_space<vmem>>, vector<1x32xf32>
    %cst_47 = arith.constant dense<0.000000e+00> : vector<8x32xf32>
    %125 = tpu.matmul %120, %121, %cst_47 {dimension_numbers = #tpu.dot_dimension_numbers<[1], [0], [0], [1], [0, 0, 1, 1], [], []>} : vector<8x32xf32>, vector<32x32xf32>, vector<8x32xf32> -> vector<8x32xf32>
    %126 = vector.broadcast %122 : vector<1x32xf32> to vector<8x32xf32>
    %127 = arith.addf %125, %126 : vector<8x32xf32>
    %cst_48 = arith.constant 0.000000e+00 : f32
    %128 = vector.broadcast %cst_48 : f32 to vector<8x32xf32>
    %129 = arith.maximumf %127, %128 : vector<8x32xf32>
    %cst_49 = arith.constant dense<0.000000e+00> : vector<8x32xf32>
    %130 = tpu.matmul %129, %123, %cst_49 {dimension_numbers = #tpu.dot_dimension_numbers<[1], [0], [0], [1], [0, 0, 1, 1], [], []>} : vector<8x32xf32>, vector<32x32xf32>, vector<8x32xf32> -> vector<8x32xf32>
    %131 = vector.broadcast %124 : vector<1x32xf32> to vector<8x32xf32>
    %132 = arith.addf %130, %131 : vector<8x32xf32>
    %133 = arith.addf %96, %132 : vector<8x32xf32>
    %c464 = arith.constant 464 : index
    %c0_50 = arith.constant 0 : index
    %134 = vector.load %arg2[%c464, %c0_50] : memref<688x128xf32, #tpu.memory_space<vmem>>, vector<1x32xf32>
    %c472 = arith.constant 472 : index
    %c0_51 = arith.constant 0 : index
    %135 = vector.load %arg2[%c472, %c0_51] : memref<688x128xf32, #tpu.memory_space<vmem>>, vector<1x32xf32>
    %cst_52 = arith.constant dense<0.000000e+00> : vector<8xf32>
    %136 = vector.multi_reduction <add>, %133, %cst_52 [1] : vector<8x32xf32> to vector<8xf32>
    %137 = vector.shape_cast %136 : vector<8xf32> to vector<8x1xf32>
    %cst_53 = arith.constant 3.200000e+01 : f32
    %138 = vector.broadcast %cst_53 : f32 to vector<8x1xf32>
    %139 = arith.divf %137, %138 : vector<8x1xf32>
    %140 = vector.broadcast %139 : vector<8x1xf32> to vector<8x32xf32>
    %141 = arith.subf %133, %140 : vector<8x32xf32>
    %142 = arith.mulf %141, %141 : vector<8x32xf32>
    %cst_54 = arith.constant dense<0.000000e+00> : vector<8xf32>
    %143 = vector.multi_reduction <add>, %142, %cst_54 [1] : vector<8x32xf32> to vector<8xf32>
    %144 = vector.shape_cast %143 : vector<8xf32> to vector<8x1xf32>
    %cst_55 = arith.constant 3.200000e+01 : f32
    %145 = vector.broadcast %cst_55 : f32 to vector<8x1xf32>
    %146 = arith.divf %144, %145 : vector<8x1xf32>
    %147 = vector.broadcast %139 : vector<8x1xf32> to vector<8x32xf32>
    %148 = arith.subf %133, %147 : vector<8x32xf32>
    %cst_56 = arith.constant 9.99999974E-6 : f32
    %149 = vector.broadcast %cst_56 : f32 to vector<8x1xf32>
    %150 = arith.addf %146, %149 : vector<8x1xf32>
    %151 = math.rsqrt %150 : vector<8x1xf32>
    %152 = vector.broadcast %151 : vector<8x1xf32> to vector<8x32xf32>
    %153 = arith.mulf %148, %152 : vector<8x32xf32>
    %154 = vector.broadcast %134 : vector<1x32xf32> to vector<8x32xf32>
    %155 = arith.mulf %153, %154 : vector<8x32xf32>
    %156 = vector.broadcast %135 : vector<1x32xf32> to vector<8x32xf32>
    %157 = arith.addf %155, %156 : vector<8x32xf32>
    %c304 = arith.constant 304 : index
    %c0_57 = arith.constant 0 : index
    %158 = vector.load %arg2[%c304, %c0_57] : memref<688x128xf32, #tpu.memory_space<vmem>>, vector<32x96xf32>
    %cst_58 = arith.constant dense<0.000000e+00> : vector<8x96xf32>
    %159 = tpu.matmul %157, %158, %cst_58 {dimension_numbers = #tpu.dot_dimension_numbers<[1], [0], [0], [1], [0, 0, 1, 1], [], []>} : vector<8x32xf32>, vector<32x96xf32>, vector<8x96xf32> -> vector<8x96xf32>
    %c336 = arith.constant 336 : index
    %c0_59 = arith.constant 0 : index
    %160 = vector.load %arg2[%c336, %c0_59] : memref<688x128xf32, #tpu.memory_space<vmem>>, vector<1x96xf32>
    %161 = vector.broadcast %160 : vector<1x96xf32> to vector<8x96xf32>
    %162 = arith.addf %159, %161 : vector<8x96xf32>
    %163 = vector.extract_strided_slice %162 {offsets = [0, 32], sizes = [8, 32], strides = [1, 1]} : vector<8x96xf32> to vector<8x32xf32>
    %164 = tpu.transpose %163, [1, 0] : vector<8x32xf32> -> vector<32x8xf32>
    %165 = vector.extract_strided_slice %162 {offsets = [0, 0], sizes = [8, 16], strides = [1, 1]} : vector<8x96xf32> to vector<8x16xf32>
    %166 = vector.extract_strided_slice %164 {offsets = [0, 0], sizes = [16, 8], strides = [1, 1]} : vector<32x8xf32> to vector<16x8xf32>
    %cst_60 = arith.constant dense<0.000000e+00> : vector<8x8xf32>
    %167 = tpu.matmul %165, %166, %cst_60 {dimension_numbers = #tpu.dot_dimension_numbers<[1], [0], [0], [1], [0, 0, 1, 1], [], []>} : vector<8x16xf32>, vector<16x8xf32>, vector<8x8xf32> -> vector<8x8xf32>
    %168 = vector.extract_strided_slice %162 {offsets = [0, 16], sizes = [8, 16], strides = [1, 1]} : vector<8x96xf32> to vector<8x16xf32>
    %169 = vector.extract_strided_slice %164 {offsets = [16, 0], sizes = [16, 8], strides = [1, 1]} : vector<32x8xf32> to vector<16x8xf32>
    %cst_61 = arith.constant dense<0.000000e+00> : vector<8x8xf32>
    %170 = tpu.matmul %168, %169, %cst_61 {dimension_numbers = #tpu.dot_dimension_numbers<[1], [0], [0], [1], [0, 0, 1, 1], [], []>} : vector<8x16xf32>, vector<16x8xf32>, vector<8x8xf32> -> vector<8x8xf32>
    %171 = tpu.concatenate %167, %170 in 0 : vector<8x8xf32>, vector<8x8xf32> -> vector<16x8xf32>
    %cst_62 = arith.constant dense<0xFF800000> : vector<16xf32>
    %172 = vector.multi_reduction <maximumf>, %171, %cst_62 [1] : vector<16x8xf32> to vector<16xf32>
    %173 = vector.shape_cast %172 : vector<16xf32> to vector<16x1xf32>
    %174 = vector.broadcast %173 : vector<16x1xf32> to vector<16x8xf32>
    %175 = arith.subf %171, %174 : vector<16x8xf32>
    %176 = math.exp %175 : vector<16x8xf32>
    %cst_63 = arith.constant dense<0.000000e+00> : vector<16xf32>
    %177 = vector.multi_reduction <add>, %176, %cst_63 [1] : vector<16x8xf32> to vector<16xf32>
    %178 = vector.shape_cast %177 : vector<16xf32> to vector<16x1xf32>
    %179 = vector.broadcast %178 : vector<16x1xf32> to vector<16x8xf32>
    %180 = arith.divf %176, %179 : vector<16x8xf32>
    %c344 = arith.constant 344 : index
    %c0_64 = arith.constant 0 : index
    %181 = vector.load %arg2[%c344, %c0_64] : memref<688x128xf32, #tpu.memory_space<vmem>>, vector<32x32xf32>
    %c376 = arith.constant 376 : index
    %c0_65 = arith.constant 0 : index
    %182 = vector.load %arg2[%c376, %c0_65] : memref<688x128xf32, #tpu.memory_space<vmem>>, vector<1x32xf32>
    %183 = vector.extract_strided_slice %180 {offsets = [0, 0], sizes = [8, 8], strides = [1, 1]} : vector<16x8xf32> to vector<8x8xf32>
    %184 = vector.extract_strided_slice %162 {offsets = [0, 64], sizes = [8, 16], strides = [1, 1]} : vector<8x96xf32> to vector<8x16xf32>
    %cst_66 = arith.constant dense<0.000000e+00> : vector<8x16xf32>
    %185 = tpu.matmul %183, %184, %cst_66 {dimension_numbers = #tpu.dot_dimension_numbers<[1], [0], [0], [1], [0, 0, 1, 1], [], []>} : vector<8x8xf32>, vector<8x16xf32>, vector<8x16xf32> -> vector<8x16xf32>
    %186 = vector.extract_strided_slice %181 {offsets = [0, 0], sizes = [16, 32], strides = [1, 1]} : vector<32x32xf32> to vector<16x32xf32>
    %cst_67 = arith.constant dense<0.000000e+00> : vector<8x32xf32>
    %187 = tpu.matmul %185, %186, %cst_67 {dimension_numbers = #tpu.dot_dimension_numbers<[1], [0], [0], [1], [0, 0, 1, 1], [], []>} : vector<8x16xf32>, vector<16x32xf32>, vector<8x32xf32> -> vector<8x32xf32>
    %188 = vector.broadcast %182 : vector<1x32xf32> to vector<8x32xf32>
    %189 = arith.addf %188, %187 : vector<8x32xf32>
    %190 = vector.extract_strided_slice %180 {offsets = [8, 0], sizes = [8, 8], strides = [1, 1]} : vector<16x8xf32> to vector<8x8xf32>
    %191 = vector.extract_strided_slice %162 {offsets = [0, 80], sizes = [8, 16], strides = [1, 1]} : vector<8x96xf32> to vector<8x16xf32>
    %cst_68 = arith.constant dense<0.000000e+00> : vector<8x16xf32>
    %192 = tpu.matmul %190, %191, %cst_68 {dimension_numbers = #tpu.dot_dimension_numbers<[1], [0], [0], [1], [0, 0, 1, 1], [], []>} : vector<8x8xf32>, vector<8x16xf32>, vector<8x16xf32> -> vector<8x16xf32>
    %193 = vector.extract_strided_slice %181 {offsets = [16, 0], sizes = [16, 32], strides = [1, 1]} : vector<32x32xf32> to vector<16x32xf32>
    %cst_69 = arith.constant dense<0.000000e+00> : vector<8x32xf32>
    %194 = tpu.matmul %192, %193, %cst_69 {dimension_numbers = #tpu.dot_dimension_numbers<[1], [0], [0], [1], [0, 0, 1, 1], [], []>} : vector<8x16xf32>, vector<16x32xf32>, vector<8x32xf32> -> vector<8x32xf32>
    %195 = arith.addf %189, %194 : vector<8x32xf32>
    %196 = arith.addf %133, %195 : vector<8x32xf32>
    %c480 = arith.constant 480 : index
    %c0_70 = arith.constant 0 : index
    %197 = vector.load %arg2[%c480, %c0_70] : memref<688x128xf32, #tpu.memory_space<vmem>>, vector<1x32xf32>
    %c488 = arith.constant 488 : index
    %c0_71 = arith.constant 0 : index
    %198 = vector.load %arg2[%c488, %c0_71] : memref<688x128xf32, #tpu.memory_space<vmem>>, vector<1x32xf32>
    %cst_72 = arith.constant dense<0.000000e+00> : vector<8xf32>
    %199 = vector.multi_reduction <add>, %196, %cst_72 [1] : vector<8x32xf32> to vector<8xf32>
    %200 = vector.shape_cast %199 : vector<8xf32> to vector<8x1xf32>
    %cst_73 = arith.constant 3.200000e+01 : f32
    %201 = vector.broadcast %cst_73 : f32 to vector<8x1xf32>
    %202 = arith.divf %200, %201 : vector<8x1xf32>
    %203 = vector.broadcast %202 : vector<8x1xf32> to vector<8x32xf32>
    %204 = arith.subf %196, %203 : vector<8x32xf32>
    %205 = arith.mulf %204, %204 : vector<8x32xf32>
    %cst_74 = arith.constant dense<0.000000e+00> : vector<8xf32>
    %206 = vector.multi_reduction <add>, %205, %cst_74 [1] : vector<8x32xf32> to vector<8xf32>
    %207 = vector.shape_cast %206 : vector<8xf32> to vector<8x1xf32>
    %cst_75 = arith.constant 3.200000e+01 : f32
    %208 = vector.broadcast %cst_75 : f32 to vector<8x1xf32>
    %209 = arith.divf %207, %208 : vector<8x1xf32>
    %210 = vector.broadcast %202 : vector<8x1xf32> to vector<8x32xf32>
    %211 = arith.subf %196, %210 : vector<8x32xf32>
    %cst_76 = arith.constant 9.99999974E-6 : f32
    %212 = vector.broadcast %cst_76 : f32 to vector<8x1xf32>
    %213 = arith.addf %209, %212 : vector<8x1xf32>
    %214 = math.rsqrt %213 : vector<8x1xf32>
    %215 = vector.broadcast %214 : vector<8x1xf32> to vector<8x32xf32>
    %216 = arith.mulf %211, %215 : vector<8x32xf32>
    %217 = vector.broadcast %197 : vector<1x32xf32> to vector<8x32xf32>
    %218 = arith.mulf %216, %217 : vector<8x32xf32>
    %219 = vector.broadcast %198 : vector<1x32xf32> to vector<8x32xf32>
    %220 = arith.addf %218, %219 : vector<8x32xf32>
    %c384 = arith.constant 384 : index
    %c0_77 = arith.constant 0 : index
    %221 = vector.load %arg2[%c384, %c0_77] : memref<688x128xf32, #tpu.memory_space<vmem>>, vector<32x32xf32>
    %c416 = arith.constant 416 : index
    %c0_78 = arith.constant 0 : index
    %222 = vector.load %arg2[%c416, %c0_78] : memref<688x128xf32, #tpu.memory_space<vmem>>, vector<1x32xf32>
    %c424 = arith.constant 424 : index
    %c0_79 = arith.constant 0 : index
    %223 = vector.load %arg2[%c424, %c0_79] : memref<688x128xf32, #tpu.memory_space<vmem>>, vector<32x32xf32>
    %c456 = arith.constant 456 : index
    %c0_80 = arith.constant 0 : index
    %224 = vector.load %arg2[%c456, %c0_80] : memref<688x128xf32, #tpu.memory_space<vmem>>, vector<1x32xf32>
    %cst_81 = arith.constant dense<0.000000e+00> : vector<8x32xf32>
    %225 = tpu.matmul %220, %221, %cst_81 {dimension_numbers = #tpu.dot_dimension_numbers<[1], [0], [0], [1], [0, 0, 1, 1], [], []>} : vector<8x32xf32>, vector<32x32xf32>, vector<8x32xf32> -> vector<8x32xf32>
    %226 = vector.broadcast %222 : vector<1x32xf32> to vector<8x32xf32>
    %227 = arith.addf %225, %226 : vector<8x32xf32>
    %cst_82 = arith.constant 0.000000e+00 : f32
    %228 = vector.broadcast %cst_82 : f32 to vector<8x32xf32>
    %229 = arith.maximumf %227, %228 : vector<8x32xf32>
    %cst_83 = arith.constant dense<0.000000e+00> : vector<8x32xf32>
    %230 = tpu.matmul %229, %223, %cst_83 {dimension_numbers = #tpu.dot_dimension_numbers<[1], [0], [0], [1], [0, 0, 1, 1], [], []>} : vector<8x32xf32>, vector<32x32xf32>, vector<8x32xf32> -> vector<8x32xf32>
    %231 = vector.broadcast %224 : vector<1x32xf32> to vector<8x32xf32>
    %232 = arith.addf %230, %231 : vector<8x32xf32>
    %233 = arith.addf %196, %232 : vector<8x32xf32>
    %c656 = arith.constant 656 : index
    %c0_84 = arith.constant 0 : index
    %234 = vector.load %arg2[%c656, %c0_84] : memref<688x128xf32, #tpu.memory_space<vmem>>, vector<1x32xf32>
    %c664 = arith.constant 664 : index
    %c0_85 = arith.constant 0 : index
    %235 = vector.load %arg2[%c664, %c0_85] : memref<688x128xf32, #tpu.memory_space<vmem>>, vector<1x32xf32>
    %cst_86 = arith.constant dense<0.000000e+00> : vector<8xf32>
    %236 = vector.multi_reduction <add>, %233, %cst_86 [1] : vector<8x32xf32> to vector<8xf32>
    %237 = vector.shape_cast %236 : vector<8xf32> to vector<8x1xf32>
    %cst_87 = arith.constant 3.200000e+01 : f32
    %238 = vector.broadcast %cst_87 : f32 to vector<8x1xf32>
    %239 = arith.divf %237, %238 : vector<8x1xf32>
    %240 = vector.broadcast %239 : vector<8x1xf32> to vector<8x32xf32>
    %241 = arith.subf %233, %240 : vector<8x32xf32>
    %242 = arith.mulf %241, %241 : vector<8x32xf32>
    %cst_88 = arith.constant dense<0.000000e+00> : vector<8xf32>
    %243 = vector.multi_reduction <add>, %242, %cst_88 [1] : vector<8x32xf32> to vector<8xf32>
    %244 = vector.shape_cast %243 : vector<8xf32> to vector<8x1xf32>
    %cst_89 = arith.constant 3.200000e+01 : f32
    %245 = vector.broadcast %cst_89 : f32 to vector<8x1xf32>
    %246 = arith.divf %244, %245 : vector<8x1xf32>
    %247 = vector.broadcast %239 : vector<8x1xf32> to vector<8x32xf32>
    %248 = arith.subf %233, %247 : vector<8x32xf32>
    %cst_90 = arith.constant 9.99999974E-6 : f32
    %249 = vector.broadcast %cst_90 : f32 to vector<8x1xf32>
    %250 = arith.addf %246, %249 : vector<8x1xf32>
    %251 = math.rsqrt %250 : vector<8x1xf32>
    %252 = vector.broadcast %251 : vector<8x1xf32> to vector<8x32xf32>
    %253 = arith.mulf %248, %252 : vector<8x32xf32>
    %254 = vector.broadcast %234 : vector<1x32xf32> to vector<8x32xf32>
    %255 = arith.mulf %253, %254 : vector<8x32xf32>
    %256 = vector.broadcast %235 : vector<1x32xf32> to vector<8x32xf32>
    %257 = arith.addf %255, %256 : vector<8x32xf32>
    %c496 = arith.constant 496 : index
    %c0_91 = arith.constant 0 : index
    %258 = vector.load %arg2[%c496, %c0_91] : memref<688x128xf32, #tpu.memory_space<vmem>>, vector<32x96xf32>
    %cst_92 = arith.constant dense<0.000000e+00> : vector<8x96xf32>
    %259 = tpu.matmul %257, %258, %cst_92 {dimension_numbers = #tpu.dot_dimension_numbers<[1], [0], [0], [1], [0, 0, 1, 1], [], []>} : vector<8x32xf32>, vector<32x96xf32>, vector<8x96xf32> -> vector<8x96xf32>
    %c528 = arith.constant 528 : index
    %c0_93 = arith.constant 0 : index
    %260 = vector.load %arg2[%c528, %c0_93] : memref<688x128xf32, #tpu.memory_space<vmem>>, vector<1x96xf32>
    %261 = vector.broadcast %260 : vector<1x96xf32> to vector<8x96xf32>
    %262 = arith.addf %259, %261 : vector<8x96xf32>
    %263 = vector.extract_strided_slice %262 {offsets = [0, 32], sizes = [8, 32], strides = [1, 1]} : vector<8x96xf32> to vector<8x32xf32>
    %264 = tpu.transpose %263, [1, 0] : vector<8x32xf32> -> vector<32x8xf32>
    %265 = vector.extract_strided_slice %262 {offsets = [0, 0], sizes = [8, 16], strides = [1, 1]} : vector<8x96xf32> to vector<8x16xf32>
    %266 = vector.extract_strided_slice %264 {offsets = [0, 0], sizes = [16, 8], strides = [1, 1]} : vector<32x8xf32> to vector<16x8xf32>
    %cst_94 = arith.constant dense<0.000000e+00> : vector<8x8xf32>
    %267 = tpu.matmul %265, %266, %cst_94 {dimension_numbers = #tpu.dot_dimension_numbers<[1], [0], [0], [1], [0, 0, 1, 1], [], []>} : vector<8x16xf32>, vector<16x8xf32>, vector<8x8xf32> -> vector<8x8xf32>
    %268 = vector.extract_strided_slice %262 {offsets = [0, 16], sizes = [8, 16], strides = [1, 1]} : vector<8x96xf32> to vector<8x16xf32>
    %269 = vector.extract_strided_slice %264 {offsets = [16, 0], sizes = [16, 8], strides = [1, 1]} : vector<32x8xf32> to vector<16x8xf32>
    %cst_95 = arith.constant dense<0.000000e+00> : vector<8x8xf32>
    %270 = tpu.matmul %268, %269, %cst_95 {dimension_numbers = #tpu.dot_dimension_numbers<[1], [0], [0], [1], [0, 0, 1, 1], [], []>} : vector<8x16xf32>, vector<16x8xf32>, vector<8x8xf32> -> vector<8x8xf32>
    %271 = tpu.concatenate %267, %270 in 0 : vector<8x8xf32>, vector<8x8xf32> -> vector<16x8xf32>
    %cst_96 = arith.constant dense<0xFF800000> : vector<16xf32>
    %272 = vector.multi_reduction <maximumf>, %271, %cst_96 [1] : vector<16x8xf32> to vector<16xf32>
    %273 = vector.shape_cast %272 : vector<16xf32> to vector<16x1xf32>
    %274 = vector.broadcast %273 : vector<16x1xf32> to vector<16x8xf32>
    %275 = arith.subf %271, %274 : vector<16x8xf32>
    %276 = math.exp %275 : vector<16x8xf32>
    %cst_97 = arith.constant dense<0.000000e+00> : vector<16xf32>
    %277 = vector.multi_reduction <add>, %276, %cst_97 [1] : vector<16x8xf32> to vector<16xf32>
    %278 = vector.shape_cast %277 : vector<16xf32> to vector<16x1xf32>
    %279 = vector.broadcast %278 : vector<16x1xf32> to vector<16x8xf32>
    %280 = arith.divf %276, %279 : vector<16x8xf32>
    %c536 = arith.constant 536 : index
    %c0_98 = arith.constant 0 : index
    %281 = vector.load %arg2[%c536, %c0_98] : memref<688x128xf32, #tpu.memory_space<vmem>>, vector<32x32xf32>
    %c568 = arith.constant 568 : index
    %c0_99 = arith.constant 0 : index
    %282 = vector.load %arg2[%c568, %c0_99] : memref<688x128xf32, #tpu.memory_space<vmem>>, vector<1x32xf32>
    %283 = vector.extract_strided_slice %280 {offsets = [0, 0], sizes = [8, 8], strides = [1, 1]} : vector<16x8xf32> to vector<8x8xf32>
    %284 = vector.extract_strided_slice %262 {offsets = [0, 64], sizes = [8, 16], strides = [1, 1]} : vector<8x96xf32> to vector<8x16xf32>
    %cst_100 = arith.constant dense<0.000000e+00> : vector<8x16xf32>
    %285 = tpu.matmul %283, %284, %cst_100 {dimension_numbers = #tpu.dot_dimension_numbers<[1], [0], [0], [1], [0, 0, 1, 1], [], []>} : vector<8x8xf32>, vector<8x16xf32>, vector<8x16xf32> -> vector<8x16xf32>
    %286 = vector.extract_strided_slice %281 {offsets = [0, 0], sizes = [16, 32], strides = [1, 1]} : vector<32x32xf32> to vector<16x32xf32>
    %cst_101 = arith.constant dense<0.000000e+00> : vector<8x32xf32>
    %287 = tpu.matmul %285, %286, %cst_101 {dimension_numbers = #tpu.dot_dimension_numbers<[1], [0], [0], [1], [0, 0, 1, 1], [], []>} : vector<8x16xf32>, vector<16x32xf32>, vector<8x32xf32> -> vector<8x32xf32>
    %288 = vector.broadcast %282 : vector<1x32xf32> to vector<8x32xf32>
    %289 = arith.addf %288, %287 : vector<8x32xf32>
    %290 = vector.extract_strided_slice %280 {offsets = [8, 0], sizes = [8, 8], strides = [1, 1]} : vector<16x8xf32> to vector<8x8xf32>
    %291 = vector.extract_strided_slice %262 {offsets = [0, 80], sizes = [8, 16], strides = [1, 1]} : vector<8x96xf32> to vector<8x16xf32>
    %cst_102 = arith.constant dense<0.000000e+00> : vector<8x16xf32>
    %292 = tpu.matmul %290, %291, %cst_102 {dimension_numbers = #tpu.dot_dimension_numbers<[1], [0], [0], [1], [0, 0, 1, 1], [], []>} : vector<8x8xf32>, vector<8x16xf32>, vector<8x16xf32> -> vector<8x16xf32>
    %293 = vector.extract_strided_slice %281 {offsets = [16, 0], sizes = [16, 32], strides = [1, 1]} : vector<32x32xf32> to vector<16x32xf32>
    %cst_103 = arith.constant dense<0.000000e+00> : vector<8x32xf32>
    %294 = tpu.matmul %292, %293, %cst_103 {dimension_numbers = #tpu.dot_dimension_numbers<[1], [0], [0], [1], [0, 0, 1, 1], [], []>} : vector<8x16xf32>, vector<16x32xf32>, vector<8x32xf32> -> vector<8x32xf32>
    %295 = arith.addf %289, %294 : vector<8x32xf32>
    %296 = arith.addf %233, %295 : vector<8x32xf32>
    %c672 = arith.constant 672 : index
    %c0_104 = arith.constant 0 : index
    %297 = vector.load %arg2[%c672, %c0_104] : memref<688x128xf32, #tpu.memory_space<vmem>>, vector<1x32xf32>
    %c680 = arith.constant 680 : index
    %c0_105 = arith.constant 0 : index
    %298 = vector.load %arg2[%c680, %c0_105] : memref<688x128xf32, #tpu.memory_space<vmem>>, vector<1x32xf32>
    %cst_106 = arith.constant dense<0.000000e+00> : vector<8xf32>
    %299 = vector.multi_reduction <add>, %296, %cst_106 [1] : vector<8x32xf32> to vector<8xf32>
    %300 = vector.shape_cast %299 : vector<8xf32> to vector<8x1xf32>
    %cst_107 = arith.constant 3.200000e+01 : f32
    %301 = vector.broadcast %cst_107 : f32 to vector<8x1xf32>
    %302 = arith.divf %300, %301 : vector<8x1xf32>
    %303 = vector.broadcast %302 : vector<8x1xf32> to vector<8x32xf32>
    %304 = arith.subf %296, %303 : vector<8x32xf32>
    %305 = arith.mulf %304, %304 : vector<8x32xf32>
    %cst_108 = arith.constant dense<0.000000e+00> : vector<8xf32>
    %306 = vector.multi_reduction <add>, %305, %cst_108 [1] : vector<8x32xf32> to vector<8xf32>
    %307 = vector.shape_cast %306 : vector<8xf32> to vector<8x1xf32>
    %cst_109 = arith.constant 3.200000e+01 : f32
    %308 = vector.broadcast %cst_109 : f32 to vector<8x1xf32>
    %309 = arith.divf %307, %308 : vector<8x1xf32>
    %310 = vector.broadcast %302 : vector<8x1xf32> to vector<8x32xf32>
    %311 = arith.subf %296, %310 : vector<8x32xf32>
    %cst_110 = arith.constant 9.99999974E-6 : f32
    %312 = vector.broadcast %cst_110 : f32 to vector<8x1xf32>
    %313 = arith.addf %309, %312 : vector<8x1xf32>
    %314 = math.rsqrt %313 : vector<8x1xf32>
    %315 = vector.broadcast %314 : vector<8x1xf32> to vector<8x32xf32>
    %316 = arith.mulf %311, %315 : vector<8x32xf32>
    %317 = vector.broadcast %297 : vector<1x32xf32> to vector<8x32xf32>
    %318 = arith.mulf %316, %317 : vector<8x32xf32>
    %319 = vector.broadcast %298 : vector<1x32xf32> to vector<8x32xf32>
    %320 = arith.addf %318, %319 : vector<8x32xf32>
    %c576 = arith.constant 576 : index
    %c0_111 = arith.constant 0 : index
    %321 = vector.load %arg2[%c576, %c0_111] : memref<688x128xf32, #tpu.memory_space<vmem>>, vector<32x32xf32>
    %c608 = arith.constant 608 : index
    %c0_112 = arith.constant 0 : index
    %322 = vector.load %arg2[%c608, %c0_112] : memref<688x128xf32, #tpu.memory_space<vmem>>, vector<1x32xf32>
    %c616 = arith.constant 616 : index
    %c0_113 = arith.constant 0 : index
    %323 = vector.load %arg2[%c616, %c0_113] : memref<688x128xf32, #tpu.memory_space<vmem>>, vector<32x32xf32>
    %c648 = arith.constant 648 : index
    %c0_114 = arith.constant 0 : index
    %324 = vector.load %arg2[%c648, %c0_114] : memref<688x128xf32, #tpu.memory_space<vmem>>, vector<1x32xf32>
    %cst_115 = arith.constant dense<0.000000e+00> : vector<8x32xf32>
    %325 = tpu.matmul %320, %321, %cst_115 {dimension_numbers = #tpu.dot_dimension_numbers<[1], [0], [0], [1], [0, 0, 1, 1], [], []>} : vector<8x32xf32>, vector<32x32xf32>, vector<8x32xf32> -> vector<8x32xf32>
    %326 = vector.broadcast %322 : vector<1x32xf32> to vector<8x32xf32>
    %327 = arith.addf %325, %326 : vector<8x32xf32>
    %cst_116 = arith.constant 0.000000e+00 : f32
    %328 = vector.broadcast %cst_116 : f32 to vector<8x32xf32>
    %329 = arith.maximumf %327, %328 : vector<8x32xf32>
    %cst_117 = arith.constant dense<0.000000e+00> : vector<8x32xf32>
    %330 = tpu.matmul %329, %323, %cst_117 {dimension_numbers = #tpu.dot_dimension_numbers<[1], [0], [0], [1], [0, 0, 1, 1], [], []>} : vector<8x32xf32>, vector<32x32xf32>, vector<8x32xf32> -> vector<8x32xf32>
    %331 = vector.broadcast %324 : vector<1x32xf32> to vector<8x32xf32>
    %332 = arith.addf %330, %331 : vector<8x32xf32>
    %333 = arith.addf %296, %332 : vector<8x32xf32>
    %c272_118 = arith.constant 272 : index
    %c0_119 = arith.constant 0 : index
    %334 = vector.load %arg2[%c272_118, %c0_119] : memref<688x128xf32, #tpu.memory_space<vmem>>, vector<1x32xf32>
    %c280_120 = arith.constant 280 : index
    %c0_121 = arith.constant 0 : index
    %335 = vector.load %arg2[%c280_120, %c0_121] : memref<688x128xf32, #tpu.memory_space<vmem>>, vector<1x32xf32>
    %cst_122 = arith.constant dense<0.000000e+00> : vector<8xf32>
    %336 = vector.multi_reduction <add>, %333, %cst_122 [1] : vector<8x32xf32> to vector<8xf32>
    %337 = vector.shape_cast %336 : vector<8xf32> to vector<8x1xf32>
    %cst_123 = arith.constant 3.200000e+01 : f32
    %338 = vector.broadcast %cst_123 : f32 to vector<8x1xf32>
    %339 = arith.divf %337, %338 : vector<8x1xf32>
    %340 = vector.broadcast %339 : vector<8x1xf32> to vector<8x32xf32>
    %341 = arith.subf %333, %340 : vector<8x32xf32>
    %342 = arith.mulf %341, %341 : vector<8x32xf32>
    %cst_124 = arith.constant dense<0.000000e+00> : vector<8xf32>
    %343 = vector.multi_reduction <add>, %342, %cst_124 [1] : vector<8x32xf32> to vector<8xf32>
    %344 = vector.shape_cast %343 : vector<8xf32> to vector<8x1xf32>
    %cst_125 = arith.constant 3.200000e+01 : f32
    %345 = vector.broadcast %cst_125 : f32 to vector<8x1xf32>
    %346 = arith.divf %344, %345 : vector<8x1xf32>
    %347 = vector.broadcast %339 : vector<8x1xf32> to vector<8x32xf32>
    %348 = arith.subf %333, %347 : vector<8x32xf32>
    %cst_126 = arith.constant 9.99999974E-6 : f32
    %349 = vector.broadcast %cst_126 : f32 to vector<8x1xf32>
    %350 = arith.addf %346, %349 : vector<8x1xf32>
    %351 = math.rsqrt %350 : vector<8x1xf32>
    %352 = vector.broadcast %351 : vector<8x1xf32> to vector<8x32xf32>
    %353 = arith.mulf %348, %352 : vector<8x32xf32>
    %354 = vector.broadcast %334 : vector<1x32xf32> to vector<8x32xf32>
    %355 = arith.mulf %353, %354 : vector<8x32xf32>
    %356 = vector.broadcast %335 : vector<1x32xf32> to vector<8x32xf32>
    %357 = arith.addf %355, %356 : vector<8x32xf32>
    %c32_127 = arith.constant 32 : index
    %c0_128 = arith.constant 0 : index
    %358 = vector.load %arg2[%c32_127, %c0_128] : memref<688x128xf32, #tpu.memory_space<vmem>>, vector<32x32xf32>
    %cst_129 = arith.constant dense<0.000000e+00> : vector<8x32xf32>
    %359 = tpu.matmul %357, %358, %cst_129 {dimension_numbers = #tpu.dot_dimension_numbers<[1], [0], [0], [1], [0, 0, 1, 1], [], []>} : vector<8x32xf32>, vector<32x32xf32>, vector<8x32xf32> -> vector<8x32xf32>
    %c64_130 = arith.constant 64 : index
    %c0_131 = arith.constant 0 : index
    %360 = vector.load %arg2[%c64_130, %c0_131] : memref<688x128xf32, #tpu.memory_space<vmem>>, vector<1x32xf32>
    %361 = vector.broadcast %360 : vector<1x32xf32> to vector<8x32xf32>
    %362 = arith.addf %359, %361 : vector<8x32xf32>
    %cst_132 = arith.constant dense<0.000000e+00> : vector<8x16xf32>
    %363 = tpu.matmul %362, %49, %cst_132 {dimension_numbers = #tpu.dot_dimension_numbers<[1], [0], [0], [1], [0, 0, 1, 1], [], []>} : vector<8x32xf32>, vector<32x16xf32>, vector<8x16xf32> -> vector<8x16xf32>
    %cst_133 = arith.constant dense<0xFF800000> : vector<8xf32>
    %364 = vector.multi_reduction <maximumf>, %363, %cst_133 [1] : vector<8x16xf32> to vector<8xf32>
    %365 = vector.shape_cast %364 : vector<8xf32> to vector<8x1xf32>
    %366 = vector.broadcast %365 : vector<8x1xf32> to vector<8x16xf32>
    %367 = arith.subf %363, %366 : vector<8x16xf32>
    %368 = math.exp %367 : vector<8x16xf32>
    %cst_134 = arith.constant dense<0.000000e+00> : vector<8xf32>
    %369 = vector.multi_reduction <add>, %368, %cst_134 [1] : vector<8x16xf32> to vector<8xf32>
    %370 = vector.shape_cast %369 : vector<8xf32> to vector<8x1xf32>
    %371 = vector.broadcast %370 : vector<8x1xf32> to vector<8x16xf32>
    %372 = arith.divf %368, %371 : vector<8x16xf32>
    %cst_135 = arith.constant dense<0.000000e+00> : vector<8x32xf32>
    %373 = tpu.matmul %372, %48, %cst_135 {dimension_numbers = #tpu.dot_dimension_numbers<[1], [0], [0], [1], [0, 0, 1, 1], [], []>} : vector<8x16xf32>, vector<16x32xf32>, vector<8x32xf32> -> vector<8x32xf32>
    %c152_136 = arith.constant 152 : index
    %c0_137 = arith.constant 0 : index
    %374 = vector.load %arg2[%c152_136, %c0_137] : memref<688x128xf32, #tpu.memory_space<vmem>>, vector<32x32xf32>
    %cst_138 = arith.constant dense<0.000000e+00> : vector<8x32xf32>
    %375 = tpu.matmul %373, %374, %cst_138 {dimension_numbers = #tpu.dot_dimension_numbers<[1], [0], [0], [1], [0, 0, 1, 1], [], []>} : vector<8x32xf32>, vector<32x32xf32>, vector<8x32xf32> -> vector<8x32xf32>
    %376 = arith.addf %333, %375 : vector<8x32xf32>
    %c184_139 = arith.constant 184 : index
    %c0_140 = arith.constant 0 : index
    %377 = vector.load %arg2[%c184_139, %c0_140] : memref<688x128xf32, #tpu.memory_space<vmem>>, vector<1x32xf32>
    %378 = vector.broadcast %377 : vector<1x32xf32> to vector<8x32xf32>
    %379 = arith.addf %376, %378 : vector<8x32xf32>
    %c288_141 = arith.constant 288 : index
    %c0_142 = arith.constant 0 : index
    %380 = vector.load %arg2[%c288_141, %c0_142] : memref<688x128xf32, #tpu.memory_space<vmem>>, vector<1x32xf32>
    %c296_143 = arith.constant 296 : index
    %c0_144 = arith.constant 0 : index
    %381 = vector.load %arg2[%c296_143, %c0_144] : memref<688x128xf32, #tpu.memory_space<vmem>>, vector<1x32xf32>
    %cst_145 = arith.constant dense<0.000000e+00> : vector<8xf32>
    %382 = vector.multi_reduction <add>, %379, %cst_145 [1] : vector<8x32xf32> to vector<8xf32>
    %383 = vector.shape_cast %382 : vector<8xf32> to vector<8x1xf32>
    %cst_146 = arith.constant 3.200000e+01 : f32
    %384 = vector.broadcast %cst_146 : f32 to vector<8x1xf32>
    %385 = arith.divf %383, %384 : vector<8x1xf32>
    %386 = vector.broadcast %385 : vector<8x1xf32> to vector<8x32xf32>
    %387 = arith.subf %379, %386 : vector<8x32xf32>
    %388 = arith.mulf %387, %387 : vector<8x32xf32>
    %cst_147 = arith.constant dense<0.000000e+00> : vector<8xf32>
    %389 = vector.multi_reduction <add>, %388, %cst_147 [1] : vector<8x32xf32> to vector<8xf32>
    %390 = vector.shape_cast %389 : vector<8xf32> to vector<8x1xf32>
    %cst_148 = arith.constant 3.200000e+01 : f32
    %391 = vector.broadcast %cst_148 : f32 to vector<8x1xf32>
    %392 = arith.divf %390, %391 : vector<8x1xf32>
    %393 = vector.broadcast %385 : vector<8x1xf32> to vector<8x32xf32>
    %394 = arith.subf %379, %393 : vector<8x32xf32>
    %cst_149 = arith.constant 9.99999974E-6 : f32
    %395 = vector.broadcast %cst_149 : f32 to vector<8x1xf32>
    %396 = arith.addf %392, %395 : vector<8x1xf32>
    %397 = math.rsqrt %396 : vector<8x1xf32>
    %398 = vector.broadcast %397 : vector<8x1xf32> to vector<8x32xf32>
    %399 = arith.mulf %394, %398 : vector<8x32xf32>
    %400 = vector.broadcast %380 : vector<1x32xf32> to vector<8x32xf32>
    %401 = arith.mulf %399, %400 : vector<8x32xf32>
    %402 = vector.broadcast %381 : vector<1x32xf32> to vector<8x32xf32>
    %403 = arith.addf %401, %402 : vector<8x32xf32>
    %c192_150 = arith.constant 192 : index
    %c0_151 = arith.constant 0 : index
    %404 = vector.load %arg2[%c192_150, %c0_151] : memref<688x128xf32, #tpu.memory_space<vmem>>, vector<32x32xf32>
    %c224_152 = arith.constant 224 : index
    %c0_153 = arith.constant 0 : index
    %405 = vector.load %arg2[%c224_152, %c0_153] : memref<688x128xf32, #tpu.memory_space<vmem>>, vector<1x32xf32>
    %c232_154 = arith.constant 232 : index
    %c0_155 = arith.constant 0 : index
    %406 = vector.load %arg2[%c232_154, %c0_155] : memref<688x128xf32, #tpu.memory_space<vmem>>, vector<32x32xf32>
    %c264_156 = arith.constant 264 : index
    %c0_157 = arith.constant 0 : index
    %407 = vector.load %arg2[%c264_156, %c0_157] : memref<688x128xf32, #tpu.memory_space<vmem>>, vector<1x32xf32>
    %cst_158 = arith.constant dense<0.000000e+00> : vector<8x32xf32>
    %408 = tpu.matmul %403, %404, %cst_158 {dimension_numbers = #tpu.dot_dimension_numbers<[1], [0], [0], [1], [0, 0, 1, 1], [], []>} : vector<8x32xf32>, vector<32x32xf32>, vector<8x32xf32> -> vector<8x32xf32>
    %409 = vector.broadcast %405 : vector<1x32xf32> to vector<8x32xf32>
    %410 = arith.addf %408, %409 : vector<8x32xf32>
    %cst_159 = arith.constant 0.000000e+00 : f32
    %411 = vector.broadcast %cst_159 : f32 to vector<8x32xf32>
    %412 = arith.maximumf %410, %411 : vector<8x32xf32>
    %cst_160 = arith.constant dense<0.000000e+00> : vector<8x32xf32>
    %413 = tpu.matmul %412, %406, %cst_160 {dimension_numbers = #tpu.dot_dimension_numbers<[1], [0], [0], [1], [0, 0, 1, 1], [], []>} : vector<8x32xf32>, vector<32x32xf32>, vector<8x32xf32> -> vector<8x32xf32>
    %414 = vector.broadcast %407 : vector<1x32xf32> to vector<8x32xf32>
    %415 = arith.addf %413, %414 : vector<8x32xf32>
    %416 = arith.addf %379, %415 : vector<8x32xf32>
    %c464_161 = arith.constant 464 : index
    %c0_162 = arith.constant 0 : index
    %417 = vector.load %arg2[%c464_161, %c0_162] : memref<688x128xf32, #tpu.memory_space<vmem>>, vector<1x32xf32>
    %c472_163 = arith.constant 472 : index
    %c0_164 = arith.constant 0 : index
    %418 = vector.load %arg2[%c472_163, %c0_164] : memref<688x128xf32, #tpu.memory_space<vmem>>, vector<1x32xf32>
    %cst_165 = arith.constant dense<0.000000e+00> : vector<8xf32>
    %419 = vector.multi_reduction <add>, %416, %cst_165 [1] : vector<8x32xf32> to vector<8xf32>
    %420 = vector.shape_cast %419 : vector<8xf32> to vector<8x1xf32>
    %cst_166 = arith.constant 3.200000e+01 : f32
    %421 = vector.broadcast %cst_166 : f32 to vector<8x1xf32>
    %422 = arith.divf %420, %421 : vector<8x1xf32>
    %423 = vector.broadcast %422 : vector<8x1xf32> to vector<8x32xf32>
    %424 = arith.subf %416, %423 : vector<8x32xf32>
    %425 = arith.mulf %424, %424 : vector<8x32xf32>
    %cst_167 = arith.constant dense<0.000000e+00> : vector<8xf32>
    %426 = vector.multi_reduction <add>, %425, %cst_167 [1] : vector<8x32xf32> to vector<8xf32>
    %427 = vector.shape_cast %426 : vector<8xf32> to vector<8x1xf32>
    %cst_168 = arith.constant 3.200000e+01 : f32
    %428 = vector.broadcast %cst_168 : f32 to vector<8x1xf32>
    %429 = arith.divf %427, %428 : vector<8x1xf32>
    %430 = vector.broadcast %422 : vector<8x1xf32> to vector<8x32xf32>
    %431 = arith.subf %416, %430 : vector<8x32xf32>
    %cst_169 = arith.constant 9.99999974E-6 : f32
    %432 = vector.broadcast %cst_169 : f32 to vector<8x1xf32>
    %433 = arith.addf %429, %432 : vector<8x1xf32>
    %434 = math.rsqrt %433 : vector<8x1xf32>
    %435 = vector.broadcast %434 : vector<8x1xf32> to vector<8x32xf32>
    %436 = arith.mulf %431, %435 : vector<8x32xf32>
    %437 = vector.broadcast %417 : vector<1x32xf32> to vector<8x32xf32>
    %438 = arith.mulf %436, %437 : vector<8x32xf32>
    %439 = vector.broadcast %418 : vector<1x32xf32> to vector<8x32xf32>
    %440 = arith.addf %438, %439 : vector<8x32xf32>
    %c304_170 = arith.constant 304 : index
    %c0_171 = arith.constant 0 : index
    %441 = vector.load %arg2[%c304_170, %c0_171] : memref<688x128xf32, #tpu.memory_space<vmem>>, vector<32x96xf32>
    %cst_172 = arith.constant dense<0.000000e+00> : vector<8x96xf32>
    %442 = tpu.matmul %440, %441, %cst_172 {dimension_numbers = #tpu.dot_dimension_numbers<[1], [0], [0], [1], [0, 0, 1, 1], [], []>} : vector<8x32xf32>, vector<32x96xf32>, vector<8x96xf32> -> vector<8x96xf32>
    %c336_173 = arith.constant 336 : index
    %c0_174 = arith.constant 0 : index
    %443 = vector.load %arg2[%c336_173, %c0_174] : memref<688x128xf32, #tpu.memory_space<vmem>>, vector<1x96xf32>
    %444 = vector.broadcast %443 : vector<1x96xf32> to vector<8x96xf32>
    %445 = arith.addf %442, %444 : vector<8x96xf32>
    %446 = vector.extract_strided_slice %445 {offsets = [0, 32], sizes = [8, 32], strides = [1, 1]} : vector<8x96xf32> to vector<8x32xf32>
    %447 = tpu.transpose %446, [1, 0] : vector<8x32xf32> -> vector<32x8xf32>
    %448 = vector.extract_strided_slice %445 {offsets = [0, 0], sizes = [8, 16], strides = [1, 1]} : vector<8x96xf32> to vector<8x16xf32>
    %449 = vector.extract_strided_slice %447 {offsets = [0, 0], sizes = [16, 8], strides = [1, 1]} : vector<32x8xf32> to vector<16x8xf32>
    %cst_175 = arith.constant dense<0.000000e+00> : vector<8x8xf32>
    %450 = tpu.matmul %448, %449, %cst_175 {dimension_numbers = #tpu.dot_dimension_numbers<[1], [0], [0], [1], [0, 0, 1, 1], [], []>} : vector<8x16xf32>, vector<16x8xf32>, vector<8x8xf32> -> vector<8x8xf32>
    %451 = vector.extract_strided_slice %445 {offsets = [0, 16], sizes = [8, 16], strides = [1, 1]} : vector<8x96xf32> to vector<8x16xf32>
    %452 = vector.extract_strided_slice %447 {offsets = [16, 0], sizes = [16, 8], strides = [1, 1]} : vector<32x8xf32> to vector<16x8xf32>
    %cst_176 = arith.constant dense<0.000000e+00> : vector<8x8xf32>
    %453 = tpu.matmul %451, %452, %cst_176 {dimension_numbers = #tpu.dot_dimension_numbers<[1], [0], [0], [1], [0, 0, 1, 1], [], []>} : vector<8x16xf32>, vector<16x8xf32>, vector<8x8xf32> -> vector<8x8xf32>
    %454 = tpu.concatenate %450, %453 in 0 : vector<8x8xf32>, vector<8x8xf32> -> vector<16x8xf32>
    %cst_177 = arith.constant dense<0xFF800000> : vector<16xf32>
    %455 = vector.multi_reduction <maximumf>, %454, %cst_177 [1] : vector<16x8xf32> to vector<16xf32>
    %456 = vector.shape_cast %455 : vector<16xf32> to vector<16x1xf32>
    %457 = vector.broadcast %456 : vector<16x1xf32> to vector<16x8xf32>
    %458 = arith.subf %454, %457 : vector<16x8xf32>
    %459 = math.exp %458 : vector<16x8xf32>
    %cst_178 = arith.constant dense<0.000000e+00> : vector<16xf32>
    %460 = vector.multi_reduction <add>, %459, %cst_178 [1] : vector<16x8xf32> to vector<16xf32>
    %461 = vector.shape_cast %460 : vector<16xf32> to vector<16x1xf32>
    %462 = vector.broadcast %461 : vector<16x1xf32> to vector<16x8xf32>
    %463 = arith.divf %459, %462 : vector<16x8xf32>
    %c344_179 = arith.constant 344 : index
    %c0_180 = arith.constant 0 : index
    %464 = vector.load %arg2[%c344_179, %c0_180] : memref<688x128xf32, #tpu.memory_space<vmem>>, vector<32x32xf32>
    %c376_181 = arith.constant 376 : index
    %c0_182 = arith.constant 0 : index
    %465 = vector.load %arg2[%c376_181, %c0_182] : memref<688x128xf32, #tpu.memory_space<vmem>>, vector<1x32xf32>
    %466 = vector.extract_strided_slice %463 {offsets = [0, 0], sizes = [8, 8], strides = [1, 1]} : vector<16x8xf32> to vector<8x8xf32>
    %467 = vector.extract_strided_slice %445 {offsets = [0, 64], sizes = [8, 16], strides = [1, 1]} : vector<8x96xf32> to vector<8x16xf32>
    %cst_183 = arith.constant dense<0.000000e+00> : vector<8x16xf32>
    %468 = tpu.matmul %466, %467, %cst_183 {dimension_numbers = #tpu.dot_dimension_numbers<[1], [0], [0], [1], [0, 0, 1, 1], [], []>} : vector<8x8xf32>, vector<8x16xf32>, vector<8x16xf32> -> vector<8x16xf32>
    %469 = vector.extract_strided_slice %464 {offsets = [0, 0], sizes = [16, 32], strides = [1, 1]} : vector<32x32xf32> to vector<16x32xf32>
    %cst_184 = arith.constant dense<0.000000e+00> : vector<8x32xf32>
    %470 = tpu.matmul %468, %469, %cst_184 {dimension_numbers = #tpu.dot_dimension_numbers<[1], [0], [0], [1], [0, 0, 1, 1], [], []>} : vector<8x16xf32>, vector<16x32xf32>, vector<8x32xf32> -> vector<8x32xf32>
    %471 = vector.broadcast %465 : vector<1x32xf32> to vector<8x32xf32>
    %472 = arith.addf %471, %470 : vector<8x32xf32>
    %473 = vector.extract_strided_slice %463 {offsets = [8, 0], sizes = [8, 8], strides = [1, 1]} : vector<16x8xf32> to vector<8x8xf32>
    %474 = vector.extract_strided_slice %445 {offsets = [0, 80], sizes = [8, 16], strides = [1, 1]} : vector<8x96xf32> to vector<8x16xf32>
    %cst_185 = arith.constant dense<0.000000e+00> : vector<8x16xf32>
    %475 = tpu.matmul %473, %474, %cst_185 {dimension_numbers = #tpu.dot_dimension_numbers<[1], [0], [0], [1], [0, 0, 1, 1], [], []>} : vector<8x8xf32>, vector<8x16xf32>, vector<8x16xf32> -> vector<8x16xf32>
    %476 = vector.extract_strided_slice %464 {offsets = [16, 0], sizes = [16, 32], strides = [1, 1]} : vector<32x32xf32> to vector<16x32xf32>
    %cst_186 = arith.constant dense<0.000000e+00> : vector<8x32xf32>
    %477 = tpu.matmul %475, %476, %cst_186 {dimension_numbers = #tpu.dot_dimension_numbers<[1], [0], [0], [1], [0, 0, 1, 1], [], []>} : vector<8x16xf32>, vector<16x32xf32>, vector<8x32xf32> -> vector<8x32xf32>
    %478 = arith.addf %472, %477 : vector<8x32xf32>
    %479 = arith.addf %416, %478 : vector<8x32xf32>
    %c480_187 = arith.constant 480 : index
    %c0_188 = arith.constant 0 : index
    %480 = vector.load %arg2[%c480_187, %c0_188] : memref<688x128xf32, #tpu.memory_space<vmem>>, vector<1x32xf32>
    %c488_189 = arith.constant 488 : index
    %c0_190 = arith.constant 0 : index
    %481 = vector.load %arg2[%c488_189, %c0_190] : memref<688x128xf32, #tpu.memory_space<vmem>>, vector<1x32xf32>
    %cst_191 = arith.constant dense<0.000000e+00> : vector<8xf32>
    %482 = vector.multi_reduction <add>, %479, %cst_191 [1] : vector<8x32xf32> to vector<8xf32>
    %483 = vector.shape_cast %482 : vector<8xf32> to vector<8x1xf32>
    %cst_192 = arith.constant 3.200000e+01 : f32
    %484 = vector.broadcast %cst_192 : f32 to vector<8x1xf32>
    %485 = arith.divf %483, %484 : vector<8x1xf32>
    %486 = vector.broadcast %485 : vector<8x1xf32> to vector<8x32xf32>
    %487 = arith.subf %479, %486 : vector<8x32xf32>
    %488 = arith.mulf %487, %487 : vector<8x32xf32>
    %cst_193 = arith.constant dense<0.000000e+00> : vector<8xf32>
    %489 = vector.multi_reduction <add>, %488, %cst_193 [1] : vector<8x32xf32> to vector<8xf32>
    %490 = vector.shape_cast %489 : vector<8xf32> to vector<8x1xf32>
    %cst_194 = arith.constant 3.200000e+01 : f32
    %491 = vector.broadcast %cst_194 : f32 to vector<8x1xf32>
    %492 = arith.divf %490, %491 : vector<8x1xf32>
    %493 = vector.broadcast %485 : vector<8x1xf32> to vector<8x32xf32>
    %494 = arith.subf %479, %493 : vector<8x32xf32>
    %cst_195 = arith.constant 9.99999974E-6 : f32
    %495 = vector.broadcast %cst_195 : f32 to vector<8x1xf32>
    %496 = arith.addf %492, %495 : vector<8x1xf32>
    %497 = math.rsqrt %496 : vector<8x1xf32>
    %498 = vector.broadcast %497 : vector<8x1xf32> to vector<8x32xf32>
    %499 = arith.mulf %494, %498 : vector<8x32xf32>
    %500 = vector.broadcast %480 : vector<1x32xf32> to vector<8x32xf32>
    %501 = arith.mulf %499, %500 : vector<8x32xf32>
    %502 = vector.broadcast %481 : vector<1x32xf32> to vector<8x32xf32>
    %503 = arith.addf %501, %502 : vector<8x32xf32>
    %c384_196 = arith.constant 384 : index
    %c0_197 = arith.constant 0 : index
    %504 = vector.load %arg2[%c384_196, %c0_197] : memref<688x128xf32, #tpu.memory_space<vmem>>, vector<32x32xf32>
    %c416_198 = arith.constant 416 : index
    %c0_199 = arith.constant 0 : index
    %505 = vector.load %arg2[%c416_198, %c0_199] : memref<688x128xf32, #tpu.memory_space<vmem>>, vector<1x32xf32>
    %c424_200 = arith.constant 424 : index
    %c0_201 = arith.constant 0 : index
    %506 = vector.load %arg2[%c424_200, %c0_201] : memref<688x128xf32, #tpu.memory_space<vmem>>, vector<32x32xf32>
    %c456_202 = arith.constant 456 : index
    %c0_203 = arith.constant 0 : index
    %507 = vector.load %arg2[%c456_202, %c0_203] : memref<688x128xf32, #tpu.memory_space<vmem>>, vector<1x32xf32>
    %cst_204 = arith.constant dense<0.000000e+00> : vector<8x32xf32>
    %508 = tpu.matmul %503, %504, %cst_204 {dimension_numbers = #tpu.dot_dimension_numbers<[1], [0], [0], [1], [0, 0, 1, 1], [], []>} : vector<8x32xf32>, vector<32x32xf32>, vector<8x32xf32> -> vector<8x32xf32>
    %509 = vector.broadcast %505 : vector<1x32xf32> to vector<8x32xf32>
    %510 = arith.addf %508, %509 : vector<8x32xf32>
    %cst_205 = arith.constant 0.000000e+00 : f32
    %511 = vector.broadcast %cst_205 : f32 to vector<8x32xf32>
    %512 = arith.maximumf %510, %511 : vector<8x32xf32>
    %cst_206 = arith.constant dense<0.000000e+00> : vector<8x32xf32>
    %513 = tpu.matmul %512, %506, %cst_206 {dimension_numbers = #tpu.dot_dimension_numbers<[1], [0], [0], [1], [0, 0, 1, 1], [], []>} : vector<8x32xf32>, vector<32x32xf32>, vector<8x32xf32> -> vector<8x32xf32>
    %514 = vector.broadcast %507 : vector<1x32xf32> to vector<8x32xf32>
    %515 = arith.addf %513, %514 : vector<8x32xf32>
    %516 = arith.addf %479, %515 : vector<8x32xf32>
    %c656_207 = arith.constant 656 : index
    %c0_208 = arith.constant 0 : index
    %517 = vector.load %arg2[%c656_207, %c0_208] : memref<688x128xf32, #tpu.memory_space<vmem>>, vector<1x32xf32>
    %c664_209 = arith.constant 664 : index
    %c0_210 = arith.constant 0 : index
    %518 = vector.load %arg2[%c664_209, %c0_210] : memref<688x128xf32, #tpu.memory_space<vmem>>, vector<1x32xf32>
    %cst_211 = arith.constant dense<0.000000e+00> : vector<8xf32>
    %519 = vector.multi_reduction <add>, %516, %cst_211 [1] : vector<8x32xf32> to vector<8xf32>
    %520 = vector.shape_cast %519 : vector<8xf32> to vector<8x1xf32>
    %cst_212 = arith.constant 3.200000e+01 : f32
    %521 = vector.broadcast %cst_212 : f32 to vector<8x1xf32>
    %522 = arith.divf %520, %521 : vector<8x1xf32>
    %523 = vector.broadcast %522 : vector<8x1xf32> to vector<8x32xf32>
    %524 = arith.subf %516, %523 : vector<8x32xf32>
    %525 = arith.mulf %524, %524 : vector<8x32xf32>
    %cst_213 = arith.constant dense<0.000000e+00> : vector<8xf32>
    %526 = vector.multi_reduction <add>, %525, %cst_213 [1] : vector<8x32xf32> to vector<8xf32>
    %527 = vector.shape_cast %526 : vector<8xf32> to vector<8x1xf32>
    %cst_214 = arith.constant 3.200000e+01 : f32
    %528 = vector.broadcast %cst_214 : f32 to vector<8x1xf32>
    %529 = arith.divf %527, %528 : vector<8x1xf32>
    %530 = vector.broadcast %522 : vector<8x1xf32> to vector<8x32xf32>
    %531 = arith.subf %516, %530 : vector<8x32xf32>
    %cst_215 = arith.constant 9.99999974E-6 : f32
    %532 = vector.broadcast %cst_215 : f32 to vector<8x1xf32>
    %533 = arith.addf %529, %532 : vector<8x1xf32>
    %534 = math.rsqrt %533 : vector<8x1xf32>
    %535 = vector.broadcast %534 : vector<8x1xf32> to vector<8x32xf32>
    %536 = arith.mulf %531, %535 : vector<8x32xf32>
    %537 = vector.broadcast %517 : vector<1x32xf32> to vector<8x32xf32>
    %538 = arith.mulf %536, %537 : vector<8x32xf32>
    %539 = vector.broadcast %518 : vector<1x32xf32> to vector<8x32xf32>
    %540 = arith.addf %538, %539 : vector<8x32xf32>
    %c496_216 = arith.constant 496 : index
    %c0_217 = arith.constant 0 : index
    %541 = vector.load %arg2[%c496_216, %c0_217] : memref<688x128xf32, #tpu.memory_space<vmem>>, vector<32x96xf32>
    %cst_218 = arith.constant dense<0.000000e+00> : vector<8x96xf32>
    %542 = tpu.matmul %540, %541, %cst_218 {dimension_numbers = #tpu.dot_dimension_numbers<[1], [0], [0], [1], [0, 0, 1, 1], [], []>} : vector<8x32xf32>, vector<32x96xf32>, vector<8x96xf32> -> vector<8x96xf32>
    %c528_219 = arith.constant 528 : index
    %c0_220 = arith.constant 0 : index
    %543 = vector.load %arg2[%c528_219, %c0_220] : memref<688x128xf32, #tpu.memory_space<vmem>>, vector<1x96xf32>
    %544 = vector.broadcast %543 : vector<1x96xf32> to vector<8x96xf32>
    %545 = arith.addf %542, %544 : vector<8x96xf32>
    %546 = vector.extract_strided_slice %545 {offsets = [0, 32], sizes = [8, 32], strides = [1, 1]} : vector<8x96xf32> to vector<8x32xf32>
    %547 = tpu.transpose %546, [1, 0] : vector<8x32xf32> -> vector<32x8xf32>
    %548 = vector.extract_strided_slice %545 {offsets = [0, 0], sizes = [8, 16], strides = [1, 1]} : vector<8x96xf32> to vector<8x16xf32>
    %549 = vector.extract_strided_slice %547 {offsets = [0, 0], sizes = [16, 8], strides = [1, 1]} : vector<32x8xf32> to vector<16x8xf32>
    %cst_221 = arith.constant dense<0.000000e+00> : vector<8x8xf32>
    %550 = tpu.matmul %548, %549, %cst_221 {dimension_numbers = #tpu.dot_dimension_numbers<[1], [0], [0], [1], [0, 0, 1, 1], [], []>} : vector<8x16xf32>, vector<16x8xf32>, vector<8x8xf32> -> vector<8x8xf32>
    %551 = vector.extract_strided_slice %545 {offsets = [0, 16], sizes = [8, 16], strides = [1, 1]} : vector<8x96xf32> to vector<8x16xf32>
    %552 = vector.extract_strided_slice %547 {offsets = [16, 0], sizes = [16, 8], strides = [1, 1]} : vector<32x8xf32> to vector<16x8xf32>
    %cst_222 = arith.constant dense<0.000000e+00> : vector<8x8xf32>
    %553 = tpu.matmul %551, %552, %cst_222 {dimension_numbers = #tpu.dot_dimension_numbers<[1], [0], [0], [1], [0, 0, 1, 1], [], []>} : vector<8x16xf32>, vector<16x8xf32>, vector<8x8xf32> -> vector<8x8xf32>
    %554 = tpu.concatenate %550, %553 in 0 : vector<8x8xf32>, vector<8x8xf32> -> vector<16x8xf32>
    %cst_223 = arith.constant dense<0xFF800000> : vector<16xf32>
    %555 = vector.multi_reduction <maximumf>, %554, %cst_223 [1] : vector<16x8xf32> to vector<16xf32>
    %556 = vector.shape_cast %555 : vector<16xf32> to vector<16x1xf32>
    %557 = vector.broadcast %556 : vector<16x1xf32> to vector<16x8xf32>
    %558 = arith.subf %554, %557 : vector<16x8xf32>
    %559 = math.exp %558 : vector<16x8xf32>
    %cst_224 = arith.constant dense<0.000000e+00> : vector<16xf32>
    %560 = vector.multi_reduction <add>, %559, %cst_224 [1] : vector<16x8xf32> to vector<16xf32>
    %561 = vector.shape_cast %560 : vector<16xf32> to vector<16x1xf32>
    %562 = vector.broadcast %561 : vector<16x1xf32> to vector<16x8xf32>
    %563 = arith.divf %559, %562 : vector<16x8xf32>
    %c536_225 = arith.constant 536 : index
    %c0_226 = arith.constant 0 : index
    %564 = vector.load %arg2[%c536_225, %c0_226] : memref<688x128xf32, #tpu.memory_space<vmem>>, vector<32x32xf32>
    %c568_227 = arith.constant 568 : index
    %c0_228 = arith.constant 0 : index
    %565 = vector.load %arg2[%c568_227, %c0_228] : memref<688x128xf32, #tpu.memory_space<vmem>>, vector<1x32xf32>
    %566 = vector.extract_strided_slice %563 {offsets = [0, 0], sizes = [8, 8], strides = [1, 1]} : vector<16x8xf32> to vector<8x8xf32>
    %567 = vector.extract_strided_slice %545 {offsets = [0, 64], sizes = [8, 16], strides = [1, 1]} : vector<8x96xf32> to vector<8x16xf32>
    %cst_229 = arith.constant dense<0.000000e+00> : vector<8x16xf32>
    %568 = tpu.matmul %566, %567, %cst_229 {dimension_numbers = #tpu.dot_dimension_numbers<[1], [0], [0], [1], [0, 0, 1, 1], [], []>} : vector<8x8xf32>, vector<8x16xf32>, vector<8x16xf32> -> vector<8x16xf32>
    %569 = vector.extract_strided_slice %564 {offsets = [0, 0], sizes = [16, 32], strides = [1, 1]} : vector<32x32xf32> to vector<16x32xf32>
    %cst_230 = arith.constant dense<0.000000e+00> : vector<8x32xf32>
    %570 = tpu.matmul %568, %569, %cst_230 {dimension_numbers = #tpu.dot_dimension_numbers<[1], [0], [0], [1], [0, 0, 1, 1], [], []>} : vector<8x16xf32>, vector<16x32xf32>, vector<8x32xf32> -> vector<8x32xf32>
    %571 = vector.broadcast %565 : vector<1x32xf32> to vector<8x32xf32>
    %572 = arith.addf %571, %570 : vector<8x32xf32>
    %573 = vector.extract_strided_slice %563 {offsets = [8, 0], sizes = [8, 8], strides = [1, 1]} : vector<16x8xf32> to vector<8x8xf32>
    %574 = vector.extract_strided_slice %545 {offsets = [0, 80], sizes = [8, 16], strides = [1, 1]} : vector<8x96xf32> to vector<8x16xf32>
    %cst_231 = arith.constant dense<0.000000e+00> : vector<8x16xf32>
    %575 = tpu.matmul %573, %574, %cst_231 {dimension_numbers = #tpu.dot_dimension_numbers<[1], [0], [0], [1], [0, 0, 1, 1], [], []>} : vector<8x8xf32>, vector<8x16xf32>, vector<8x16xf32> -> vector<8x16xf32>
    %576 = vector.extract_strided_slice %564 {offsets = [16, 0], sizes = [16, 32], strides = [1, 1]} : vector<32x32xf32> to vector<16x32xf32>
    %cst_232 = arith.constant dense<0.000000e+00> : vector<8x32xf32>
    %577 = tpu.matmul %575, %576, %cst_232 {dimension_numbers = #tpu.dot_dimension_numbers<[1], [0], [0], [1], [0, 0, 1, 1], [], []>} : vector<8x16xf32>, vector<16x32xf32>, vector<8x32xf32> -> vector<8x32xf32>
    %578 = arith.addf %572, %577 : vector<8x32xf32>
    %579 = arith.addf %516, %578 : vector<8x32xf32>
    %c672_233 = arith.constant 672 : index
    %c0_234 = arith.constant 0 : index
    %580 = vector.load %arg2[%c672_233, %c0_234] : memref<688x128xf32, #tpu.memory_space<vmem>>, vector<1x32xf32>
    %c680_235 = arith.constant 680 : index
    %c0_236 = arith.constant 0 : index
    %581 = vector.load %arg2[%c680_235, %c0_236] : memref<688x128xf32, #tpu.memory_space<vmem>>, vector<1x32xf32>
    %cst_237 = arith.constant dense<0.000000e+00> : vector<8xf32>
    %582 = vector.multi_reduction <add>, %579, %cst_237 [1] : vector<8x32xf32> to vector<8xf32>
    %583 = vector.shape_cast %582 : vector<8xf32> to vector<8x1xf32>
    %cst_238 = arith.constant 3.200000e+01 : f32
    %584 = vector.broadcast %cst_238 : f32 to vector<8x1xf32>
    %585 = arith.divf %583, %584 : vector<8x1xf32>
    %586 = vector.broadcast %585 : vector<8x1xf32> to vector<8x32xf32>
    %587 = arith.subf %579, %586 : vector<8x32xf32>
    %588 = arith.mulf %587, %587 : vector<8x32xf32>
    %cst_239 = arith.constant dense<0.000000e+00> : vector<8xf32>
    %589 = vector.multi_reduction <add>, %588, %cst_239 [1] : vector<8x32xf32> to vector<8xf32>
    %590 = vector.shape_cast %589 : vector<8xf32> to vector<8x1xf32>
    %cst_240 = arith.constant 3.200000e+01 : f32
    %591 = vector.broadcast %cst_240 : f32 to vector<8x1xf32>
    %592 = arith.divf %590, %591 : vector<8x1xf32>
    %593 = vector.broadcast %585 : vector<8x1xf32> to vector<8x32xf32>
    %594 = arith.subf %579, %593 : vector<8x32xf32>
    %cst_241 = arith.constant 9.99999974E-6 : f32
    %595 = vector.broadcast %cst_241 : f32 to vector<8x1xf32>
    %596 = arith.addf %592, %595 : vector<8x1xf32>
    %597 = math.rsqrt %596 : vector<8x1xf32>
    %598 = vector.broadcast %597 : vector<8x1xf32> to vector<8x32xf32>
    %599 = arith.mulf %594, %598 : vector<8x32xf32>
    %600 = vector.broadcast %580 : vector<1x32xf32> to vector<8x32xf32>
    %601 = arith.mulf %599, %600 : vector<8x32xf32>
    %602 = vector.broadcast %581 : vector<1x32xf32> to vector<8x32xf32>
    %603 = arith.addf %601, %602 : vector<8x32xf32>
    %c576_242 = arith.constant 576 : index
    %c0_243 = arith.constant 0 : index
    %604 = vector.load %arg2[%c576_242, %c0_243] : memref<688x128xf32, #tpu.memory_space<vmem>>, vector<32x32xf32>
    %c608_244 = arith.constant 608 : index
    %c0_245 = arith.constant 0 : index
    %605 = vector.load %arg2[%c608_244, %c0_245] : memref<688x128xf32, #tpu.memory_space<vmem>>, vector<1x32xf32>
    %c616_246 = arith.constant 616 : index
    %c0_247 = arith.constant 0 : index
    %606 = vector.load %arg2[%c616_246, %c0_247] : memref<688x128xf32, #tpu.memory_space<vmem>>, vector<32x32xf32>
    %c648_248 = arith.constant 648 : index
    %c0_249 = arith.constant 0 : index
    %607 = vector.load %arg2[%c648_248, %c0_249] : memref<688x128xf32, #tpu.memory_space<vmem>>, vector<1x32xf32>
    %cst_250 = arith.constant dense<0.000000e+00> : vector<8x32xf32>
    %608 = tpu.matmul %603, %604, %cst_250 {dimension_numbers = #tpu.dot_dimension_numbers<[1], [0], [0], [1], [0, 0, 1, 1], [], []>} : vector<8x32xf32>, vector<32x32xf32>, vector<8x32xf32> -> vector<8x32xf32>
    %609 = vector.broadcast %605 : vector<1x32xf32> to vector<8x32xf32>
    %610 = arith.addf %608, %609 : vector<8x32xf32>
    %cst_251 = arith.constant 0.000000e+00 : f32
    %611 = vector.broadcast %cst_251 : f32 to vector<8x32xf32>
    %612 = arith.maximumf %610, %611 : vector<8x32xf32>
    %cst_252 = arith.constant dense<0.000000e+00> : vector<8x32xf32>
    %613 = tpu.matmul %612, %606, %cst_252 {dimension_numbers = #tpu.dot_dimension_numbers<[1], [0], [0], [1], [0, 0, 1, 1], [], []>} : vector<8x32xf32>, vector<32x32xf32>, vector<8x32xf32> -> vector<8x32xf32>
    %614 = vector.broadcast %607 : vector<1x32xf32> to vector<8x32xf32>
    %615 = arith.addf %613, %614 : vector<8x32xf32>
    %616 = arith.addf %579, %615 : vector<8x32xf32>
    %c0_253 = arith.constant 0 : index
    %c0_254 = arith.constant 0 : index
    %c0_255 = arith.constant 0 : index
    %617 = vector.load %arg3[%c0_253, %c0_254, %c0_255] : memref<1x8x32xf32, #tpu.memory_space<vmem>>, vector<1x8x32xf32>
    %618 = vector.shape_cast %617 : vector<1x8x32xf32> to vector<8x32xf32>
    %619 = vector.shape_cast %616 : vector<8x32xf32> to vector<1x8x32xf32>
    tpu.vector_store %arg3[%c0_253, %c0_254, %c0_255], %619 {strides = array<i32>} : memref<1x8x32xf32, #tpu.memory_space<vmem>>, vector<1x8x32xf32>,
    return
  }
  func.func @transform_0(%arg0: i32) -> (i32, i32, i32) {
    %c0_i32 = arith.constant 0 : i32
    %c0_i32_0 = arith.constant 0 : i32
    %c0_i32_1 = arith.constant 0 : i32
    return %arg0, %c0_i32, %c0_i32_0 : i32, i32, i32
  }
  func.func @transform_1(%arg0: i32) -> (i32, i32) {
    %c0_i32 = arith.constant 0 : i32
    %c0_i32_0 = arith.constant 0 : i32
    %c0_i32_1 = arith.constant 0 : i32
    return %c0_i32, %c0_i32_0 : i32, i32
  }
  func.func @transform_2(%arg0: i32) -> (i32, i32, i32) {
    %c0_i32 = arith.constant 0 : i32
    %c0_i32_0 = arith.constant 0 : i32
    %c0_i32_1 = arith.constant 0 : i32
    return %arg0, %c0_i32, %c0_i32_0 : i32, i32, i32
  }
}

</mosaic_0001>

<bundles_post_ra>
// kernel: perceiver_forward.1
= control target key start
LH: loop header
LB: loop body
LE: loop exit
PB: predicated region body
PF: predicated region fallthrough
CT: control target
= control target key end

     0   :  { %7 = vsyncpa [#allocation3], 0  ;;  %s6034_s9 = smov 0   ;;  %s6702_s0 = inlined_call_operand.vmem [shape: f32[2,16,17], index: 0, kind: input, shape index: {}]   ;;  %s6703_s1 = inlined_call_operand.hbm [shape: f32[688,128], index: 1, kind: input, shape index: {}]   ;;  %s6704_s2 = inlined_call_operand.vmem [shape: f32[2,8,32], index: 2, kind: output, shape index: {}]  }
   0x1 LB: > { %s6040_s10 = sadd.s32 4294967295, %s5998_s9   ;;  %p4957_p0 = scmp.ge.s32.totalorder %s5998_s9, 1  ;;  %s5998_s9 = sphi %s6034_s9, %s13_s9  }
   0x2   : > { %p91_p1 = scmp.lt.s32.totalorder %s5998_s9, 3  ;;  %s6000_s11 = smov [#allocation2]  }
   0x3   : > { %s103_s12 = sshll.u32 %s6000_s11, 4  ;;  %p6705_p3 = scmp.eq.s32.totalorder %s6040_s10, 0  ;;  %s104_s12 = int_to_ptr.vmem [resolvable:$true] %s103_s12 }
   0x4   : > { %p6044_p2 = pnand %p4957_p0, %p91_p1  ;;  %s5960_s17 = scalar_lea.hbm %s6703_s1, 11008 }
   0x5   : > { %p5961_p6 = scmp.ne.s32.totalorder %s6703_s1, %s5960_s17  ;;  %p5967_p10 = scmp.lt.u32.totalorder %s5960_s17, %s6703_s1 }
   0x6   : > { %s6709_s13 = scalar_select %p6044_p2, 1, 0 }
   0x7   : > { %p5851_p4 = pneg %p6044_p2 }
   0x9   : > { %p6053_p5 = pnand %p6705_p3, %p5851_p4 }
   0xb   : > { %p5962_p7 = pneg %p6053_p5 }
   0xd   : > { %p5963_p8 = pnand %p5962_p7, %p5961_p6 }
   0xf   : > { %p5964_p9 = pneg %p5963_p8 }
  0x11   : > { %p5969_p11 = pnand %p5967_p10, %p5964_p9 }
  0x13   : > { %5972 = shalt.err (!%p5969_p11)
}
  0x14   : > { %s5973_s22 = scalar_lea.vmem %s104_s12, 11008  ;;  %p5981_p1 = scmp.lt.s32.totalorder %s104_s12, %s104_s12 }
  0x15   : > { %p5974_p12 = scmp.ne.s32.totalorder %s104_s12, %s5973_s22  ;;  %p5982_p4 = scmp.lt.s32.totalorder %s5973_s22, %s5973_s22 }
  0x17   : > { %p5976_p13 = pnand %p5974_p12, %p5962_p7  ;;  %p5983_p3 = por %p5982_p4, %p5981_p1 }
  0x19   : > { %p5977_p0 = pneg %p5976_p13 }
  0x1b   : > { %p5984_p2 = pnand %p5983_p3, %p5977_p0 }
  0x1d   : > { %5987 = shalt.err (!%p5984_p2)
}
  0x1e   : > { %s6001_s23 = smov 128   ;;  %s6002_s24 = smov 8  }
  0x1f   : > { %5854 = dma.hbm_to_vmem [thread:$0]  (!%p6053_p5), %s6703_s1, 11008, %s104_s12, [#allocation3], %s6001_s23, %s6001_s23, %s6002_s24  }
  0x20   : > { %p6711_p6 = scmp.ne.s32.totalorder %s6709_s13, 0 }
  0x21   : > { %p6712_p8 = scmp.eq.s32.totalorder (!%p6711_p6), %s6040_s10, 0 }
  0x22   : > { %127 = sbr.rel (%p6711_p6) target bundleno = 14117 (0x3725), region = 28 }
  0x29   : > { %5993 = dma.done.wait (%p6712_p8), [#allocation3], 11008   ;;  %p6713_p7 = pmov %p6712_p8 }
  0x2a   : > { %v157_v0 = vlaneseq  ;;  %v4967_v6 = vld [vmem:[#allocation2] ss:$0 sm:$0xff]  ;;  %v6003_v31 = vmov 683565275   ;;  %v6004_v33 = vmov 2475754826  }
  0x2b   : > { %5995 = vsyncadd (%p6713_p7), [#allocation3], 4294956288  ;;  %v6005_v35 = vmov 2131351028   ;;  %v6006_v37 = vmov 2102212464  }
  0x2c   : > { %v158_v1 = vshrl.u32 %v157_v0, 7  ;;  %v6007_v39 = vmov 920167782   ;;  %v6008_v46 = vmov 1326507024   ;;  %s6009_s27 = smov 17  }
  0x2d   : > { %s6010_s28 = smov 24   ;;  %p148_p2 = scmp.lt.s32.totalorder %s6040_s10, 1 }
  0x2e   : > { %v160_v2 = vcvt.s32.f32 %v158_v1  ;;  %v159_v3 = vadd.s32 8, %v158_v1  ;;  %s6014_s5 = smov 80   ;;  %s6015_s6 = smov 96  }
  0x2f   : > { %s6718_s10 = smov (!%p148_p2, %s6040_s10), 1  ;;  %s6016_s7 = smov 112  }
  0x30   : > { %v162_v4 = vmul.f32 0.13333334, %v160_v2  ;;  %v161_v5 = vcvt.s32.f32 %v159_v3  ;;  %s5078_s29 = sshll.u32 %s6718_s10, 4  ;;  %s6017_s8 = smov 48  }
  0x31   : > { %s152_s4 = scalar_lea.vmem %s6702_s0, %s5078_s29  ;;  %s6018_s11 = smov 64  }
  0x32   : > { %v6079_v7 = vadd.f32 -1.0, %v162_v4  ;;  %v163_v8 = vmul.f32 0.13333334, %v161_v5  ;;  %s4964_s12 = sshll.u32 %s6718_s10, 3 }
  0x33   : > { %s156_s15 = scalar_lea.vmem %s6704_s2, %s4964_s12 }
  0x34   : > { %v6082_v9 = vmul.f32 %v4967_v6, %v6079_v7  ;;  %v6084_v10 = vadd.f32 -1.0, %v163_v8 }
  0x36   : > { %v175_v11 = vand.u32 2147483647, %v6082_v9  ;;  %v178_v12 = vand.u32 2139095040, %v6082_v9  ;;  %v6089_v13 = vmul.f32 %v4967_v6, %v6084_v10  ;;  %vm177_vm14 = vcmp.lt.s32.totalorder %v6082_v9, 0 }
  0x38   : > { %v179_v14 = vshrl.u32 %v178_v12, 23  ;;  %v182_v15 = vand.u32 8388607, %v175_v11  ;;  %v279_v16 = vand.u32 2147483647, %v6089_v13  ;;  %v282_v17 = vand.u32 2139095040, %v6089_v13 }
  0x39   : > { %vm176_vm15 = vcmp.le.f32.partialorder %v175_v11, 0.7853982 }
  0x3a   : > { %v4968_v18 = vadd.s32 4294967169, %v179_v14  ;;  %v283_v19 = vshrl.u32 %v282_v17, 23  ;;  %v183_v21 = vor.u32 8388608, %v182_v15  ;;  %v6097_v23 = vand.u32 8388607, %v279_v16 }
  0x3c   : > { %v185_v20 = vadd.s32 1, %v4968_v18  ;;  %v4972_v22 = vadd.s32 4294967169, %v283_v19  ;;  %v6099_v28 = vshll.u32 %v183_v21, 8  ;;  %v287_v29 = vor.u32 8388608, %v6097_v23 }
  0x3e   : > { %vm186_vm0 = vcmp.gt.s32.totalorder %v185_v20, 0  ;;  %v289_v25 = vadd.s32 1, %v4972_v22 }
  0x3f   : > { %v187_v24 = vsel %vm186_vm0, %v185_v20, 0  ;;  %vm281_vm0 = vcmp.lt.s32.totalorder %v6089_v13, 0 }
  0x40   : > { %v188_v26 = vshrl.u32 %v187_v24, 5  ;;  %v189_v27 = vand.u32 31, %v187_v24  ;;  %vm290_vm1 = vcmp.gt.s32.totalorder %v289_v25, 0 }
  0x41   : > { %v291_v51 = vsel %vm290_vm1, %v289_v25, 0  ;;  %vm280_vm1 = vcmp.le.f32.partialorder %v279_v16, 0.7853982 }
  0x42   : > { %v190_v30 = vsub.s32 32, %v189_v27  ;;  %v192_v32 = vshll.u32 %v6003_v31, %v189_v27  ;;  %v195_v34 = vshll.u32 %v6004_v33, %v189_v27  ;;  %v198_v36 = vshll.u32 %v6005_v35, %v189_v27 }
  0x43   : > { %v201_v38 = vshll.u32 %v6006_v37, %v189_v27  ;;  %v204_v40 = vshll.u32 %v6007_v39, %v189_v27  ;;  %vm207_vm2 = vcmp.lt.s32.totalorder %v188_v26, 1  ;;  %vm208_vm3 = vcmp.lt.s32.totalorder %v188_v26, 2 }
  0x44   : > { %v191_v41 = vshrl.u32 %v6003_v31, %v190_v30  ;;  %v193_v42 = vshrl.u32 %v6004_v33, %v190_v30  ;;  %v196_v43 = vshrl.u32 %v6005_v35, %v190_v30  ;;  %v199_v44 = vshrl.u32 %v6006_v37, %v190_v30 }
  0x45   : > { %v202_v45 = vshrl.u32 %v6007_v39, %v190_v30  ;;  %v205_v47 = vshrl.u32 %v6008_v46, %v190_v30  ;;  %vm209_vm4 = vcmp.lt.s32.totalorder %v188_v26, 3  ;;  %vm210_vm5 = vcmp.lt.s32.totalorder %v188_v26, 4 }
  0x46   : > { %v194_v48 = vor.u32 %v193_v42, %v192_v32  ;;  %v197_v49 = vor.u32 %v196_v43, %v195_v34  ;;  %v200_v50 = vor.u32 %v199_v44, %v198_v36  ;;  %v292_v54 = vshrl.u32 %v291_v51, 5 }
  0x47   : > { %v203_v52 = vor.u32 %v202_v45, %v201_v38  ;;  %v206_v53 = vor.u32 %v205_v47, %v204_v40  ;;  %v293_v55 = vand.u32 31, %v291_v51 }
  0x48   : > { %v211_v56 = vsel %vm207_vm2, %v191_v41, %v194_v48  ;;  %v212_v57 = vsel %vm210_vm5, %v200_v50, 2102212464  ;;  %v215_v58 = vsel %vm207_vm2, %v194_v48, %v197_v49  ;;  %v219_v59 = vsel %vm207_vm2, %v197_v49, %v200_v50 }
  0x49   : > { %v213_v60 = vsel %vm209_vm4, %v197_v49, %v212_v57  ;;  %v216_v61 = vsel %vm210_vm5, %v203_v52, 920167782  ;;  %v220_v62 = vsel %vm210_vm5, %v206_v53, 1326507024  ;;  %v294_v63 = vsub.s32 32, %v293_v55 }
  0x4a   : > { %v214_v0 = vsel %vm208_vm3, %v211_v56, %v213_v60  ;;  %v217_v1 = vsel %vm209_vm4, %v200_v50, %v216_v61  ;;  %v221_v2 = vsel %vm209_vm4, %v203_v52, %v220_v62  ;;  %v296_v3 = vshll.u32 %v6003_v31, %v293_v55 }
  0x4b   : > { %v218_v4 = vsel %vm208_vm3, %v215_v58, %v217_v1  ;;  %v222_v5 = vsel %vm208_vm3, %v219_v59, %v221_v2  ;;  %v230_v6 = vmul.u32 %v6099_v28, %v214_v0  ;;  %v295_v8 = vshrl.u32 %v6003_v31, %v294_v63 }
  0x4c   : > { %v6114_v12 = vmul.u32.u64.low %v6099_v28, %v222_v5  ;;  %v6115_v14 = vmul.u32.u64.high %v6099_v28, %v222_v5, %v6114_v12  ;;  %v6118_v15 = vmul.u32.u64.low %v6099_v28, %v218_v4  ;;  %v6119_v17 = vmul.u32.u64.high %v6099_v28, %v218_v4, %v6118_v15 }
  0x4d   : > { %v297_v18 = vshrl.u32 %v6004_v33, %v294_v63  ;;  %v299_v19 = vshll.u32 %v6004_v33, %v293_v55  ;;  %v300_v20 = vshrl.u32 %v6005_v35, %v294_v63  ;;  %v302_v21 = vshll.u32 %v6005_v35, %v293_v55 }
  0x4e   : > { %v303_v22 = vshrl.u32 %v6006_v37, %v294_v63  ;;  %v305_v24 = vshll.u32 %v6006_v37, %v293_v55  ;;  %v306_v25 = vshrl.u32 %v6007_v39, %v294_v63  ;;  %v308_v26 = vshll.u32 %v6007_v39, %v293_v55 }
  0x4f   : > { %v298_v27 = vor.u32 %v297_v18, %v296_v3  ;;  %v301_v30 = vor.u32 %v300_v20, %v299_v19  ;;  %v309_v32 = vshrl.u32 %v6008_v46, %v294_v63  ;;  %vm311_vm6 = vcmp.lt.s32.totalorder %v292_v54, 1 }
  0x50   : > { %vm232_vm7 = vc.u32 %v6115_v14, %v6118_v15  ;;  %v233_v31 = vadd.s32 1, %v6119_v17  ;;  %v304_v34 = vor.u32 %v303_v22, %v302_v21  ;;  %v327_v28 = vshll.u32 %v287_v29, 8 }
  0x51   : > { %v307_v36 = vor.u32 %v306_v25, %v305_v24  ;;  %v310_v33 = vor.u32 %v309_v32, %v308_v26  ;;  %vm312_vm8 = vcmp.lt.s32.totalorder %v292_v54, 2  ;;  %vm313_vm9 = vcmp.lt.s32.totalorder %v292_v54, 3 }
  0x52   : > { %v234_v35 = vsel %vm232_vm7, %v233_v31, %v6119_v17  ;;  %vm314_vm10 = vcmp.lt.s32.totalorder %v292_v54, 4  ;;  %v315_v37 = vsel %vm311_vm6, %v295_v8, %v298_v27  ;;  %v319_v38 = vsel %vm311_vm6, %v298_v27, %v301_v30 }
  0x53   : > { %v235_v39 = vadd.s32 %v234_v35, %v230_v6  ;;  %v316_v40 = vsel %vm314_vm10, %v304_v34, 2102212464  ;;  %v320_v41 = vsel %vm314_vm10, %v307_v36, 920167782  ;;  %v323_v42 = vsel %vm311_vm6, %v301_v30, %v304_v34 }
  0x54   : > { %v317_v43 = vsel %vm313_vm9, %v301_v30, %v316_v40  ;;  %v321_v44 = vsel %vm313_vm9, %v304_v34, %v320_v41  ;;  %v324_v23 = vsel %vm314_vm10, %v310_v33, 1326507024  ;;  %v231_v3 = vadd.s32 %v6118_v15, %v6115_v14 }
  0x55   : > { %v236_v29 = vadd.s32 536870912, %v235_v39  ;;  %v322_v45 = vsel %vm312_vm8, %v319_v38, %v321_v44  ;;  %v325_v46 = vsel %vm313_vm9, %v307_v36, %v324_v23  ;;  %v318_v47 = vsel %vm312_vm8, %v315_v37, %v317_v43 }
  0x56   : > { %v326_v48 = vsel %vm312_vm8, %v323_v42, %v325_v46  ;;  %v6132_v49 = vmul.u32.u64.low %v327_v28, %v322_v45  ;;  %v6133_v50 = vmul.u32.u64.high %v327_v28, %v322_v45, %v6132_v49  ;;  %v334_v56 = vmul.u32 %v327_v28, %v318_v47 }
  0x57   : > { %v237_v51 = vshrl.u32 %v236_v29, 30  ;;  %v6135_v52 = vmul.u32.u64.low %v327_v28, %v326_v48  ;;  %v6136_v53 = vmul.u32.u64.high %v327_v28, %v326_v48, %v6135_v52  ;;  %vm267_vm8 = vweird.f32 %v6082_v9 }
  0x58   : > { %v337_v57 = vadd.s32 1, %v6133_v50 }
  0x59   : > { %v238_v55 = vshll.u32 %v237_v51, 30  ;;  %vm336_vm11 = vc.u32 %v6136_v53, %v6132_v49  ;;  %v261_v32 = vsub.s32 4, %v237_v51  ;;  %v335_v14 = vadd.s32 %v6132_v49, %v6136_v53 }
  0x5a   : > { %v338_v59 = vsel %vm336_vm11, %v337_v57, %v6133_v50 }
  0x5b   : > { %v239_v58 = vsub.s32 %v235_v39, %v238_v55  ;;  %v339_v61 = vadd.s32 %v338_v59, %v334_v56  ;;  %v262_v35 = vsel %vm177_vm14, %v261_v32, %v237_v51  ;;  %v6164_v32 = vld [vmem:[#allocation2 + $0x18] sm:$0xff] }
  0x5c   : > { %v264_v41 = vsel %vm176_vm15, 0, %v262_v35 }
  0x5d   : > { %v241_v60 = vsub.s32 0, %v239_v58  ;;  %v340_v62 = vadd.s32 536870912, %v339_v61  ;;  %v268_v29 = vadd.s32 3, %v264_v41  ;;  %v476_v11 = vand.u32 3, %v264_v41 }
  0x5f   : > { %v4969_v54 = vmin.u32 %v241_v60, %v239_v58  ;;  %v341_v0 = vshrl.u32 %v340_v62, 30  ;;  %v269_v48 = vand.u32 3, %v268_v29  ;;  %vm481_vm3 = vcmp.eq.s32.totalorder %v476_v11, 2 }
  0x60   : > { %vm478_vm5 = vcmp.eq.s32.totalorder %v476_v11, 0  ;;  %vm477_vm7 = vcmp.lt.s32.totalorder %v476_v11, 2  ;;  %v656_v11 = vld [vmem:[#allocation2 + $0x48] sm:$0xff] }
  0x61   : > { %v243_v63 = vclz %v4969_v54  ;;  %v342_v2 = vshll.u32 %v341_v0, 30  ;;  %v365_v46 = vsub.s32 4, %v341_v0  ;;  %vm274_vm2 = vcmp.eq.s32.totalorder %v269_v48, 2 }
  0x62   : > { %vm271_vm4 = vcmp.eq.s32.totalorder %v269_v48, 0  ;;  %vm270_vm6 = vcmp.lt.s32.totalorder %v269_v48, 2 }
  0x63   : > { %v4970_v1 = vadd.s32 4294967294, %v243_v63  ;;  %v343_v5 = vsub.s32 %v339_v61, %v342_v2  ;;  %v366_v50 = vsel %vm281_vm0, %v365_v46, %v341_v0 }
  0x64   : > { %v368_v55 = vsel %vm280_vm1, 0, %v366_v50  ;;  %v746_v50 = vld [vmem:[#allocation2 + $0x70] sm:$0xff] }
  0x65   : > { %vm4971_vm12 = vcmp.lt.s32.totalorder %v4970_v1, 0  ;;  %v345_v17 = vsub.s32 0, %v343_v5  ;;  %v372_v60 = vadd.s32 3, %v368_v55 }
  0x66   : > { %v246_v4 = vsel %vm4971_vm12, 0, %v4970_v1 }
  0x67   : > { %v247_v6 = vsub.s32 32, %v246_v4  ;;  %v248_v8 = vshll.u32 %v239_v58, %v246_v4  ;;  %v251_v12 = vsub.s32 4294967266, %v246_v4  ;;  %v4973_v20 = vmin.u32 %v345_v17, %v343_v5 }
  0x68   : > { %v373_v2 = vand.u32 3, %v372_v60  ;;  %v6707_v60 = vmov 0.0|0.0  }
  0x69   : > { %v249_v18 = vshrl.u32 %v231_v3, %v247_v6  ;;  %v252_v19 = vadd.s32 127, %v251_v12  ;;  %v347_v24 = vclz %v4973_v20  ;;  %v579_v3 = vand.u32 3, %v368_v55  ;;  %v659_v55 = vld [vmem:[#allocation2 + $0x60] sm:$0xff] }
  0x6a   : > { %vm378_vm9 = vcmp.eq.s32.totalorder %v373_v2, 2  ;;  %vm375_vm11 = vcmp.eq.s32.totalorder %v373_v2, 0 }
  0x6b   : > { %v250_v21 = vor.u32 %v249_v18, %v248_v8  ;;  %v253_v22 = vshll.u32 %v252_v19, 23  ;;  %v4974_v27 = vadd.s32 4294967294, %v347_v24  ;;  %vm584_vm10 = vcmp.eq.s32.totalorder %v579_v3, 2 }
  0x6c   : > { %vm581_vm12 = vcmp.eq.s32.totalorder %v579_v3, 0 }
  0x6d   : > { %v254_v25 = vor.u32 4788187, %v253_v22  ;;  %v257_v26 = vcvt.s32.f32 %v250_v21  ;;  %vm4975_vm13 = vcmp.lt.s32.totalorder %v4974_v27, 0 }
  0x6e   : > { %v350_v31 = vsel %vm4975_vm13, 0, %v4974_v27  ;;  %vm374_vm13 = vcmp.lt.s32.totalorder %v373_v2, 2 }
  0x6f   : > { %v255_v30 = vand.u32 2147483647, %v254_v25  ;;  %v351_v34 = vsub.s32 32, %v350_v31  ;;  %v352_v28 = vshll.u32 %v343_v5, %v350_v31  ;;  %v355_v36 = vsub.s32 4294967266, %v350_v31  ;;  %v174_v31 = vld [vmem:[%s152_s4 + $0x8] sm:$0xff] }
  0x71   : > { %v258_v15 = vmul.f32 %v257_v26, %v255_v30  ;;  %v353_v37 = vshrl.u32 %v335_v14, %v351_v34  ;;  %v356_v38 = vadd.s32 127, %v355_v36 }
  0x73   : > { %v259_v33 = vxor.u32 2147483648, %v258_v15  ;;  %v354_v42 = vor.u32 %v353_v37, %v352_v28  ;;  %v357_v43 = vshll.u32 %v356_v38, 23 }
  0x75   : > { %v260_v39 = vsel %vm177_vm14, %v259_v33, %v258_v15  ;;  %v358_v44 = vor.u32 4788187, %v357_v43  ;;  %v361_v23 = vcvt.s32.f32 %v354_v42  ;;  %vm580_vm14 = vcmp.lt.s32.totalorder %v579_v3, 2 }
  0x76   : > { %v263_v40 = vsel %vm176_vm15, %v6082_v9, %v260_v39  ;;  %vm371_vm15 = vweird.f32 %v6089_v13 }
  0x77   : > { %5884 = vcosq.f32 %v263_v40  ;;  %v359_v45 = vand.u32 2147483647, %v358_v44 }
  0x78   : > { %5886 = vsinq.f32 %v263_v40 }
  0x79   : > { %v362_v47 = vmul.f32 %v361_v23, %v359_v45 }
  0x7b   : > { %v363_v49 = vxor.u32 2147483648, %v362_v47 }
  0x7d   : > { %v364_v51 = vsel %vm281_vm0, %v363_v49, %v362_v47  ;;  %vm605_vm0 = vcmask 138240   ;;  %v657_v49 = vld [vmem:[#allocation2 + $0x50] sm:$0xff] }
  0x7e   : > { %v367_v53 = vsel %vm280_vm1, %v6089_v13, %v364_v51  ;;  %v173_v13 = vld [vmem:[%s152_s4] sm:$0xff]  ;;  %vm608_vm1 = vcmask 195584   ;;  %v5665_v51 = vpack.c.bf16 %v657_v49, %v656_v11 }
  0x7f   : > { %5888 = vcosq.f32 %v367_v53 }
  0x80   : > { %5890 = vsinq.f32 %v367_v53  ;;  %v658_v53 = vld [vmem:[#allocation2 + $0x58] sm:$0xff]  ;;  %5666 = vmatprep.subr.bf16.mxu0 %v5665_v51 }
  0x81   : > { %v5885_v52 = vpop.eup %5884  ;;  %5668 = vmatpush3.bf16.msra.mxu0 %v5665_v51 }
  0x82   : > { %v5887_v56 = vpop.eup %5886  ;;  %v275_v57 = vxor.u32 2147483648, %v5885_v52 }
  0x83   : > { %v272_v58 = vxor.u32 2147483648, %v5887_v56 }
  0x84   : > { %v276_v16 = vsel %vm274_vm2, %v275_v57, %v5887_v56  ;;  %v483_v59 = vsel %vm481_vm3, %v275_v57, %v5887_v56  ;;  %vm611_vm2 = vcmask 252928   ;;  %vm616_vm3 = vcmask 261120  }
  0x85   : > { %v273_v61 = vsel %vm271_vm4, %v5885_v52, %v272_v58  ;;  %v480_v54 = vsel %vm478_vm5, %v5885_v52, %v272_v58  ;;  %v833_v15 = vsel %vm616_vm3, %v6164_v32, 0.0  ;;  %v747_v52 = vld [vmem:[#allocation2 + $0x78] sm:$0xff]  ;;  %v5669_v57 = vpack.c.bf16 %v659_v55, %v658_v53  ;;  %v748_v58 = vld [vmem:[#allocation2 + $0x80] sm:$0xff]  ;;  %vm6206_vm5 = vmpackc.low %vm616_vm3, %vm616_vm3 }
  0x86   : > { %v277_v62 = vsel %vm270_vm6, %v273_v61, %v276_v16  ;;  %v484_v63 = vsel %vm477_vm7, %v480_v54, %v483_v59  ;;  %v5673_v56 = vpack.c.bf16 %v747_v52, %v746_v50  ;;  %v749_v16 = vld [vmem:[#allocation2 + $0x88] sm:$0xff]  ;;  %vm6012_vm4 = vmmov 0  }
  0x87   : > { %v278_v0 = vsel %vm267_vm8, nan, %v277_v62  ;;  %v485_v1 = vsel %vm267_vm8, nan, %v484_v63  ;;  %5670 = vmatprep.subr.bf16.mxu0 %v5669_v57  ;;  %v5677_v59 = vpack.c.bf16 %v749_v16, %v748_v58  ;;  %vm1017_vm6 = vcmask 130048   ;;  %v1104_v58 = vld [vmem:[#allocation2 + $0xa8] sm:$0xff] }
  0x88   : > { %591 = vrot.lane.b32.xlu0 %v278_v0, %s6009_s27  ;;  %599 = vrot.lane.b32.xlu1 %v485_v1, %s6010_s28  ;;  %vm1639_vm7 = vcmask 64512  }
  0x89   : > { %v5889_v4 = vpop.eup %5888  ;;  %5674 = vmatprep.subr.bf16.mxu1 %v5673_v56  ;;  %5672 = vmatpush3.bf16.msra.mxu0 %v5669_v57  ;;  %v1103_v57 = vld [vmem:[#allocation2 + $0xa0] sm:$0xff] }
  0x8a   : > { %v5891_v5 = vpop.eup %5890  ;;  %v379_v9 = vxor.u32 2147483648, %v5889_v4  ;;  %5676 = vmatpush3.bf16.msra.mxu1 %v5673_v56  ;;  %5681 = vmatprep.subr.bf16.mxu0 %v6707_v60  ;;  %v1102_v56 = vld [vmem:[#allocation2 + $0x98] sm:$0xff] }
  0x8b   : > { %v376_v6 = vxor.u32 2147483648, %v5891_v5  ;;  %5678 = vmatprep.subr.bf16.mxu1 %v5677_v59  ;;  %v6228_v16 = vpack.c.bf16 %v1103_v57, %v1102_v56 }
  0x8c   : > { %v380_v8 = vsel %vm378_vm9, %v379_v9, %v5891_v5  ;;  %v586_v12 = vsel %vm584_vm10, %v379_v9, %v5891_v5  ;;  %v4984_v9 = vld [vmem:[#allocation2 + $0x8] ss:$0 sm:$0xff] }
  0x8d   : > { %v377_v17 = vsel %vm375_vm11, %v5889_v4, %v376_v6  ;;  %v583_v18 = vsel %vm581_vm12, %v5889_v4, %v376_v6 }
  0x8e   : > { %v381_v19 = vsel %vm374_vm13, %v377_v17, %v380_v8  ;;  %v587_v20 = vsel %vm580_vm14, %v583_v18, %v586_v12  ;;  %5680 = vmatpush3.bf16.msra.mxu1 %v5677_v59  ;;  %v4985_v8 = vld [vmem:[#allocation2 + $0x10] ss:$0 sm:$0xff] }
  0x8f   : > { %v382_v21 = vsel %vm371_vm15, nan, %v381_v19  ;;  %v588_v22 = vsel %vm371_vm15, nan, %v587_v20  ;;  %5687 = vmatprep.subr.bf16.mxu1 %v6707_v60  ;;  %v856_v20 = vld [vmem:[#allocation2 + $0x20] sm:$0xff]  ;;  %v1105_v59 = vld [vmem:[#allocation2 + $0xb0] sm:$0xff] }
  0x90   : > { %593 = vrot.lane.b32.xlu0 %v382_v21, %s6009_s27  ;;  %601 = vrot.lane.b32.xlu1 %v588_v22, %s6010_s28  ;;  %v857_v21 = vld [vmem:[#allocation2 + $0x28] sm:$0xff] }
  0xfa   : > { %v592_v24 = vpop.permute.xlu0 %591  ;;  %v600_v25 = vpop.permute.xlu1 %599 }
  0xfb   : > { %v606_v26 = vsel %vm605_vm0, %v173_v13, %v592_v24  ;;  %v6181_v24 = vpack.c.bf16 %v857_v21, %v856_v20  ;;  %v1211_v20 = vld [vmem:[#allocation2 + $0xc0] sm:$0xff]  ;;  %v1212_v21 = vld [vmem:[#allocation2 + $0xc8] sm:$0xff] }
  0xfc   : > { %v609_v27 = vsel %vm608_vm1, %v606_v26, %v600_v25 }
  0xfd   : > { %v612_v30 = vsel %vm611_vm2, %v609_v27, %v6079_v7  ;;  %v858_v27 = vld [vmem:[#allocation2 + $0x30] sm:$0xff] }
  0xfe   : > { %v617_v14 = vsel %vm616_vm3, %v612_v30, 0.0 }
  0xff   : > { %618 = vadd.xlane.f32.xlu0 %v617_v14  ;;  %v6183_v14 = vld [vmem:[#allocation2 + $0x110] ss:$0 sm:$0xff] }
 0x102   : > { %v594_v34 = vpop.permute.xlu0 %593  ;;  %v602_v28 = vpop.permute.xlu1 %601 }
 0x103   : > { %834 = vadd.xlane.f32.xlu0 %v833_v15  ;;  %v607_v36 = vsel %vm605_vm0, %v174_v31, %v594_v34  ;;  %v6013_v31 = vmov 0.0  }
 0x104   : > { %v610_v33 = vsel %vm608_vm1, %v607_v36, %v602_v28  ;;  %v6196_v28 = vld [vmem:[#allocation2 + $0x118] ss:$0 sm:$0xff] }
 0x105   : > { %v613_v35 = vsel %vm611_vm2, %v610_v33, %v6084_v10  ;;  %v4986_v33 = vld [vmem:[#allocation2 + $0x68] ss:$0 sm:$0xff] }
 0x106   : > { %v620_v7 = vsel %vm616_vm3, %v613_v35, 0.0 }
 0x107   : > { %621 = vadd.xlane.f32.xlu1 %v620_v7 }
 0x18c   : > { %v619_v37 = vpop.xlane.xlu0 %618 }
 0x18d   : > { %v624_v38 = vmul.f32 0.03125, %v619_v37 }
 0x18f   : > { %v626_v39 = vsub.f32 %v612_v30, %v624_v38  ;;  %v859_v30 = vld [vmem:[#allocation2 + $0x38] sm:$0xff] }
 0x190   : > { %v835_v40 = vpop.xlane.xlu0 %834  ;;  %v6188_v15 = vpack.c.bf16 %v859_v30, %v858_v27  ;;  %v1217_v27 = vld [vmem:[#allocation2 + $0xf0] sm:$0xff] }
 0x191   : > { %v836_v41 = vmul.f32 0.03125, %v835_v40  ;;  %v628_v42 = vmul.f32 %v626_v39, %v626_v39 }
 0x193   : > { %v837_v43 = vsub.f32 %v6164_v32, %v836_v41  ;;  %v630_v44 = vsel %vm616_vm3, %v628_v42, 0.0 }
 0x194   : > { %631 = vadd.xlane.f32.xlu0 %v630_v44  ;;  %v622_v29 = vpop.xlane.xlu1 %621 }
 0x195   : > { %v838_v23 = vmul.f32 %v837_v43, %v837_v43  ;;  %v625_v46 = vmul.f32 0.03125, %v622_v29 }
 0x197   : > { %v839_v45 = vsel %vm616_vm3, %v838_v23, 0.0  ;;  %v627_v10 = vsub.f32 %v613_v35, %v625_v46  ;;  %v4989_v35 = vld [vmem:[#allocation2 + $0x90] ss:$0 sm:$0xff] }
 0x198   : > { %840 = vadd.xlane.f32.xlu0 %v839_v45  ;;  %v6220_v45 = vld [vmem:[#allocation2 + $0x40] ss:$0 sm:$0xff] }
 0x199   : > { %v629_v47 = vmul.f32 %v627_v10, %v627_v10 }
 0x19b   : > { %v633_v48 = vsel %vm616_vm3, %v629_v47, 0.0 }
 0x19c   : > { %634 = vadd.xlane.f32.xlu1 %v633_v48 }
 0x221   : > { %v632_v61 = vpop.xlane.xlu0 %631 }
 0x222   : > { %v636_v54 = vmul.f32 0.03125, %v632_v61  ;;  %v6231_v61 = vpack.c.bf16 %v1105_v59, %v1104_v58 }
 0x224   : > { %v638_v62 = vadd.f32 1e-05, %v636_v54 }
 0x225   : > { %v841_v63 = vpop.xlane.xlu0 %840 }
 0x226   : > { %5892 = vrsqrt.f32 %v638_v62  ;;  %v842_v0 = vmul.f32 0.03125, %v841_v63 }
 0x228   : > { %v843_v4 = vadd.f32 1e-05, %v842_v0 }
 0x229   : > { %v635_v1 = vpop.xlane.xlu1 %634 }
 0x22a   : > { %v637_v2 = vmul.f32 0.03125, %v635_v1 }
 0x22c   : > { %v639_v3 = vadd.f32 1e-05, %v637_v2 }
 0x22e   : > { %5894 = vrsqrt.f32 %v639_v3  ;;  %v6242_v3 = vld [vmem:[#allocation2 + $0xb8] ss:$0 sm:$0xff] }
 0x22f   : > { %5896 = vrsqrt.f32 %v843_v4 }
 0x230   : > { %v5893_v5 = vpop.eup %5892 }
 0x231   : > { %v642_v6 = vmul.f32 %v5893_v5, %v626_v39 }
 0x233   : > { %v648_v12 = vmul.f32 %v4984_v9, %v642_v6 }
 0x235   : > { %v654_v17 = vadd.f32 %v4985_v8, %v648_v12 }
 0x237   : > { %5267 = vmatprep.mubr.msk.f32.mxu0 %vm616_vm3, %v654_v17  ;;  %5278 = vmatprep.mubr.msk.f32.mxu1 %vm616_vm3, %v654_v17 }
 0x238   : > { %v5895_v18 = vpop.eup %5894 }
 0x239   : > { %v643_v19 = vmul.f32 %v5895_v18, %v627_v10  ;;  %v5897_v22 = vpop.eup %5896 }
 0x23a   : > { %v845_v25 = vmul.f32 %v5897_v22, %v837_v43  ;;  %v6248_v22 = vpack.c.bf16 %v1212_v21, %v1211_v20  ;;  %v6305_v21 = vld [vmem:[#allocation2 + $0x150] ss:$0 sm:$0xff] }
 0x23b   : > { %v649_v13 = vmul.f32 %v4984_v9, %v643_v19 }
 0x23c   : > { %v850_v34 = vmul.f32 %v6183_v14, %v845_v25 }
 0x23d   : > { %v655_v26 = vadd.f32 %v4985_v8, %v649_v13  ;;  %v1214_v13 = vld [vmem:[#allocation2 + $0xd8] sm:$0xff] }
 0x23e   : > { %v855_v36 = vadd.f32 %v6196_v28, %v850_v34 }
 0x23f   : > { %5268 = vmatmul.mubr.msk.f32.vlgmr.msra.gmra.mrb[0].mxu0 %vm616_vm3, %v655_v26  ;;  %5279 = vmatmul.mubr.msk.f32.vlgmr.msra.gmra.mrb[0].mxu1 %vm616_vm3, %v655_v26  ;;  %v1216_v26 = vld [vmem:[#allocation2 + $0xe8] sm:$0xff] }
 0x240   : > { %5683 = vmatpush3.bf16.msra.mxu0 %v6181_v24  ;;  %5289 = vmatprep.mubr.msk.f32.mxu0 %vm6012_vm4, %v6013_v31  ;;  %v6256_v30 = vpack.c.bf16 %v1217_v27, %v1216_v26 }
 0x241   : > { %5684 = vmatprep.subr.bf16.mxu0 %v6707_v60  ;;  %5296 = vmatprep.mubr.msk.f32.mxu1 %vm6012_vm4, %v6013_v31 }
 0x244   : > { %5686 = vmatpush3.bf16.msra.mxu0 %v6188_v15 }
 0x245   : > { %5691 = vmatprep.subr.bf16.mxu0 %v6707_v60 }
 0x247   : > { %5290 = vmatmul.mubr.msk.f32.vlgmr.msra.gmra.mrb[2].mxu0 %vm616_vm3, %v855_v36 }
 0x248   : > { %5303 = vmatprep.mubr.msk.f32.mxu0 %vm6012_vm4, %v6013_v31 }
 0x312   : > { %v5269_v7 = vpop.f32.mrb[0].mxu0  ;;  %v5280_v37 = vpop.f32.mrb[0].mxu1 }
 0x313   : > { %v743_v38 = vadd.f32 %v5269_v7, %v4986_v33  ;;  %v827_v39 = vadd.f32 %v5280_v37, %v4989_v35  ;;  %v737_v40 = vpop.f32.mrb[1].mxu0  ;;  %v821_v41 = vpop.f32.mrb[1].mxu1  ;;  %v6260_v7 = vld [vmem:[#allocation2 + $0x120] ss:$0 sm:$0xff] }
 0x314   : > { %v738_v42 = vadd.f32 %v4986_v33, %v737_v40  ;;  %v822_v43 = vadd.f32 %v4989_v35, %v821_v41  ;;  %v1218_v41 = vld [vmem:[#allocation2 + $0xf8] sm:$0xff] }
 0x316   : > { %v6210_v23 = vpack.c.bf16 %v743_v38, %v738_v42  ;;  %v6212_v29 = vpack.c.bf16 %v827_v39, %v822_v43  ;;  %v6262_v38 = vld [vmem:[#allocation2 + $0x128] ss:$0 sm:$0xff]  ;;  %v1219_v42 = vld [vmem:[#allocation2 + $0x100] sm:$0xff] }
 0x317   : > { %v6269_v43 = vpack.c.bf16 %v1219_v42, %v1218_v41 }
 0x318   : > { %5690 = vmatpush3.bf16.xpose.msk.msra.mxu1 %vm6206_vm5, %v6210_v23  ;;  %5693 = vmatpush3.bf16.msra.mxu0 %v6212_v29 }
 0x319   : > { %5694 = vmatprep.subr.bf16.mxu1 %v6707_v60  ;;  %5700 = vmatprep.subr.bf16.mxu0 %v6707_v60 }
 0x31a   : > { %v934_v46 = vpop.f32.mrb[2].mxu0 }
 0x31b   : > { %v5291_v10 = vpop.f32.mrb[3].mxu0  ;;  %v935_v47 = vadd.f32 %v6220_v45, %v934_v46  ;;  %v6273_v46 = vld [vmem:[#allocation2 + $0xe0] ss:$0 sm:$0xff] }
 0x31f   : > { %5297 = vmatmul.mubr.msk.f32.vlgmr.msra.gmra.mrb[2].mxu1 %vm616_vm3, %v935_v47 }
 0x320   : > { %5314 = vmatprep.mubr.msk.f32.mxu1 %vm6012_vm4, %v6013_v31  ;;  %5696 = vmatpush3.bf16.msra.mxu1 %v6228_v16 }
 0x321   : > { %5697 = vmatprep.subr.bf16.mxu1 %v6707_v60 }
 0x324   : > { %5699 = vmatpush3.bf16.msra.mxu1 %v6231_v61 }
 0x325   : > { %5706 = vmatprep.subr.bf16.mxu1 %v6707_v60 }
 0x3f2   : > { %v1013_v48 = vpop.f32.mrb[2].mxu1 }
 0x3f3   : > { %v5298_v11 = vpop.f32.mrb[3].mxu1  ;;  %v1018_v49 = vsel %vm1017_vm6, %v1013_v48, -inf }
 0x3f4   : > { %1019 = vmax.xlane.f32.xlu1 %v1018_v49  ;;  %v6279_v49 = vld [vmem:[#allocation2 + $0x108] ss:$0 sm:$0xff] }
 0x481   : > { %v1020_v50 = vpop.xlane.xlu1 %1019 }
 0x482   : > { %v1021_v51 = vsub.f32 %v1013_v48, %v1020_v50 }
 0x484   : > { %v1022_v52 = vmul.f32 1.442695, %v1021_v51 }
 0x486   : > { %5898 = vpow2.f32 %v1022_v52 }
 0x490   : > { %v5899_v53 = vpop.eup %5898 }
 0x491   : > { %v1024_v55 = vsel %vm1017_vm6, %v5899_v53, 0.0 }
 0x492   : > { %1025 = vadd.xlane.f32.xlu0 %v1024_v55 }
 0x51f   : > { %v1026_v54 = vpop.xlane.xlu0 %1025 }
 0x520   : > { %5900 = vrcp.f32 %v1026_v54 }
 0x52a   : > { %v5901_v62 = vpop.eup %5900 }
 0x52b   : > { %v1028_v63 = vmul.f32 %v5901_v62, %v5899_v53  ;;  %v1402_v62 = vld [vmem:[#allocation2 + $0x130] sm:$0xff] }
 0x52d   : > { %5304 = vmatmul.mubr.msk.f32.vlgmr.msra.gmra.mrb[4].mxu0 %vm1017_vm6, %v1028_v63  ;;  %v1403_v63 = vld [vmem:[#allocation2 + $0x138] sm:$0xff] }
 0x52e   : > { %5325 = vmatprep.mubr.msk.f32.mxu0 %vm6012_vm4, %v6013_v31  ;;  %5702 = vmatpush3.bf16.msra.mxu0 %v6248_v22 }
 0x52f   : > { %5703 = vmatprep.subr.bf16.mxu0 %v6707_v60 }
 0x600   : > { %v1098_v0 = vpop.f32.mrb[4].mxu0 }
 0x601   : > { %v5305_v1 = vpop.f32.mrb[5].mxu0  ;;  %5315 = vmatmul.mubr.msk.f32.vlgmr.msra.gmra.mrb[4].mxu1 %vm616_vm3, %v1098_v0  ;;  %v6288_v0 = vpack.c.bf16 %v1403_v63, %v1402_v62 }
 0x602   : > { %5336 = vmatprep.mubr.msk.f32.mxu1 %vm6012_vm4, %v6013_v31  ;;  %5708 = vmatpush3.bf16.msra.mxu1 %v6256_v30  ;;  %v1404_v1 = vld [vmem:[#allocation2 + $0x140] sm:$0xff] }
 0x603   : > { %5709 = vmatprep.subr.bf16.mxu1 %v6707_v60 }
 0x606   : > { %5711 = vmatpush3.bf16.msra.mxu1 %v6269_v43 }
 0x607   : > { %5350 = vmatprep.subr.mxu1 %v6013_v31 }
 0x6d4   : > { %v1175_v2 = vpop.f32.mrb[4].mxu1 }
 0x6d5   : > { %v1179_v4 = vadd.f32 %v1175_v2, %v6164_v32  ;;  %v5316_v5 = vpop.f32.mrb[5].mxu1  ;;  %v1213_v32 = vld [vmem:[#allocation2 + $0xd0] sm:$0xff]  ;;  %v1405_v2 = vld [vmem:[#allocation2 + $0x148] sm:$0xff] }
 0x6d6   : > { %v6252_v25 = vpack.c.bf16 %v1214_v13, %v1213_v32 }
 0x6d7   : > { %v1185_v9 = vadd.f32 %v6242_v3, %v1179_v4  ;;  %v6292_v4 = vpack.c.bf16 %v1405_v2, %v1404_v1 }
 0x6d8   : > { %5705 = vmatpush3.bf16.msra.mxu0 %v6252_v25 }
 0x6d9   : > { %v1188_v6 = vsel %vm616_vm3, %v1185_v9, 0.0  ;;  %5712 = vmatprep.subr.bf16.mxu0 %v6707_v60 }
 0x6da   : > { %1189 = vadd.xlane.f32.xlu1 %v1188_v6 }
 0x767   : > { %v1190_v8 = vpop.xlane.xlu1 %1189 }
 0x768   : > { %v1191_v12 = vmul.f32 0.03125, %v1190_v8 }
 0x76a   : > { %v1192_v17 = vsub.f32 %v1185_v9, %v1191_v12  ;;  %v6296_v12 = vld [vmem:[#allocation2 + $0x1d0] ss:$0 sm:$0xff] }
 0x76c   : > { %v1193_v18 = vmul.f32 %v1192_v17, %v1192_v17 }
 0x76e   : > { %v1194_v19 = vsel %vm616_vm3, %v1193_v18, 0.0  ;;  %v6298_v18 = vld [vmem:[#allocation2 + $0x1d8] ss:$0 sm:$0xff] }
 0x76f   : > { %1195 = vadd.xlane.f32.xlu0 %v1194_v19 }
 0x7fc   : > { %v1196_v34 = vpop.xlane.xlu0 %1195 }
 0x7fd   : > { %v1197_v36 = vmul.f32 0.03125, %v1196_v34 }
 0x7ff   : > { %v1198_v33 = vadd.f32 1e-05, %v1197_v36 }
 0x801   : > { %5902 = vrsqrt.f32 %v1198_v33 }
 0x80b   : > { %v5903_v35 = vpop.eup %5902 }
 0x80c   : > { %v1200_v37 = vmul.f32 %v5903_v35, %v1192_v17 }
 0x80e   : > { %v1205_v39 = vmul.f32 %v6260_v7, %v1200_v37 }
 0x810   : > { %v1210_v40 = vadd.f32 %v6262_v38, %v1205_v39 }
 0x812   : > { %5326 = vmatmul.mubr.msk.f32.vlgmr.msra.gmra.mrb[6].mxu0 %vm616_vm3, %v1210_v40 }
 0x813   : > { %5347 = vmatprep.mubr.msk.f32.mxu0 %vm6012_vm4, %v6013_v31  ;;  %5714 = vmatpush3.bf16.msra.mxu0 %v6288_v0 }
 0x814   : > { %5715 = vmatprep.subr.bf16.mxu0 %v6707_v60 }
 0x817   : > { %5717 = vmatpush3.bf16.msra.mxu0 %v6292_v4 }
 0x818   : > { %5355 = vmatprep.subr.mxu0 %v6013_v31 }
 0x8e5   : > { %v1294_v10 = vpop.f32.mrb[6].mxu0 }
 0x8e6   : > { %v1295_v47 = vadd.f32 %v6273_v46, %v1294_v10  ;;  %v5327_v48 = vpop.f32.mrb[7].mxu0 }
 0x8e8   : > { %v1298_v11 = vmax.f32 %v1295_v47, 0.0 }
 0x8ea   : > { %5337 = vmatmul.mubr.msk.f32.vlgmr.msra.gmra.mrb[6].mxu1 %vm616_vm3, %v1298_v11 }
 0x8eb   : > { %5352 = vmatprep.mubr.msk.f32.mxu1 %vm6012_vm4, %v6013_v31 }
 0x9bd   : > { %v1372_v50 = vpop.f32.mrb[6].mxu1 }
 0x9be   : > { %v1373_v51 = vadd.f32 %v6279_v49, %v1372_v50  ;;  %v5338_v52 = vpop.f32.mrb[7].mxu1 }
 0x9c0   : > { %v6282_v53 = vadd.f32 %v1373_v51, %v1185_v9 }
 0x9c2   : > { %v1379_v55 = vsel %vm616_vm3, %v6282_v53, 0.0 }
 0x9c3   : > { %1380 = vadd.xlane.f32.xlu1 %v1379_v55 }
 0xa50   : > { %v1381_v56 = vpop.xlane.xlu1 %1380 }
 0xa51   : > { %v1382_v57 = vmul.f32 0.03125, %v1381_v56 }
 0xa53   : > { %v1383_v58 = vsub.f32 %v6282_v53, %v1382_v57  ;;  %v1662_v57 = vld [vmem:[#allocation2 + $0x158] sm:$0xff] }
 0xa55   : > { %v1384_v59 = vmul.f32 %v1383_v58, %v1383_v58 }
 0xa57   : > { %v1385_v54 = vsel %vm616_vm3, %v1384_v59, 0.0 }
 0xa58   : > { %1386 = vadd.xlane.f32.xlu0 %v1385_v54 }
 0xae5   : > { %v1387_v5 = vpop.xlane.xlu0 %1386 }
 0xae6   : > { %v1388_v9 = vmul.f32 0.03125, %v1387_v5 }
 0xae8   : > { %v1389_v6 = vadd.f32 1e-05, %v1388_v9 }
 0xaea   : > { %5904 = vrsqrt.f32 %v1389_v6 }
 0xaf4   : > { %v5905_v8 = vpop.eup %5904 }
 0xaf5   : > { %v1391_v17 = vmul.f32 %v5905_v8, %v1383_v58  ;;  %v1663_v58 = vld [vmem:[#allocation2 + $0x160] sm:$0xff]  ;;  %v1664_v8 = vld [vmem:[#allocation2 + $0x168] sm:$0xff] }
 0xaf6   : > { %v6327_v59 = vpack.c.bf16 %v1663_v58, %v1662_v57  ;;  %v2002_v57 = vld [vmem:[#allocation2 + $0x1a8] sm:$0xff]  ;;  %v2003_v58 = vld [vmem:[#allocation2 + $0x1b0] sm:$0xff] }
 0xaf7   : > { %v1396_v19 = vmul.f32 %v6296_v12, %v1391_v17  ;;  %v1665_v17 = vld [vmem:[#allocation2 + $0x170] sm:$0xff] }
 0xaf9   : > { %v1401_v20 = vadd.f32 %v6298_v18, %v1396_v19  ;;  %v6339_v19 = vpack.c.bf16 %v1665_v17, %v1664_v8 }
 0xafb   : > { %5348 = vmatmul.mubr.msk.f32.vlgmr.msra.gmra.mrb[8].mxu0 %vm616_vm3, %v1401_v20 }
 0xafc   : > { %5357 = vmatprep.mubr.msk.f32.mxu0 %vm6012_vm4, %v6013_v31 }
 0xbce   : > { %v1480_v32 = vpop.f32.mrb[8].mxu0 }
 0xbcf   : > { %v1481_v13 = vadd.f32 %v6305_v21, %v1480_v32  ;;  %v5349_v26 = vpop.f32.mrb[9].mxu0 }
 0xbd1   : > { %1563 = vrot.lane.b32.xlu0 %v1481_v13, %s6014_s5  ;;  %1485 = vrot.lane.b32.xlu1 %v1481_v13, %s6015_s6 }
 0xbd5   : > { %1561 = vrot.lane.b32.xlu1 %v1481_v13, %s6016_s7 }
 0xc43   : > { %v1564_v27 = vpop.permute.xlu0 %1563  ;;  %v1486_v34 = vpop.permute.xlu1 %1485 }
 0xc44   : > { %5351 = vmatpush3.xpose.msk.msra.mxu1 %vm1017_vm6, %v1486_v34  ;;  %5356 = vmatpush3.xpose.msk.msra.mxu0 %vm1017_vm6, %v1564_v27  ;;  %v6349_v27 = vld [vmem:[#allocation2 + $0x178] ss:$0 sm:$0xff] }
 0xc45   : > { %5360 = vmatprep.subr.mxu1 %v6013_v31  ;;  %5718 = vmatprep.subr.bf16.mxu0 %v6707_v60 }
 0xc47   : > { %5353 = vmatmul.mubr.msk.f32.vlgmr.msra.gmra.mrb[8].mxu1 %vm1017_vm6, %v1481_v13  ;;  %v1562_v36 = vpop.permute.xlu1 %1561 }
 0xc48   : > { %5358 = vmatmul.mubr.msk.f32.vlgmr.msra.gmra.mrb[10].mxu0 %vm1017_vm6, %v1562_v36  ;;  %5362 = vmatprep.mubr.msk.f32.mxu1 %vm6012_vm4, %v6013_v31 }
 0xc49   : > { %5369 = vmatprep.mubr.msk.f32.mxu0 %vm6012_vm4, %v6013_v31  ;;  %5720 = vmatpush3.bf16.msra.mxu0 %v6327_v59 }
 0xc4a   : > { %5721 = vmatprep.subr.bf16.mxu0 %v6707_v60 }
 0xd1a   : > { %v1557_v33 = vpop.f32.mrb[8].mxu1 }
 0xd1b   : > { %v5354_v35 = vpop.f32.mrb[9].mxu1  ;;  %v1635_v37 = vpop.f32.mrb[10].mxu0  ;;  %v1640_v39 = vsel %vm1639_vm7, %v1557_v33, -inf }
 0xd1c   : > { %1641 = vmax.xlane.f32.xlu1 %v1640_v39  ;;  %v5359_v40 = vpop.f32.mrb[11].mxu0  ;;  %v1643_v41 = vsel %vm1639_vm7, %v1635_v37, -inf }
 0xd1d   : > { %1644 = vmax.xlane.f32.xlu0 %v1643_v41 }
 0xda9   : > { %v1642_v42 = vpop.xlane.xlu1 %1641 }
 0xdaa   : > { %v1646_v10 = vsub.f32 %v1557_v33, %v1642_v42  ;;  %v1645_v47 = vpop.xlane.xlu0 %1644 }
 0xdab   : > { %v1647_v48 = vsub.f32 %v1635_v37, %v1645_v47 }
 0xdac   : > { %v1648_v11 = vmul.f32 1.442695, %v1646_v10 }
 0xdad   : > { %v1650_v50 = vmul.f32 1.442695, %v1647_v48 }
 0xdae   : > { %5906 = vpow2.f32 %v1648_v11 }
 0xdaf   : > { %5908 = vpow2.f32 %v1650_v50  ;;  %v1997_v50 = vld [vmem:[#allocation2 + $0x180] sm:$0xff] }
 0xdb8   : > { %v5907_v51 = vpop.eup %5906 }
 0xdb9   : > { %v5909_v52 = vpop.eup %5908  ;;  %v1652_v55 = vsel %vm1639_vm7, %v5907_v51, 0.0 }
 0xdba   : > { %1653 = vadd.xlane.f32.xlu0 %v1652_v55  ;;  %v1655_v56 = vsel %vm1639_vm7, %v5909_v52, 0.0  ;;  %v1999_v55 = vld [vmem:[#allocation2 + $0x190] sm:$0xff] }
 0xdbb   : > { %1656 = vadd.xlane.f32.xlu1 %v1655_v56  ;;  %v2000_v56 = vld [vmem:[#allocation2 + $0x198] sm:$0xff] }
 0xdcc   : > { %1821 = vrot.lane.b32.xlu1 %v1481_v13, %s6017_s8 }
 0xdd0   : > { %1667 = vrot.lane.b32.xlu0 %v1481_v13, %s6018_s11 }
 0xe47   : > { %v1654_v54 = vpop.xlane.xlu0 %1653 }
 0xe48   : > { %5910 = vrcp.f32 %v1654_v54  ;;  %v1657_v62 = vpop.xlane.xlu1 %1656  ;;  %v6363_v54 = vpack.c.bf16 %v2003_v58, %v2002_v57  ;;  %v2189_v57 = vld [vmem:[#allocation2 + $0x1f8] sm:$0xff] }
 0xe49   : > { %5912 = vrcp.f32 %v1657_v62 }
 0xe4b   : > { %v1668_v63 = vpop.permute.xlu0 %1667 }
 0xe4c   : > { %5361 = vmatpush3.msra.mxu1 %v1668_v63  ;;  %v1822_v9 = vpop.permute.xlu1 %1821 }
 0xe4d   : > { %5372 = vmatprep.subr.mxu1 %v6013_v31 }
 0xe52   : > { %v5911_v1 = vpop.eup %5910 }
 0xe53   : > { %v1659_v2 = vmul.f32 %v5911_v1, %v5907_v51  ;;  %v5913_v5 = vpop.eup %5912  ;;  %v1998_v51 = vld [vmem:[#allocation2 + $0x188] sm:$0xff] }
 0xe54   : > { %v1661_v6 = vmul.f32 %v5913_v5, %v5909_v52  ;;  %v6355_v52 = vpack.c.bf16 %v1998_v51, %v1997_v50  ;;  %v6367_v5 = vld [vmem:[#allocation2 + $0x1e0] ss:$0 sm:$0xff] }
 0xe55   : > { %5363 = vmatmul.mubr.msk.f32.vlgmr.msra.gmra.mrb[10].mxu1 %vm1639_vm7, %v1659_v2 }
 0xe56   : > { %5373 = vmatpush3.msra.mxu1 %v1822_v9  ;;  %5374 = vmatprep.mubr.msk.f32.mxu1 %vm6012_vm4, %v6013_v31 }
 0xe57   : > { %5724 = vmatprep.subr.bf16.mxu1 %v6707_v60 }
 0xe59   : > { %5375 = vmatmul.mubr.msk.f32.vlgmr.msra.gmra.mrb[12].mxu1 %vm1639_vm7, %v1661_v6  ;;  %v6369_v6 = vld [vmem:[#allocation2 + $0x1e8] ss:$0 sm:$0xff] }
 0xe5a   : > { %5392 = vmatprep.mubr.msk.f32.mxu1 %vm6012_vm4, %v6013_v31  ;;  %5726 = vmatpush3.bf16.msra.mxu1 %v6355_v52 }
 0xe5b   : > { %5727 = vmatprep.subr.bf16.mxu1 %v6707_v60 }
 0xf28   : > { %v1739_v20 = vpop.f32.mrb[10].mxu1 }
 0xf29   : > { %v5364_v32 = vpop.f32.mrb[11].mxu1  ;;  %5370 = vmatmul.mubr.msk.f32.vlgmr.msra.gmra.mrb[12].mxu0 %vm1017_vm6, %v1739_v20  ;;  %v2004_v20 = vld [vmem:[#allocation2 + $0x1b8] sm:$0xff] }
 0xf2a   : > { %5723 = vmatpush3.bf16.msra.mxu0 %v6339_v19  ;;  %5381 = vmatprep.mubr.msk.f32.mxu0 %vm6012_vm4, %v6013_v31  ;;  %v2005_v32 = vld [vmem:[#allocation2 + $0x1c0] sm:$0xff] }
 0xf2b   : > { %5730 = vmatprep.subr.bf16.mxu0 %v6707_v60 }
 0xf2c   : > { %v1893_v13 = vpop.f32.mrb[12].mxu1 }
 0xf2d   : > { %v5376_v26 = vpop.f32.mrb[13].mxu1  ;;  %5382 = vmatmul.mubr.msk.f32.vlgmr.msra.gmra.mrb[14].mxu0 %vm1017_vm6, %v1893_v13  ;;  %v6376_v13 = vpack.c.bf16 %v2005_v32, %v2004_v20  ;;  %v6405_v32 = vld [vmem:[#allocation2 + $0x298] ss:$0 sm:$0xff] }
 0xf2e   : > { %5403 = vmatprep.mubr.msk.f32.mxu0 %vm6012_vm4, %v6013_v31  ;;  %5732 = vmatpush3.bf16.msra.mxu0 %v6363_v54  ;;  %v6380_v26 = vld [vmem:[#allocation2 + $0x1a0] ss:$0 sm:$0xff] }
 0xf2f   : > { %5733 = vmatprep.subr.bf16.mxu0 %v6707_v60 }
 0xf32   : > { %5735 = vmatpush3.bf16.msra.mxu0 %v6376_v13 }
 0xf33   : > { %5417 = vmatprep.subr.mxu0 %v6013_v31 }
 0xffc   : > { %v1812_v34 = vpop.f32.mrb[12].mxu0 }
 0xffd   : > { %v5371_v36 = vpop.f32.mrb[13].mxu0  ;;  %v1820_v33 = vadd.f32 %v6349_v27, %v1812_v34 }
0x1000   : > { %v1966_v35 = vpop.f32.mrb[14].mxu0 }
0x1001   : > { %v1970_v37 = vadd.f32 %v1966_v35, %v1820_v33  ;;  %v5383_v39 = vpop.f32.mrb[15].mxu0 }
0x1003   : > { %v1971_v40 = vadd.f32 %v1970_v37, %v6282_v53  ;;  %v6359_v53 = vpack.c.bf16 %v2000_v56, %v1999_v55  ;;  %v6386_v37 = vld [vmem:[#allocation2 + $0x1c8] ss:$0 sm:$0xff]  ;;  %v2188_v56 = vld [vmem:[#allocation2 + $0x1f0] sm:$0xff] }
0x1004   : > { %v6395_v58 = vpack.c.bf16 %v2189_v57, %v2188_v56 }
0x1005   : > { %v1974_v41 = vsel %vm616_vm3, %v1971_v40, 0.0  ;;  %5729 = vmatpush3.bf16.msra.mxu1 %v6359_v53 }
0x1006   : > { %1975 = vadd.xlane.f32.xlu1 %v1974_v41  ;;  %5736 = vmatprep.subr.bf16.mxu1 %v6707_v60 }
0x1093   : > { %v1976_v42 = vpop.xlane.xlu1 %1975 }
0x1094   : > { %v1977_v10 = vmul.f32 0.03125, %v1976_v42 }
0x1096   : > { %v1978_v47 = vsub.f32 %v1971_v40, %v1977_v10 }
0x1098   : > { %v1979_v48 = vmul.f32 %v1978_v47, %v1978_v47 }
0x109a   : > { %v1980_v11 = vsel %vm616_vm3, %v1979_v48, 0.0 }
0x109b   : > { %1981 = vadd.xlane.f32.xlu0 %v1980_v11 }
0x1128   : > { %v1982_v62 = vpop.xlane.xlu0 %1981 }
0x1129   : > { %v1983_v63 = vmul.f32 0.03125, %v1982_v62  ;;  %v2191_v62 = vld [vmem:[#allocation2 + $0x208] sm:$0xff] }
0x112b   : > { %v1984_v1 = vadd.f32 1e-05, %v1983_v63 }
0x112d   : > { %5914 = vrsqrt.f32 %v1984_v1 }
0x1137   : > { %v5915_v2 = vpop.eup %5914 }
0x1138   : > { %v1986_v9 = vmul.f32 %v5915_v2, %v1978_v47 }
0x113a   : > { %v1991_v8 = vmul.f32 %v6367_v5, %v1986_v9 }
0x113c   : > { %v1996_v17 = vadd.f32 %v6369_v6, %v1991_v8 }
0x113e   : > { %5393 = vmatmul.mubr.msk.f32.vlgmr.msra.gmra.mrb[14].mxu1 %vm616_vm3, %v1996_v17  ;;  %v6403_v17 = vld [vmem:[#allocation2 + $0x290] ss:$0 sm:$0xff] }
0x113f   : > { %5414 = vmatprep.mubr.msk.f32.mxu1 %vm6012_vm4, %v6013_v31  ;;  %5738 = vmatpush3.bf16.msra.mxu1 %v6395_v58 }
0x1140   : > { %5739 = vmatprep.subr.bf16.mxu1 %v6707_v60 }
0x1211   : > { %v2080_v34 = vpop.f32.mrb[14].mxu1 }
0x1212   : > { %v2081_v36 = vadd.f32 %v6380_v26, %v2080_v34  ;;  %v5394_v33 = vpop.f32.mrb[15].mxu1 }
0x1213   : > { %v6412_v33 = vld [vmem:[#allocation2 + $0x210] ss:$0 sm:$0xff] }
0x1214   : > { %v2084_v35 = vmax.f32 %v2081_v36, 0.0 }
0x1216   : > { %5404 = vmatmul.mubr.msk.f32.vlgmr.msra.gmra.mrb[16].mxu0 %vm616_vm3, %v2084_v35 }
0x1217   : > { %5419 = vmatprep.mubr.msk.f32.mxu0 %vm6012_vm4, %v6013_v31 }
0x12e9   : > { %v2158_v39 = vpop.f32.mrb[16].mxu0 }
0x12ea   : > { %v2159_v41 = vadd.f32 %v6386_v37, %v2158_v39  ;;  %v5405_v42 = vpop.f32.mrb[17].mxu0 }
0x12ec   : > { %v6389_v10 = vadd.f32 %v2159_v41, %v1971_v40  ;;  %v2190_v40 = vld [vmem:[#allocation2 + $0x200] sm:$0xff] }
0x12ed   : > { %v6399_v63 = vpack.c.bf16 %v2191_v62, %v2190_v40 }
0x12ee   : > { %v2165_v47 = vsel %vm616_vm3, %v6389_v10, 0.0 }
0x12ef   : > { %2166 = vadd.xlane.f32.xlu0 %v2165_v47  ;;  %5741 = vmatpush3.bf16.msra.mxu1 %v6399_v63 }
0x12f0   : > { %5427 = vmatprep.subr.mxu1 %v6013_v31 }
0x137c   : > { %v2167_v48 = vpop.xlane.xlu0 %2166 }
0x137d   : > { %v2168_v11 = vmul.f32 0.03125, %v2167_v48 }
0x137f   : > { %v2169_v50 = vsub.f32 %v6389_v10, %v2168_v11 }
0x1381   : > { %v2170_v51 = vmul.f32 %v2169_v50, %v2169_v50 }
0x1383   : > { %v2171_v55 = vsel %vm616_vm3, %v2170_v51, 0.0 }
0x1384   : > { %2172 = vadd.xlane.f32.xlu1 %v2171_v55 }
0x1411   : > { %v2173_v1 = vpop.xlane.xlu1 %2172 }
0x1412   : > { %v2174_v2 = vmul.f32 0.03125, %v2173_v1 }
0x1414   : > { %v2175_v9 = vadd.f32 1e-05, %v2174_v2 }
0x1416   : > { %5916 = vrsqrt.f32 %v2175_v9 }
0x1420   : > { %v5917_v8 = vpop.eup %5916 }
0x1421   : > { %v2177_v20 = vmul.f32 %v5917_v8, %v2169_v50 }
0x1423   : > { %v2182_v34 = vmul.f32 %v6403_v17, %v2177_v20 }
0x1425   : > { %v2187_v36 = vadd.f32 %v6405_v32, %v2182_v34 }
0x1427   : > { %5415 = vmatmul.mubr.msk.f32.vlgmr.msra.gmra.mrb[16].mxu1 %vm616_vm3, %v2187_v36 }
0x1428   : > { %5429 = vmatprep.mubr.msk.f32.mxu1 %vm6012_vm4, %v6013_v31 }
0x14fa   : > { %v2266_v35 = vpop.f32.mrb[16].mxu1 }
0x14fb   : > { %v2267_v39 = vadd.f32 %v6412_v33, %v2266_v35  ;;  %v5416_v41 = vpop.f32.mrb[17].mxu1 }
0x14fd   : > { %2349 = vrot.lane.b32.xlu1 %v2267_v39, %s6014_s5  ;;  %2271 = vrot.lane.b32.xlu0 %v2267_v39, %s6015_s6 }
0x1501   : > { %2347 = vrot.lane.b32.xlu1 %v2267_v39, %s6016_s7 }
0x156f   : > { %v2272_v42 = vpop.permute.xlu0 %2271  ;;  %v2350_v47 = vpop.permute.xlu1 %2349 }
0x1570   : > { %5418 = vmatpush3.xpose.msk.msra.mxu0 %vm1017_vm6, %v2272_v42  ;;  %v2447_v42 = vld [vmem:[#allocation2 + $0x218] sm:$0xff] }
0x1571   : > { %5422 = vmatprep.subr.mxu0 %v6013_v31 }
0x1573   : > { %5420 = vmatmul.mubr.msk.f32.vlgmr.msra.gmra.mrb[18].mxu0 %vm1017_vm6, %v2267_v39  ;;  %v2348_v48 = vpop.permute.xlu1 %2347 }
0x1574   : > { %5423 = vmatpush3.xpose.msk.msra.mxu0 %vm1017_vm6, %v2350_v47  ;;  %5424 = vmatprep.mubr.msk.f32.mxu0 %vm6012_vm4, %v6013_v31  ;;  %v2448_v47 = vld [vmem:[#allocation2 + $0x220] sm:$0xff] }
0x1575   : > { %5742 = vmatprep.subr.bf16.mxu0 %v6707_v60 }
0x1577   : > { %5425 = vmatmul.mubr.msk.f32.vlgmr.msra.gmra.mrb[20].mxu0 %vm1017_vm6, %v2348_v48  ;;  %v6435_v48 = vpack.c.bf16 %v2448_v47, %v2447_v42 }
0x1578   : > { %5436 = vmatprep.mubr.msk.f32.mxu0 %vm6012_vm4, %v6013_v31 }
0x1579   : > { %5744 = vmatpush3.bf16.msra.mxu0 %v6435_v48 }
0x157a   : > { %5745 = vmatprep.subr.bf16.mxu0 %v6707_v60 }
0x1646   : > { %v2343_v11 = vpop.f32.mrb[18].mxu0 }
0x1647   : > { %v5421_v50 = vpop.f32.mrb[19].mxu0  ;;  %v2425_v51 = vsel %vm1639_vm7, %v2343_v11, -inf }
0x1648   : > { %2426 = vmax.xlane.f32.xlu0 %v2425_v51 }
0x164a   : > { %v2421_v55 = vpop.f32.mrb[20].mxu0 }
0x164b   : > { %v5426_v56 = vpop.f32.mrb[21].mxu0  ;;  %v2428_v57 = vsel %vm1639_vm7, %v2421_v55, -inf }
0x164c   : > { %2429 = vmax.xlane.f32.xlu1 %v2428_v57 }
0x165d   : > { %2452 = vrot.lane.b32.xlu1 %v2267_v39, %s6018_s11 }
0x16d5   : > { %v2427_v40 = vpop.xlane.xlu0 %2426 }
0x16d6   : > { %v2431_v62 = vsub.f32 %v2343_v11, %v2427_v40  ;;  %v2449_v40 = vld [vmem:[#allocation2 + $0x228] sm:$0xff] }
0x16d8   : > { %v2433_v1 = vmul.f32 1.442695, %v2431_v62  ;;  %v2450_v62 = vld [vmem:[#allocation2 + $0x230] sm:$0xff] }
0x16d9   : > { %v2430_v2 = vpop.xlane.xlu1 %2429 }
0x16da   : > { %5918 = vpow2.f32 %v2433_v1  ;;  %v2432_v9 = vsub.f32 %v2421_v55, %v2430_v2  ;;  %v6446_v1 = vpack.c.bf16 %v2450_v62, %v2449_v40  ;;  %v2782_v62 = vld [vmem:[#allocation2 + $0x240] sm:$0xff] }
0x16dc   : > { %v2435_v8 = vmul.f32 1.442695, %v2432_v9 }
0x16dd   : > { %v2453_v20 = vpop.permute.xlu1 %2452 }
0x16de   : > { %5920 = vpow2.f32 %v2435_v8  ;;  %5428 = vmatpush3.msra.mxu1 %v2453_v20 }
0x16df   : > { %5439 = vmatprep.subr.mxu1 %v6013_v31 }
0x16e4   : > { %v5919_v34 = vpop.eup %5918 }
0x16e5   : > { %v2437_v36 = vsel %vm1639_vm7, %v5919_v34, 0.0 }
0x16e6   : > { %2438 = vadd.xlane.f32.xlu0 %v2437_v36 }
0x16e8   : > { %v5921_v35 = vpop.eup %5920 }
0x16e9   : > { %v2440_v41 = vsel %vm1639_vm7, %v5921_v35, 0.0 }
0x16ea   : > { %2441 = vadd.xlane.f32.xlu0 %v2440_v41 }
0x1700   : > { %2606 = vrot.lane.b32.xlu0 %v2267_v39, %s6017_s8 }
0x1773   : > { %v2439_v11 = vpop.xlane.xlu0 %2438 }
0x1774   : > { %5922 = vrcp.f32 %v2439_v11 }
0x1777   : > { %v2442_v50 = vpop.xlane.xlu0 %2441 }
0x1778   : > { %5924 = vrcp.f32 %v2442_v50 }
0x177b   : > { %v2607_v56 = vpop.permute.xlu0 %2606 }
0x177e   : > { %v5923_v51 = vpop.eup %5922 }
0x177f   : > { %v2444_v55 = vmul.f32 %v5923_v51, %v5919_v34  ;;  %v6456_v34 = vld [vmem:[#allocation2 + $0x238] ss:$0 sm:$0xff] }
0x1781   : > { %5430 = vmatmul.mubr.msk.f32.vlgmr.msra.gmra.mrb[18].mxu1 %vm1639_vm7, %v2444_v55 }
0x1782   : > { %v5925_v57 = vpop.eup %5924  ;;  %5440 = vmatpush3.msra.mxu1 %v2607_v56  ;;  %5441 = vmatprep.mubr.msk.f32.mxu1 %vm6012_vm4, %v6013_v31 }
0x1783   : > { %v2446_v39 = vmul.f32 %v5925_v57, %v5921_v35  ;;  %5748 = vmatprep.subr.bf16.mxu1 %v6707_v60 }
0x1785   : > { %5442 = vmatmul.mubr.msk.f32.vlgmr.msra.gmra.mrb[20].mxu1 %vm1639_vm7, %v2446_v39 }
0x1786   : > { %5459 = vmatprep.mubr.msk.f32.mxu1 %vm6012_vm4, %v6013_v31 }
0x1854   : > { %v2524_v2 = vpop.f32.mrb[18].mxu1 }
0x1855   : > { %v5431_v9 = vpop.f32.mrb[19].mxu1  ;;  %5437 = vmatmul.mubr.msk.f32.vlgmr.msra.gmra.mrb[22].mxu0 %vm1017_vm6, %v2524_v2  ;;  %v2783_v2 = vld [vmem:[#allocation2 + $0x248] sm:$0xff] }
0x1856   : > { %5747 = vmatpush3.bf16.msra.mxu0 %v6446_v1  ;;  %5448 = vmatprep.mubr.msk.f32.mxu0 %vm6012_vm4, %v6013_v31  ;;  %v6462_v9 = vpack.c.bf16 %v2783_v2, %v2782_v62  ;;  %v6480_v2 = vld [vmem:[#allocation2 + $0x2a8] ss:$0 sm:$0xff] }
0x1857   : > { %5754 = vmatprep.subr.bf16.mxu0 %v6707_v60 }
0x1858   : > { %v2678_v8 = vpop.f32.mrb[20].mxu1  ;;  %5750 = vmatpush3.bf16.msra.mxu1 %v6462_v9 }
0x1859   : > { %v5443_v20 = vpop.f32.mrb[21].mxu1  ;;  %5449 = vmatmul.mubr.msk.f32.vlgmr.msra.gmra.mrb[24].mxu0 %vm1017_vm6, %v2678_v8  ;;  %v2784_v8 = vld [vmem:[#allocation2 + $0x250] sm:$0xff]  ;;  %5751 = vmatprep.subr.bf16.mxu1 %v6707_v60 }
0x185a   : > { %5470 = vmatprep.mubr.msk.f32.mxu0 %vm6012_vm4, %v6013_v31  ;;  %v2785_v20 = vld [vmem:[#allocation2 + $0x258] sm:$0xff] }
0x1928   : > { %v2597_v36 = vpop.f32.mrb[22].mxu0 }
0x1929   : > { %v5438_v35 = vpop.f32.mrb[23].mxu0  ;;  %v2605_v41 = vadd.f32 %v6456_v34, %v2597_v36  ;;  %v2787_v36 = vld [vmem:[#allocation2 + $0x268] sm:$0xff] }
0x192a   : > { %v2788_v35 = vld [vmem:[#allocation2 + $0x270] sm:$0xff] }
0x192c   : > { %v2751_v42 = vpop.f32.mrb[24].mxu0 }
0x192d   : > { %v2755_v47 = vadd.f32 %v2751_v42, %v2605_v41  ;;  %v5450_v11 = vpop.f32.mrb[25].mxu0  ;;  %v2789_v41 = vld [vmem:[#allocation2 + $0x278] sm:$0xff]  ;;  %v6470_v42 = vpack.c.bf16 %v2788_v35, %v2787_v36 }
0x192f   : > { %v2756_v50 = vadd.f32 %v2755_v47, %v6389_v10  ;;  %v6466_v10 = vpack.c.bf16 %v2785_v20, %v2784_v8  ;;  %v2790_v47 = vld [vmem:[#allocation2 + $0x280] sm:$0xff]  ;;  %5756 = vmatpush3.bf16.msra.mxu0 %v6470_v42 }
0x1930   : > { %v6473_v11 = vpack.c.bf16 %v2790_v47, %v2789_v41  ;;  %5757 = vmatprep.subr.bf16.mxu0 %v6707_v60 }
0x1931   : > { %v2759_v51 = vsel %vm616_vm3, %v2756_v50, 0.0  ;;  %5753 = vmatpush3.bf16.msra.mxu1 %v6466_v10 }
0x1932   : > { %2760 = vadd.xlane.f32.xlu1 %v2759_v51  ;;  %5760 = vmatprep.subr.bf16.mxu1 %v6707_v60 }
0x1933   : > { %5759 = vmatpush3.bf16.msra.mxu0 %v6473_v11 }
0x1934   : > { %5766 = vmatprep.subr.bf16.mxu0 %v6707_v60 }
0x19bf   : > { %v2761_v55 = vpop.xlane.xlu1 %2760 }
0x19c0   : > { %v2762_v56 = vmul.f32 0.03125, %v2761_v55 }
0x19c2   : > { %v2763_v57 = vsub.f32 %v2756_v50, %v2762_v56 }
0x19c4   : > { %v2764_v39 = vmul.f32 %v2763_v57, %v2763_v57 }
0x19c6   : > { %v2765_v40 = vsel %vm616_vm3, %v2764_v39, 0.0 }
0x19c7   : > { %2766 = vadd.xlane.f32.xlu0 %v2765_v40  ;;  %v6478_v40 = vld [vmem:[#allocation2 + $0x2a0] ss:$0 sm:$0xff] }
0x1a54   : > { %v2767_v51 = vpop.xlane.xlu0 %2766 }
0x1a55   : > { %v2768_v55 = vmul.f32 0.03125, %v2767_v51 }
0x1a57   : > { %v2769_v56 = vadd.f32 1e-05, %v2768_v55 }
0x1a59   : > { %5926 = vrsqrt.f32 %v2769_v56 }
0x1a63   : > { %v5927_v39 = vpop.eup %5926 }
0x1a64   : > { %v2771_v62 = vmul.f32 %v5927_v39, %v2763_v57  ;;  %v6491_v57 = vld [vmem:[#allocation2 + $0x260] ss:$0 sm:$0xff] }
0x1a66   : > { %v2776_v8 = vmul.f32 %v6478_v40, %v2771_v62 }
0x1a68   : > { %v2781_v20 = vadd.f32 %v6480_v2, %v2776_v8 }
0x1a6a   : > { %5460 = vmatmul.mubr.msk.f32.vlgmr.msra.gmra.mrb[22].mxu1 %vm616_vm3, %v2781_v20 }
0x1a6b   : > { %5762 = vmatpush3.bf16.msra.mxu1 %v6181_v24  ;;  %5481 = vmatprep.mubr.msk.f32.mxu1 %vm6012_vm4, %v6013_v31  ;;  %v6501_v24 = vld [vmem:[#allocation2 + $0x288] ss:$0 sm:$0xff] }
0x1a6c   : > { %5763 = vmatprep.subr.bf16.mxu1 %v6707_v60 }
0x1a6f   : > { %5765 = vmatpush3.bf16.msra.mxu1 %v6188_v15 }
0x1a70   : > { %5770 = vmatprep.subr.bf16.mxu1 %v6707_v60 }
0x1b3d   : > { %v2865_v36 = vpop.f32.mrb[22].mxu1 }
0x1b3e   : > { %v2866_v35 = vadd.f32 %v6491_v57, %v2865_v36  ;;  %v5461_v41 = vpop.f32.mrb[23].mxu1 }
0x1b40   : > { %v2869_v47 = vmax.f32 %v2866_v35, 0.0 }
0x1b42   : > { %5471 = vmatmul.mubr.msk.f32.vlgmr.msra.gmra.mrb[26].mxu0 %vm616_vm3, %v2869_v47 }
0x1b43   : > { %5769 = vmatpush3.bf16.xpose.msk.msra.mxu0 %vm6206_vm5, %v6210_v23  ;;  %5488 = vmatprep.mubr.msk.f32.mxu0 %vm6012_vm4, %v6013_v31 }
0x1b44   : > { %5773 = vmatprep.subr.bf16.mxu0 %v6707_v60 }
0x1c15   : > { %v2943_v15 = vpop.f32.mrb[26].mxu0 }
0x1c16   : > { %v2944_v51 = vadd.f32 %v6501_v24, %v2943_v15  ;;  %v5472_v55 = vpop.f32.mrb[27].mxu0 }
0x1c18   : > { %v2947_v56 = vadd.f32 %v2944_v51, %v2756_v50  ;;  %v6716_v51 = vmov 0.0|0.0  }
0x1c1a   : > { %v2948_v39 = vsel %vm616_vm3, %v2947_v56, 0.0 }
0x1c1b   : > { %2949 = vadd.xlane.f32.xlu1 %v2948_v39 }
0x1ca8   : > { %v2950_v62 = vpop.xlane.xlu1 %2949 }
0x1ca9   : > { %v2951_v8 = vmul.f32 0.03125, %v2950_v62 }
0x1cab   : > { %v2952_v20 = vsub.f32 %v2947_v56, %v2951_v8 }
0x1cad   : > { %v2953_v44 = vmul.f32 %v2952_v20, %v2952_v20 }
0x1caf   : > { %v2954_v23 = vsel %vm616_vm3, %v2953_v44, 0.0 }
0x1cb0   : > { %2955 = vadd.xlane.f32.xlu0 %v2954_v23 }
0x1d3d   : > { %v2956_v36 = vpop.xlane.xlu0 %2955 }
0x1d3e   : > { %v2957_v35 = vmul.f32 0.03125, %v2956_v36 }
0x1d40   : > { %v2958_v41 = vadd.f32 1e-05, %v2957_v35 }
0x1d42   : > { %5928 = vrsqrt.f32 %v2958_v41 }
0x1d4c   : > { %v5929_v47 = vpop.eup %5928 }
0x1d4d   : > { %v2960_v60 = vmul.f32 %v5929_v47, %v2952_v20 }
0x1d4f   : > { %v2961_v15 = vmul.f32 %v6183_v14, %v2960_v60 }
0x1d51   : > { %v2962_v50 = vadd.f32 %v6196_v28, %v2961_v15 }
0x1d53   : > { %5482 = vmatmul.mubr.msk.f32.vlgmr.msra.gmra.mrb[24].mxu1 %vm616_vm3, %v2962_v50 }
0x1d54   : > { %5772 = vmatpush3.bf16.msra.mxu1 %v6212_v29  ;;  %5495 = vmatprep.mubr.msk.f32.mxu1 %vm6012_vm4, %v6013_v31 }
0x1d55   : > { %5779 = vmatprep.subr.bf16.mxu1 %v6716_v51 }
0x1e26   : > { %v3032_v55 = vpop.f32.mrb[24].mxu1 }
0x1e27   : > { %v3033_v39 = vadd.f32 %v6220_v45, %v3032_v55  ;;  %v5483_v62 = vpop.f32.mrb[25].mxu1 }
0x1e29   : > { %5489 = vmatmul.mubr.msk.f32.vlgmr.msra.gmra.mrb[28].mxu0 %vm616_vm3, %v3033_v39 }
0x1e2a   : > { %5775 = vmatpush3.bf16.msra.mxu0 %v6228_v16  ;;  %5506 = vmatprep.mubr.msk.f32.mxu0 %vm6012_vm4, %v6013_v31 }
0x1e2b   : > { %5776 = vmatprep.subr.bf16.mxu0 %v6716_v51 }
0x1e2e   : > { %5778 = vmatpush3.bf16.msra.mxu0 %v6231_v61 }
0x1e2f   : > { %5785 = vmatprep.subr.bf16.mxu0 %v6716_v51 }
0x1efc   : > { %v3105_v60 = vpop.f32.mrb[28].mxu0 }
0x1efd   : > { %v5490_v14 = vpop.f32.mrb[29].mxu0  ;;  %v3109_v28 = vsel %vm1017_vm6, %v3105_v60, -inf }
0x1efe   : > { %3110 = vmax.xlane.f32.xlu1 %v3109_v28 }
0x1f8b   : > { %v3111_v29 = vpop.xlane.xlu1 %3110 }
0x1f8c   : > { %v3112_v45 = vsub.f32 %v3105_v60, %v3111_v29 }
0x1f8e   : > { %v3113_v8 = vmul.f32 1.442695, %v3112_v45 }
0x1f90   : > { %5930 = vpow2.f32 %v3113_v8 }
0x1f9a   : > { %v5931_v20 = vpop.eup %5930 }
0x1f9b   : > { %v3115_v16 = vsel %vm1017_vm6, %v5931_v20, 0.0 }
0x1f9c   : > { %3116 = vadd.xlane.f32.xlu0 %v3115_v16 }
0x2029   : > { %v3117_v44 = vpop.xlane.xlu0 %3116 }
0x202a   : > { %5932 = vrcp.f32 %v3117_v44 }
0x2034   : > { %v5933_v23 = vpop.eup %5932 }
0x2035   : > { %v3119_v36 = vmul.f32 %v5933_v23, %v5931_v20 }
0x2037   : > { %5496 = vmatmul.mubr.msk.f32.vlgmr.msra.gmra.mrb[26].mxu1 %vm1017_vm6, %v3119_v36 }
0x2038   : > { %5781 = vmatpush3.bf16.msra.mxu1 %v6248_v22  ;;  %5517 = vmatprep.mubr.msk.f32.mxu1 %vm6012_vm4, %v6013_v31 }
0x2039   : > { %5782 = vmatprep.subr.bf16.mxu1 %v6716_v51 }
0x203c   : > { %5784 = vmatpush3.bf16.msra.mxu1 %v6252_v25 }
0x203d   : > { %5791 = vmatprep.subr.bf16.mxu1 %v6716_v51 }
0x210a   : > { %v3189_v61 = vpop.f32.mrb[26].mxu1 }
0x210b   : > { %v5497_v35 = vpop.f32.mrb[27].mxu1  ;;  %5507 = vmatmul.mubr.msk.f32.vlgmr.msra.gmra.mrb[30].mxu0 %vm616_vm3, %v3189_v61 }
0x210c   : > { %5787 = vmatpush3.bf16.msra.mxu0 %v6256_v30  ;;  %5528 = vmatprep.mubr.msk.f32.mxu0 %vm6012_vm4, %v6013_v31 }
0x210d   : > { %5788 = vmatprep.subr.bf16.mxu0 %v6716_v51 }
0x2110   : > { %5790 = vmatpush3.bf16.msra.mxu0 %v6269_v43 }
0x2111   : > { %5542 = vmatprep.subr.mxu0 %v6013_v31 }
0x21de   : > { %v3262_v22 = vpop.f32.mrb[30].mxu0 }
0x21df   : > { %v3266_v41 = vadd.f32 %v3262_v22, %v2947_v56  ;;  %v5508_v25 = vpop.f32.mrb[31].mxu0 }
0x21e1   : > { %v3267_v47 = vadd.f32 %v6242_v3, %v3266_v41 }
0x21e3   : > { %v3268_v15 = vsel %vm616_vm3, %v3267_v47, 0.0 }
0x21e4   : > { %3269 = vadd.xlane.f32.xlu1 %v3268_v15 }
0x2271   : > { %v3270_v50 = vpop.xlane.xlu1 %3269 }
0x2272   : > { %v3271_v55 = vmul.f32 0.03125, %v3270_v50 }
0x2274   : > { %v3272_v30 = vsub.f32 %v3267_v47, %v3271_v55 }
0x2276   : > { %v3273_v39 = vmul.f32 %v3272_v30, %v3272_v30 }
0x2278   : > { %v3274_v62 = vsel %vm616_vm3, %v3273_v39, 0.0 }
0x2279   : > { %3275 = vadd.xlane.f32.xlu0 %v3274_v62 }
0x2306   : > { %v3276_v60 = vpop.xlane.xlu0 %3275 }
0x2307   : > { %v3277_v14 = vmul.f32 0.03125, %v3276_v60 }
0x2309   : > { %v3278_v43 = vadd.f32 1e-05, %v3277_v14 }
0x230b   : > { %5934 = vrsqrt.f32 %v3278_v43 }
0x2315   : > { %v5935_v28 = vpop.eup %5934 }
0x2316   : > { %v3280_v29 = vmul.f32 %v5935_v28, %v3272_v30 }
0x2318   : > { %v3281_v56 = vmul.f32 %v6260_v7, %v3280_v29 }
0x231a   : > { %v3282_v3 = vadd.f32 %v6262_v38, %v3281_v56 }
0x231c   : > { %5518 = vmatmul.mubr.msk.f32.vlgmr.msra.gmra.mrb[28].mxu1 %vm616_vm3, %v3282_v3 }
0x231d   : > { %5793 = vmatpush3.bf16.msra.mxu1 %v6288_v0  ;;  %5539 = vmatprep.mubr.msk.f32.mxu1 %vm6012_vm4, %v6013_v31 }
0x231e   : > { %5794 = vmatprep.subr.bf16.mxu1 %v6716_v51 }
0x2321   : > { %5796 = vmatpush3.bf16.msra.mxu1 %v6292_v4 }
0x2322   : > { %5547 = vmatprep.subr.mxu1 %v6013_v31 }
0x23ef   : > { %v3352_v45 = vpop.f32.mrb[28].mxu1 }
0x23f0   : > { %v3353_v8 = vadd.f32 %v6273_v46, %v3352_v45  ;;  %v5519_v20 = vpop.f32.mrb[29].mxu1 }
0x23f2   : > { %v3356_v7 = vmax.f32 %v3353_v8, 0.0 }
0x23f4   : > { %5529 = vmatmul.mubr.msk.f32.vlgmr.msra.gmra.mrb[32].mxu0 %vm616_vm3, %v3356_v7 }
0x23f5   : > { %5544 = vmatprep.mubr.msk.f32.mxu0 %vm6012_vm4, %v6013_v31 }
0x24c7   : > { %v3426_v38 = vpop.f32.mrb[32].mxu0 }
0x24c8   : > { %v3427_v0 = vadd.f32 %v6279_v49, %v3426_v38  ;;  %v5530_v16 = vpop.f32.mrb[33].mxu0 }
0x24ca   : > { %v6554_v44 = vadd.f32 %v3427_v0, %v3267_v47 }
0x24cc   : > { %v3431_v4 = vsel %vm616_vm3, %v6554_v44, 0.0 }
0x24cd   : > { %3432 = vadd.xlane.f32.xlu1 %v3431_v4 }
0x255a   : > { %v3433_v23 = vpop.xlane.xlu1 %3432 }
0x255b   : > { %v3434_v36 = vmul.f32 0.03125, %v3433_v23 }
0x255d   : > { %v3435_v46 = vsub.f32 %v6554_v44, %v3434_v36 }
0x255f   : > { %v3436_v61 = vmul.f32 %v3435_v46, %v3435_v46 }
0x2561   : > { %v3437_v35 = vsel %vm616_vm3, %v3436_v61, 0.0 }
0x2562   : > { %3438 = vadd.xlane.f32.xlu0 %v3437_v35 }
0x25ef   : > { %v3439_v22 = vpop.xlane.xlu0 %3438 }
0x25f0   : > { %v3440_v41 = vmul.f32 0.03125, %v3439_v22 }
0x25f2   : > { %v3441_v25 = vadd.f32 1e-05, %v3440_v41 }
0x25f4   : > { %5936 = vrsqrt.f32 %v3441_v25 }
0x25fe   : > { %v5937_v49 = vpop.eup %5936 }
0x25ff   : > { %v3443_v15 = vmul.f32 %v5937_v49, %v3435_v46 }
0x2601   : > { %v3444_v47 = vmul.f32 %v6296_v12, %v3443_v15 }
0x2603   : > { %v3445_v50 = vadd.f32 %v6298_v18, %v3444_v47 }
0x2605   : > { %5540 = vmatmul.mubr.msk.f32.vlgmr.msra.gmra.mrb[30].mxu1 %vm616_vm3, %v3445_v50 }
0x2606   : > { %5549 = vmatprep.mubr.msk.f32.mxu1 %vm6012_vm4, %v6013_v31 }
0x26d8   : > { %v3515_v55 = vpop.f32.mrb[30].mxu1 }
0x26d9   : > { %v3516_v30 = vadd.f32 %v6305_v21, %v3515_v55  ;;  %v5541_v39 = vpop.f32.mrb[31].mxu1 }
0x26db   : > { %3598 = vrot.lane.b32.xlu0 %v3516_v30, %s6014_s5  ;;  %3520 = vrot.lane.b32.xlu1 %v3516_v30, %s6015_s6 }
0x26df   : > { %3596 = vrot.lane.b32.xlu1 %v3516_v30, %s6016_s7 }
0x274d   : > { %v3599_v62 = vpop.permute.xlu0 %3598  ;;  %v3521_v60 = vpop.permute.xlu1 %3520 }
0x274e   : > { %5543 = vmatpush3.xpose.msk.msra.mxu0 %vm1017_vm6, %v3521_v60  ;;  %5548 = vmatpush3.xpose.msk.msra.mxu1 %vm1017_vm6, %v3599_v62 }
0x274f   : > { %5552 = vmatprep.subr.mxu0 %v6013_v31  ;;  %5797 = vmatprep.subr.bf16.mxu1 %v6716_v51 }
0x2751   : > { %5545 = vmatmul.mubr.msk.f32.vlgmr.msra.gmra.mrb[34].mxu0 %vm1017_vm6, %v3516_v30  ;;  %v3597_v12 = vpop.permute.xlu1 %3596 }
0x2752   : > { %5550 = vmatmul.mubr.msk.f32.vlgmr.msra.gmra.mrb[32].mxu1 %vm1017_vm6, %v3597_v12  ;;  %5554 = vmatprep.mubr.msk.f32.mxu0 %vm6012_vm4, %v6013_v31 }
0x2753   : > { %5799 = vmatpush3.bf16.msra.mxu1 %v6327_v59  ;;  %5561 = vmatprep.mubr.msk.f32.mxu1 %vm6012_vm4, %v6013_v31 }
0x2754   : > { %5800 = vmatprep.subr.bf16.mxu1 %v6716_v51 }
0x2824   : > { %v3592_v18 = vpop.f32.mrb[34].mxu0 }
0x2825   : > { %v5546_v21 = vpop.f32.mrb[35].mxu0  ;;  %v3670_v14 = vpop.f32.mrb[32].mxu1  ;;  %v3674_v43 = vsel %vm1639_vm7, %v3592_v18, -inf }
0x2826   : > { %v5551_v28 = vpop.f32.mrb[33].mxu1  ;;  %3675 = vmax.xlane.f32.xlu1 %v3674_v43  ;;  %v3677_v29 = vsel %vm1639_vm7, %v3670_v14, -inf }
0x2827   : > { %3678 = vmax.xlane.f32.xlu0 %v3677_v29 }
0x28b3   : > { %v3676_v56 = vpop.xlane.xlu1 %3675 }
0x28b4   : > { %v3680_v3 = vsub.f32 %v3592_v18, %v3676_v56  ;;  %v3679_v45 = vpop.xlane.xlu0 %3678 }
0x28b5   : > { %v3681_v8 = vsub.f32 %v3670_v14, %v3679_v45 }
0x28b6   : > { %v3682_v59 = vmul.f32 1.442695, %v3680_v3 }
0x28b7   : > { %v3684_v20 = vmul.f32 1.442695, %v3681_v8 }
0x28b8   : > { %5938 = vpow2.f32 %v3682_v59 }
0x28b9   : > { %5940 = vpow2.f32 %v3684_v20 }
0x28c2   : > { %v5939_v7 = vpop.eup %5938 }
0x28c3   : > { %v5941_v38 = vpop.eup %5940  ;;  %v3686_v0 = vsel %vm1639_vm7, %v5939_v7, 0.0 }
0x28c4   : > { %3687 = vadd.xlane.f32.xlu0 %v3686_v0  ;;  %v3689_v16 = vsel %vm1639_vm7, %v5941_v38, 0.0 }
0x28c5   : > { %3690 = vadd.xlane.f32.xlu1 %v3689_v16 }
0x28d6   : > { %3846 = vrot.lane.b32.xlu1 %v3516_v30, %s6017_s8 }
0x28da   : > { %3696 = vrot.lane.b32.xlu0 %v3516_v30, %s6018_s11 }
0x2951   : > { %v3688_v4 = vpop.xlane.xlu0 %3687 }
0x2952   : > { %5942 = vrcp.f32 %v3688_v4  ;;  %v3691_v23 = vpop.xlane.xlu1 %3690 }
0x2953   : > { %5944 = vrcp.f32 %v3691_v23 }
0x2955   : > { %v3697_v36 = vpop.permute.xlu0 %3696 }
0x2956   : > { %5553 = vmatpush3.msra.mxu0 %v3697_v36  ;;  %v3847_v22 = vpop.permute.xlu1 %3846 }
0x2957   : > { %5564 = vmatprep.subr.mxu0 %v6013_v31 }
0x295c   : > { %v5943_v46 = vpop.eup %5942 }
0x295d   : > { %v3693_v61 = vmul.f32 %v5943_v46, %v5939_v7  ;;  %v5945_v35 = vpop.eup %5944 }
0x295e   : > { %v3695_v41 = vmul.f32 %v5945_v35, %v5941_v38 }
0x295f   : > { %5555 = vmatmul.mubr.msk.f32.vlgmr.msra.gmra.mrb[36].mxu0 %vm1639_vm7, %v3693_v61 }
0x2960   : > { %5565 = vmatpush3.msra.mxu0 %v3847_v22  ;;  %5566 = vmatprep.mubr.msk.f32.mxu0 %vm6012_vm4, %v6013_v31 }
0x2961   : > { %5803 = vmatprep.subr.bf16.mxu0 %v6716_v51 }
0x2963   : > { %5567 = vmatmul.mubr.msk.f32.vlgmr.msra.gmra.mrb[38].mxu0 %vm1639_vm7, %v3695_v41 }
0x2964   : > { %5805 = vmatpush3.bf16.msra.mxu0 %v6355_v52  ;;  %5584 = vmatprep.mubr.msk.f32.mxu0 %vm6012_vm4, %v6013_v31 }
0x2965   : > { %5806 = vmatprep.subr.bf16.mxu0 %v6716_v51 }
0x2968   : > { %5808 = vmatpush3.bf16.msra.mxu0 %v6359_v53 }
0x2969   : > { %5815 = vmatprep.subr.bf16.mxu0 %v6716_v51 }
0x2a32   : > { %v3768_v25 = vpop.f32.mrb[36].mxu0 }
0x2a33   : > { %v5556_v49 = vpop.f32.mrb[37].mxu0  ;;  %5562 = vmatmul.mubr.msk.f32.vlgmr.msra.gmra.mrb[34].mxu1 %vm1017_vm6, %v3768_v25 }
0x2a34   : > { %5802 = vmatpush3.bf16.msra.mxu1 %v6339_v19  ;;  %5573 = vmatprep.mubr.msk.f32.mxu1 %vm6012_vm4, %v6013_v31 }
0x2a35   : > { %5809 = vmatprep.subr.bf16.mxu1 %v6716_v51 }
0x2a36   : > { %v3918_v52 = vpop.f32.mrb[38].mxu0 }
0x2a37   : > { %v5568_v15 = vpop.f32.mrb[39].mxu0  ;;  %5574 = vmatmul.mubr.msk.f32.vlgmr.msra.gmra.mrb[36].mxu1 %vm1017_vm6, %v3918_v52 }
0x2a38   : > { %5811 = vmatpush3.bf16.msra.mxu1 %v6363_v54  ;;  %5595 = vmatprep.mubr.msk.f32.mxu1 %vm6012_vm4, %v6013_v31 }
0x2a39   : > { %5812 = vmatprep.subr.bf16.mxu1 %v6716_v51 }
0x2a3c   : > { %5814 = vmatpush3.bf16.msra.mxu1 %v6376_v13 }
0x2a3d   : > { %5609 = vmatprep.subr.mxu1 %v6013_v31 }
0x2b06   : > { %v3841_v19 = vpop.f32.mrb[34].mxu1 }
0x2b07   : > { %v5563_v53 = vpop.f32.mrb[35].mxu1  ;;  %v3845_v47 = vadd.f32 %v6349_v27, %v3841_v19 }
0x2b0a   : > { %v3991_v50 = vpop.f32.mrb[36].mxu1 }
0x2b0b   : > { %v3995_v55 = vadd.f32 %v3991_v50, %v3845_v47  ;;  %v5575_v30 = vpop.f32.mrb[37].mxu1 }
0x2b0d   : > { %v3996_v39 = vadd.f32 %v3995_v55, %v6554_v44 }
0x2b0f   : > { %v3997_v54 = vsel %vm616_vm3, %v3996_v39, 0.0 }
0x2b10   : > { %3998 = vadd.xlane.f32.xlu1 %v3997_v54 }
0x2b9d   : > { %v3999_v62 = vpop.xlane.xlu1 %3998 }
0x2b9e   : > { %v4000_v60 = vmul.f32 0.03125, %v3999_v62 }
0x2ba0   : > { %v4001_v12 = vsub.f32 %v3996_v39, %v4000_v60 }
0x2ba2   : > { %v4002_v18 = vmul.f32 %v4001_v12, %v4001_v12 }
0x2ba4   : > { %v4003_v13 = vsel %vm616_vm3, %v4002_v18, 0.0 }
0x2ba5   : > { %4004 = vadd.xlane.f32.xlu0 %v4003_v13 }
0x2c32   : > { %v4005_v21 = vpop.xlane.xlu0 %4004 }
0x2c33   : > { %v4006_v14 = vmul.f32 0.03125, %v4005_v21 }
0x2c35   : > { %v4007_v43 = vadd.f32 1e-05, %v4006_v14 }
0x2c37   : > { %5946 = vrsqrt.f32 %v4007_v43 }
0x2c41   : > { %v5947_v27 = vpop.eup %5946 }
0x2c42   : > { %v4009_v28 = vmul.f32 %v5947_v27, %v4001_v12 }
0x2c44   : > { %v4010_v29 = vmul.f32 %v6367_v5, %v4009_v28 }
0x2c46   : > { %v4011_v44 = vadd.f32 %v6369_v6, %v4010_v29 }
0x2c48   : > { %5585 = vmatmul.mubr.msk.f32.vlgmr.msra.gmra.mrb[40].mxu0 %vm616_vm3, %v4011_v44 }
0x2c49   : > { %5817 = vmatpush3.bf16.msra.mxu0 %v6395_v58  ;;  %5606 = vmatprep.mubr.msk.f32.mxu0 %vm6012_vm4, %v6013_v31 }
0x2c4a   : > { %5818 = vmatprep.subr.bf16.mxu0 %v6716_v51 }
0x2c4d   : > { %5820 = vmatpush3.bf16.msra.mxu0 %v6399_v63 }
0x2c4e   : > { %5619 = vmatprep.subr.mxu0 %v6013_v31 }
0x2d1b   : > { %v4081_v56 = vpop.f32.mrb[40].mxu0 }
0x2d1c   : > { %v4082_v3 = vadd.f32 %v6380_v26, %v4081_v56  ;;  %v5586_v45 = vpop.f32.mrb[41].mxu0 }
0x2d1e   : > { %v4085_v5 = vmax.f32 %v4082_v3, 0.0 }
0x2d20   : > { %5596 = vmatmul.mubr.msk.f32.vlgmr.msra.gmra.mrb[38].mxu1 %vm616_vm3, %v4085_v5 }
0x2d21   : > { %5611 = vmatprep.mubr.msk.f32.mxu1 %vm6012_vm4, %v6013_v31 }
0x2df3   : > { %v4155_v6 = vpop.f32.mrb[38].mxu1 }
0x2df4   : > { %v4156_v58 = vadd.f32 %v6386_v37, %v4155_v6  ;;  %v5597_v8 = vpop.f32.mrb[39].mxu1 }
0x2df6   : > { %v6629_v59 = vadd.f32 %v4156_v58, %v3996_v39 }
0x2df8   : > { %v4160_v63 = vsel %vm616_vm3, %v6629_v59, 0.0 }
0x2df9   : > { %4161 = vadd.xlane.f32.xlu0 %v4160_v63 }
0x2e86   : > { %v4162_v20 = vpop.xlane.xlu0 %4161 }
0x2e87   : > { %v4163_v7 = vmul.f32 0.03125, %v4162_v20 }
0x2e89   : > { %v4164_v26 = vsub.f32 %v6629_v59, %v4163_v7 }
0x2e8b   : > { %v4165_v38 = vmul.f32 %v4164_v26, %v4164_v26 }
0x2e8d   : > { %v4166_v0 = vsel %vm616_vm3, %v4165_v38, 0.0 }
0x2e8e   : > { %4167 = vadd.xlane.f32.xlu1 %v4166_v0 }
0x2f1b   : > { %v4168_v16 = vpop.xlane.xlu1 %4167 }
0x2f1c   : > { %v4169_v4 = vmul.f32 0.03125, %v4168_v16 }
0x2f1e   : > { %v4170_v23 = vadd.f32 1e-05, %v4169_v4 }
0x2f20   : > { %5948 = vrsqrt.f32 %v4170_v23 }
0x2f2a   : > { %v5949_v37 = vpop.eup %5948 }
0x2f2b   : > { %v4172_v36 = vmul.f32 %v5949_v37, %v4164_v26 }
0x2f2d   : > { %v4173_v46 = vmul.f32 %v6403_v17, %v4172_v36 }
0x2f2f   : > { %v4174_v61 = vadd.f32 %v6405_v32, %v4173_v46 }
0x2f31   : > { %5607 = vmatmul.mubr.msk.f32.vlgmr.msra.gmra.mrb[42].mxu0 %vm616_vm3, %v4174_v61 }
0x2f32   : > { %5621 = vmatprep.mubr.msk.f32.mxu0 %vm6012_vm4, %v6013_v31 }
0x3004   : > { %v4244_v35 = vpop.f32.mrb[42].mxu0 }
0x3005   : > { %v4245_v22 = vadd.f32 %v6412_v33, %v4244_v35  ;;  %v5608_v41 = vpop.f32.mrb[43].mxu0 }
0x3007   : > { %4327 = vrot.lane.b32.xlu1 %v4245_v22, %s6014_s5  ;;  %4249 = vrot.lane.b32.xlu0 %v4245_v22, %s6015_s6 }
0x300b   : > { %4325 = vrot.lane.b32.xlu1 %v4245_v22, %s6016_s7 }
0x3079   : > { %v4250_v25 = vpop.permute.xlu0 %4249  ;;  %v4328_v49 = vpop.permute.xlu1 %4327 }
0x307a   : > { %5610 = vmatpush3.xpose.msk.msra.mxu1 %vm1017_vm6, %v4250_v25 }
0x307b   : > { %5614 = vmatprep.subr.mxu1 %v6013_v31 }
0x307d   : > { %5612 = vmatmul.mubr.msk.f32.vlgmr.msra.gmra.mrb[40].mxu1 %vm1017_vm6, %v4245_v22  ;;  %v4326_v17 = vpop.permute.xlu1 %4325 }
0x307e   : > { %5615 = vmatpush3.xpose.msk.msra.mxu1 %vm1017_vm6, %v4328_v49  ;;  %5616 = vmatprep.mubr.msk.f32.mxu1 %vm6012_vm4, %v6013_v31 }
0x307f   : > { %5821 = vmatprep.subr.bf16.mxu1 %v6716_v51 }
0x3081   : > { %5617 = vmatmul.mubr.msk.f32.vlgmr.msra.gmra.mrb[42].mxu1 %vm1017_vm6, %v4326_v17 }
0x3082   : > { %5823 = vmatpush3.bf16.msra.mxu1 %v6435_v48  ;;  %5628 = vmatprep.mubr.msk.f32.mxu1 %vm6012_vm4, %v6013_v31 }
0x3083   : > { %5824 = vmatprep.subr.bf16.mxu1 %v6716_v51 }
0x3150   : > { %v4321_v32 = vpop.f32.mrb[40].mxu1 }
0x3151   : > { %v5613_v33 = vpop.f32.mrb[41].mxu1  ;;  %v4403_v52 = vsel %vm1639_vm7, %v4321_v32, -inf }
0x3152   : > { %4404 = vmax.xlane.f32.xlu0 %v4403_v52 }
0x3154   : > { %v4399_v15 = vpop.f32.mrb[42].mxu1 }
0x3155   : > { %v5618_v19 = vpop.f32.mrb[43].mxu1  ;;  %v4406_v53 = vsel %vm1639_vm7, %v4399_v15, -inf }
0x3156   : > { %4407 = vmax.xlane.f32.xlu1 %v4406_v53 }
0x3167   : > { %4425 = vrot.lane.b32.xlu1 %v4245_v22, %s6018_s11 }
0x31df   : > { %v4405_v47 = vpop.xlane.xlu0 %4404 }
0x31e0   : > { %v4409_v50 = vsub.f32 %v4321_v32, %v4405_v47 }
0x31e2   : > { %v4411_v48 = vmul.f32 1.442695, %v4409_v50 }
0x31e3   : > { %v4408_v55 = vpop.xlane.xlu1 %4407 }
0x31e4   : > { %5950 = vpow2.f32 %v4411_v48  ;;  %v4410_v30 = vsub.f32 %v4399_v15, %v4408_v55 }
0x31e6   : > { %v4413_v39 = vmul.f32 1.442695, %v4410_v30 }
0x31e7   : > { %v4426_v54 = vpop.permute.xlu1 %4425 }
0x31e8   : > { %5952 = vpow2.f32 %v4413_v39  ;;  %5620 = vmatpush3.msra.mxu0 %v4426_v54 }
0x31e9   : > { %5631 = vmatprep.subr.mxu0 %v6013_v31 }
0x31ee   : > { %v5951_v62 = vpop.eup %5950 }
0x31ef   : > { %v4415_v60 = vsel %vm1639_vm7, %v5951_v62, 0.0 }
0x31f0   : > { %4416 = vadd.xlane.f32.xlu0 %v4415_v60 }
0x31f2   : > { %v5953_v12 = vpop.eup %5952 }
0x31f3   : > { %v4418_v18 = vsel %vm1639_vm7, %v5953_v12, 0.0 }
0x31f4   : > { %4419 = vadd.xlane.f32.xlu0 %v4418_v18 }
0x320a   : > { %4575 = vrot.lane.b32.xlu0 %v4245_v22, %s6017_s8 }
0x327d   : > { %v4417_v13 = vpop.xlane.xlu0 %4416 }
0x327e   : > { %5954 = vrcp.f32 %v4417_v13 }
0x3281   : > { %v4420_v21 = vpop.xlane.xlu0 %4419 }
0x3282   : > { %5956 = vrcp.f32 %v4420_v21 }
0x3285   : > { %v4576_v27 = vpop.permute.xlu0 %4575 }
0x3288   : > { %v5955_v14 = vpop.eup %5954 }
0x3289   : > { %v4422_v43 = vmul.f32 %v5955_v14, %v5951_v62 }
0x328b   : > { %5622 = vmatmul.mubr.msk.f32.vlgmr.msra.gmra.mrb[44].mxu0 %vm1639_vm7, %v4422_v43 }
0x328c   : > { %v5957_v28 = vpop.eup %5956  ;;  %5632 = vmatpush3.msra.mxu0 %v4576_v27  ;;  %5633 = vmatprep.mubr.msk.f32.mxu0 %vm6012_vm4, %v6013_v31 }
0x328d   : > { %v4424_v29 = vmul.f32 %v5957_v28, %v5953_v12  ;;  %5827 = vmatprep.subr.bf16.mxu0 %v6716_v51 }
0x328f   : > { %5634 = vmatmul.mubr.msk.f32.vlgmr.msra.gmra.mrb[46].mxu0 %vm1639_vm7, %v4424_v29 }
0x3290   : > { %5829 = vmatpush3.bf16.msra.mxu0 %v6462_v9  ;;  %5651 = vmatprep.mubr.msk.f32.mxu0 %vm6012_vm4, %v6013_v31 }
0x3291   : > { %5830 = vmatprep.subr.bf16.mxu0 %v6716_v51 }
0x3294   : > { %5832 = vmatpush3.bf16.msra.mxu0 %v6466_v10 }
0x335e   : > { %v4497_v44 = vpop.f32.mrb[44].mxu0 }
0x335f   : > { %v5623_v56 = vpop.f32.mrb[45].mxu0  ;;  %5629 = vmatmul.mubr.msk.f32.vlgmr.msra.gmra.mrb[44].mxu1 %vm1017_vm6, %v4497_v44 }
0x3360   : > { %5826 = vmatpush3.bf16.msra.mxu1 %v6446_v1  ;;  %5640 = vmatprep.mubr.msk.f32.mxu1 %vm6012_vm4, %v6013_v31 }
0x3361   : > { %5833 = vmatprep.subr.bf16.mxu1 %v6716_v51 }
0x3362   : > { %v4647_v3 = vpop.f32.mrb[46].mxu0 }
0x3363   : > { %v5635_v9 = vpop.f32.mrb[47].mxu0  ;;  %5641 = vmatmul.mubr.msk.f32.vlgmr.msra.gmra.mrb[46].mxu1 %vm1017_vm6, %v4647_v3 }
0x3364   : > { %5835 = vmatpush3.bf16.msra.mxu1 %v6470_v42  ;;  %5662 = vmatprep.mubr.msk.f32.mxu1 %vm6012_vm4, %v6013_v31 }
0x3365   : > { %5836 = vmatprep.subr.bf16.mxu1 %v6716_v51 }
0x3368   : > { %5838 = vmatpush3.bf16.msra.mxu1 %v6473_v11 }
0x3432   : > { %v4570_v10 = vpop.f32.mrb[44].mxu1 }
0x3433   : > { %v5630_v1 = vpop.f32.mrb[45].mxu1  ;;  %v4574_v45 = vadd.f32 %v6456_v34, %v4570_v10 }
0x3436   : > { %v4720_v5 = vpop.f32.mrb[46].mxu1 }
0x3437   : > { %v4724_v6 = vadd.f32 %v4720_v5, %v4574_v45  ;;  %v5642_v58 = vpop.f32.mrb[47].mxu1 }
0x3439   : > { %v4725_v8 = vadd.f32 %v4724_v6, %v6629_v59 }
0x343b   : > { %v4726_v63 = vsel %vm616_vm3, %v4725_v8, 0.0 }
0x343c   : > { %4727 = vadd.xlane.f32.xlu1 %v4726_v63 }
0x34c9   : > { %v4728_v42 = vpop.xlane.xlu1 %4727 }
0x34ca   : > { %v4729_v20 = vmul.f32 0.03125, %v4728_v42 }
0x34cc   : > { %v4730_v7 = vsub.f32 %v4725_v8, %v4729_v20 }
0x34ce   : > { %v4731_v31 = vmul.f32 %v4730_v7, %v4730_v7 }
0x34d0   : > { %v4732_v51 = vsel %vm616_vm3, %v4731_v31, 0.0 }
0x34d1   : > { %4733 = vadd.xlane.f32.xlu0 %v4732_v51 }
0x355e   : > { %v4734_v11 = vpop.xlane.xlu0 %4733 }
0x355f   : > { %v4735_v26 = vmul.f32 0.03125, %v4734_v11 }
0x3561   : > { %v4736_v38 = vadd.f32 1e-05, %v4735_v26 }
0x3563   : > { %5958 = vrsqrt.f32 %v4736_v38 }
0x356d   : > { %v5959_v34 = vpop.eup %5958 }
0x356e   : > { %v4738_v0 = vmul.f32 %v5959_v34, %v4730_v7 }
0x3570   : > { %v4739_v16 = vmul.f32 %v6478_v40, %v4738_v0 }
0x3572   : > { %v4740_v59 = vadd.f32 %v6480_v2, %v4739_v16 }
0x3574   : > { %5652 = vmatmul.mubr.msk.f32.vlgmr.msra.gmra.mrb[48].mxu0 %vm616_vm3, %v4740_v59 }
0x3647   : > { %v4810_v4 = vpop.f32.mrb[48].mxu0 }
0x3648   : > { %v4811_v23 = vadd.f32 %v6491_v57, %v4810_v4  ;;  %v5653_v37 = vpop.f32.mrb[49].mxu0 }
0x364a   : > { %v4814_v36 = vmax.f32 %v4811_v23, 0.0 }
0x364c   : > { %5663 = vmatmul.mubr.msk.f32.vlgmr.msra.gmra.mrb[48].mxu1 %vm616_vm3, %v4814_v36 }
0x371f   : > { %v4884_v46 = vpop.f32.mrb[48].mxu1 }
0x3720   : > { %v4885_v61 = vadd.f32 %v6501_v24, %v4884_v46  ;;  %v5664_v35 = vpop.f32.mrb[49].mxu1 }
0x3722   : > { %v4888_v40 = vadd.f32 %v4885_v61, %v4725_v8 }
0x3724   : > { %4889 = vst.msk [vmem:[%s156_s15] sm:$0xff] %vm616_vm3, %v4888_v40 }
0x3725 PF: > { %s13_s9 = sadd.s32 1, %s5998_s9  }
0x3726   : > { %p10_p3 = scmp.ge.s32.totalorder %s13_s9, 4  }
0x3728   :  { %12 = sbr.rel (!%p10_p3) target bundleno = 1 (0x1), region = 63 }
0x372f   :  { %4909 = vsyncpa [#allocation3], 1 }
0x3730   :  { %4911 = vsyncpa [#allocation3 + $0x1], 1 }

</bundles_post_ra>
